<compile_context>
chip_gen: v6e
topology: v6e:2x2x1
jax: 0.10.0
libtpu: 0.0.40
codegen_flags: <defaults>
</compile_context>

<pallas_src>
import functools

import jax
import jax.numpy as jnp
from jax.experimental import pallas as pl
from jax.experimental.pallas import tpu as pltpu


def _round_up(n, m):
    return (n + m - 1) // m * m


def _pad2(a, rows, cols):
    return jnp.pad(a, ((0, rows - a.shape[0]), (0, cols - a.shape[1])))


def make_dims(input_dim=784, hidden_dim=400, latent_dim=20, num_classes=10):
    return {
        "input_dim": input_dim,
        "hidden_dim": hidden_dim,
        "latent_dim": latent_dim,
        "num_classes": num_classes,
        "in_pad": _round_up(input_dim, 128),
        "hid_pad": _round_up(hidden_dim, 128),
        "lat_pad": _round_up(latent_dim, 128),
        "cls_pad": _round_up(num_classes, 128),
    }


# ----------------------------------------------------------------------------
# Kernel
# ----------------------------------------------------------------------------
def _cvae_kernel(
    # activation tiles (TB, feat_pad), f32
    x_ref, y_ref, eps_ref,
    # encoder params (VMEM-resident, bf16 weights / f32 biases)
    w1x_ref, w1y_ref, b1_ref,
    w2_ref, b2_ref,                 # fused fc21|fc22
    # decoder params
    w3z_ref, w3y_ref, b3_ref,
    w4_ref, b4_ref,
    # outputs
    recon_ref, mu_ref, logvar_ref,
    *, lat_pad,
):
    x = x_ref[...].astype(jnp.bfloat16)
    y = y_ref[...].astype(jnp.bfloat16)
    eps = eps_ref[...]

    # ---- encode: h1 = relu(fc1(cat(x, y))) ----
    h1 = (
        jnp.dot(x, w1x_ref[...], preferred_element_type=jnp.float32)
        + jnp.dot(y, w1y_ref[...], preferred_element_type=jnp.float32)
        + b1_ref[...]
    )
    h1 = jnp.maximum(h1, 0.0)

    # ---- fused mu/logvar projection: one (TB, hid) @ (hid, 2*lat_pad) ----
    stats = (
        jnp.dot(h1.astype(jnp.bfloat16), w2_ref[...],
                preferred_element_type=jnp.float32)
        + b2_ref[...]
    )
    mu = stats[:, :lat_pad]          # lane-128 aligned static slices
    logvar = stats[:, lat_pad:]

    # ---- reparameterize: z = mu + eps * exp(0.5 * logvar) (f32 elementwise) ----
    z = mu + eps * jnp.exp(0.5 * logvar)

    # ---- decode: sigmoid(fc4(relu(fc3(cat(z, y))))) ----
    h3 = (
        jnp.dot(z.astype(jnp.bfloat16), w3z_ref[...], preferred_element_type=jnp.float32)
        + jnp.dot(y, w3y_ref[...], preferred_element_type=jnp.float32)
        + b3_ref[...]
    )
    h3 = jnp.maximum(h3, 0.0)

    logits = (
        jnp.dot(h3.astype(jnp.bfloat16), w4_ref[...], preferred_element_type=jnp.float32)
        + b4_ref[...]
    )

    recon_ref[...] = jax.nn.sigmoid(logits).astype(recon_ref.dtype)
    mu_ref[...] = mu.astype(mu_ref.dtype)
    logvar_ref[...] = logvar.astype(logvar_ref.dtype)


# ----------------------------------------------------------------------------
# Wrapper
# ----------------------------------------------------------------------------
def cvae_forward(x, y, eps, packed, dims):
    """CVAE forward pass in one Pallas kernel.

    x:   (B, input_dim) f32; y: (B, num_classes) f32 one-hot; eps: (B, latent_dim) f32.
    Returns (reconstruction, mu, logvar) at logical shapes.
    """
    B = x.shape[0]
    in_pad, hid_pad = dims["in_pad"], dims["hid_pad"]
    lat_pad, cls_pad = dims["lat_pad"], dims["cls_pad"]
    input_dim, latent_dim = dims["input_dim"], dims["latent_dim"]

    # Batch tiling: largest tile up to 256 rows (sublane-aligned); pad batch.
    b8 = _round_up(B, 8)
    tb = b8 if b8 <= 256 else 256
    b_pad = _round_up(b8, tb)
    grid = (b_pad // tb,)

    x_p = _pad2(x, b_pad, in_pad)
    y_p = _pad2(y, b_pad, cls_pad)
    eps_p = _pad2(eps, b_pad, lat_pad)

    def act_spec(feat):
        return pl.BlockSpec((tb, feat), lambda i: (i, 0))

    def resident_spec(arr):
        return pl.BlockSpec(arr.shape, lambda i: (0, 0))

    param_order = ("w1x", "w1y", "b1", "w2", "b2", "w3z", "w3y", "b3", "w4", "b4")
    param_args = tuple(packed[k] for k in param_order)

    in_specs = (
        [act_spec(in_pad), act_spec(cls_pad), act_spec(lat_pad)]
        + [resident_spec(p) for p in param_args]
    )
    out_specs = (act_spec(in_pad), act_spec(lat_pad), act_spec(lat_pad))
    out_shapes = (
        jax.ShapeDtypeStruct((b_pad, in_pad), jnp.float32),   # reconstruction (padded)
        jax.ShapeDtypeStruct((b_pad, lat_pad), jnp.float32),  # mu (padded)
        jax.ShapeDtypeStruct((b_pad, lat_pad), jnp.float32),  # logvar (padded)
    )

    # Cost hint for XLA scheduling around the custom call.
    flops = 2 * b_pad * (
        in_pad * hid_pad + cls_pad * hid_pad       # fc1 (x-part + y-part)
        + hid_pad * 2 * lat_pad                    # fused fc21|fc22
        + lat_pad * hid_pad + cls_pad * hid_pad    # fc3 (z-part + y-part)
        + hid_pad * in_pad                         # fc4
    )
    transcendentals = b_pad * (lat_pad + in_pad)   # exp (reparam) + sigmoid
    weight_bytes = sum(int(p.size) * p.dtype.itemsize for p in param_args)
    act_bytes = 4 * (x_p.size + y_p.size + eps_p.size
                     + b_pad * in_pad + 2 * b_pad * lat_pad)
    cost = pl.CostEstimate(flops=flops, transcendentals=transcendentals,
                           bytes_accessed=weight_bytes + act_bytes)

    recon_p, mu_p, logvar_p = pl.pallas_call(
        functools.partial(_cvae_kernel, lat_pad=lat_pad),
        grid=grid,
        in_specs=in_specs,
        out_specs=out_specs,
        out_shape=out_shapes,
        compiler_params=pltpu.CompilerParams(
            dimension_semantics=("parallel",),
            vmem_limit_bytes=32 << 20,
        ),
        cost_estimate=cost,
    )(x_p, y_p, eps_p, *param_args)

    return (
        recon_p[:B, :input_dim],
        mu_p[:B, :latent_dim],
        logvar_p[:B, :latent_dim],
    )


# ----------------------------------------------------------------------------
# Parameter init (PyTorch nn.Linear-like) + packing for the kernel
# ----------------------------------------------------------------------------
def init_params(key, dims):
    """Uniform +-1/sqrt(fan_in) init; weights stored pre-transposed as (in, out).
    fc1 / fc3 weights are split into the x-/z-part and y-part of the cat input."""
    input_dim, hidden_dim = dims["input_dim"], dims["hidden_dim"]
    latent_dim, num_classes = dims["latent_dim"], dims["num_classes"]

    def linear(k, fan_in, fan_out):
        kw, kb = jax.random.split(k)
        bound = 1.0 / jnp.sqrt(fan_in)
        w = jax.random.uniform(kw, (fan_in, fan_out), jnp.float32, -bound, bound)
        b = jax.random.uniform(kb, (1, fan_out), jnp.float32, -bound, bound)
        return w, b

    k1, k2, k3, k4, k5 = jax.random.split(key, 5)
    w1, b1 = linear(k1, input_dim + num_classes, hidden_dim)
    w21, b21 = linear(k2, hidden_dim, latent_dim)
    w22, b22 = linear(k3, hidden_dim, latent_dim)
    w3, b3 = linear(k4, latent_dim + num_classes, hidden_dim)
    w4, b4 = linear(k5, hidden_dim, input_dim)

    return {
        "w1x": w1[:input_dim], "w1y": w1[input_dim:], "b1": b1,
        "w21": w21, "b21": b21, "w22": w22, "b22": b22,
        "w3z": w3[:latent_dim], "w3y": w3[latent_dim:], "b3": b3,
        "w4": w4, "b4": b4,
    }


def pack_params(params, dims):
    """Pad all feature dims to multiples of 128, fuse fc21|fc22, cast weights to bf16."""
    in_pad, hid_pad = dims["in_pad"], dims["hid_pad"]
    lat_pad, cls_pad = dims["lat_pad"], dims["cls_pad"]

    def pw(w, r, c):
        return _pad2(w, r, c).astype(jnp.bfloat16)

    def pb(b, c):
        return _pad2(b, 1, c)  # biases stay f32

    w2 = jnp.concatenate(
        [_pad2(params["w21"], hid_pad, lat_pad), _pad2(params["w22"], hid_pad, lat_pad)],
        axis=1).astype(jnp.bfloat16)
    b2 = jnp.concatenate([pb(params["b21"], lat_pad), pb(params["b22"], lat_pad)], axis=1)

    return {
        "w1x": pw(params["w1x"], in_pad, hid_pad),
        "w1y": pw(params["w1y"], cls_pad, hid_pad),
        "b1": pb(params["b1"], hid_pad),
        "w2": w2, "b2": b2,
        "w3z": pw(params["w3z"], lat_pad, hid_pad),
        "w3y": pw(params["w3y"], cls_pad, hid_pad),
        "b3": pb(params["b3"], hid_pad),
        "w4": pw(params["w4"], hid_pad, in_pad),
        "b4": pb(params["b4"], in_pad),
    }


# ----------------------------------------------------------------------------
# Pure-JAX reference (same bf16 matmul inputs / f32 accumulation as the kernel)
# ----------------------------------------------------------------------------
def cvae_reference(x, y, eps, packed, dims):
    B = x.shape[0]
    in_pad, lat_pad, cls_pad = dims["in_pad"], dims["lat_pad"], dims["cls_pad"]
    input_dim, latent_dim = dims["input_dim"], dims["latent_dim"]

    b8 = _round_up(B, 8)
    xb = _pad2(x, b8, in_pad).astype(jnp.bfloat16)
    yb = _pad2(y, b8, cls_pad).astype(jnp.bfloat16)
    ep = _pad2(eps, b8, lat_pad)

    f32 = jnp.float32
    h1 = jax.nn.relu(
        jnp.dot(xb, packed["w1x"], preferred_element_type=f32)
        + jnp.dot(yb, packed["w1y"], preferred_element_type=f32)
        + packed["b1"])
    stats = jnp.dot(h1.astype(jnp.bfloat16), packed["w2"],
                    preferred_element_type=f32) + packed["b2"]
    mu, logvar = stats[:, :lat_pad], stats[:, lat_pad:]
    z = mu + ep * jnp.exp(0.5 * logvar)
    h3 = jax.nn.relu(
        jnp.dot(z.astype(jnp.bfloat16), packed["w3z"], preferred_element_type=f32)
        + jnp.dot(yb, packed["w3y"], preferred_element_type=f32)
        + packed["b3"])
    recon = jax.nn.sigmoid(
        jnp.dot(h3.astype(jnp.bfloat16), packed["w4"], preferred_element_type=f32)
        + packed["b4"])
    return recon[:B, :input_dim], mu[:B, :latent_dim], logvar[:B, :latent_dim]


if __name__ == "__main__":
    INPUT_DIM, HIDDEN_DIM, LATENT_DIM, NUM_CLASSES = 784, 400, 20, 10
    BATCH = 8

    dims = make_dims(INPUT_DIM, HIDDEN_DIM, LATENT_DIM, NUM_CLASSES)

    root = jax.random.PRNGKey(0)
    k_params, k_x, k_y, k_eps = jax.random.split(root, 4)

    params = init_params(k_params, dims)
    packed = pack_params(params, dims)

    x = jax.random.uniform(k_x, (BATCH, INPUT_DIM), jnp.float32)  # MNIST-like [0,1)
    labels = jax.random.randint(k_y, (BATCH,), 0, NUM_CLASSES)
    y = jax.nn.one_hot(labels, NUM_CLASSES, dtype=jnp.float32)
    # eps corresponds to torch.randn_like(std); drawn in the wrapper so the
    # kernel is deterministic given its inputs.
    eps = jax.random.normal(k_eps, (BATCH, LATENT_DIM), jnp.float32)

    recon, mu, logvar = jax.block_until_ready(cvae_forward(x, y, eps, packed, dims))

    ref_recon, ref_mu, ref_logvar = cvae_reference(x, y, eps, packed, dims)

    assert recon.shape == (BATCH, INPUT_DIM)
    assert mu.shape == (BATCH, LATENT_DIM)
    assert logvar.shape == (BATCH, LATENT_DIM)
    assert bool(jnp.all(jnp.isfinite(recon)))
    assert jnp.allclose(recon, ref_recon, atol=2e-2, rtol=2e-2)
    assert jnp.allclose(mu, ref_mu, atol=2e-2, rtol=2e-2)
    assert jnp.allclose(logvar, ref_logvar, atol=2e-2, rtol=2e-2)

    print("KERNEL_OK")
</pallas_src>

<mosaic_0001>
module attributes {stable_mosaic.version = 11 : i64} {
  func.func @_cvae_kernel(%arg0: i32, %arg1: memref<8x896xf32, #tpu.memory_space<vmem>>, %arg2: memref<8x128xf32, #tpu.memory_space<vmem>>, %arg3: memref<8x128xf32, #tpu.memory_space<vmem>>, %arg4: memref<896x512xbf16, #tpu.memory_space<vmem>>, %arg5: memref<128x512xbf16, #tpu.memory_space<vmem>>, %arg6: memref<1x512xf32, #tpu.memory_space<vmem>>, %arg7: memref<512x256xbf16, #tpu.memory_space<vmem>>, %arg8: memref<1x256xf32, #tpu.memory_space<vmem>>, %arg9: memref<128x512xbf16, #tpu.memory_space<vmem>>, %arg10: memref<128x512xbf16, #tpu.memory_space<vmem>>, %arg11: memref<1x512xf32, #tpu.memory_space<vmem>>, %arg12: memref<512x896xbf16, #tpu.memory_space<vmem>>, %arg13: memref<1x896xf32, #tpu.memory_space<vmem>>, %arg14: memref<8x896xf32, #tpu.memory_space<vmem>>, %arg15: memref<8x128xf32, #tpu.memory_space<vmem>>, %arg16: memref<8x128xf32, #tpu.memory_space<vmem>>) attributes {dimension_semantics = [#tpu.dimension_semantics<parallel>], iteration_bounds = array<i64: 1>, scalar_prefetch = 0 : i64, scratch_operands = 0 : i64, tpu.core_type = #tpu.core_type<tc>, window_params = [{transform_indices = @transform_0, window_bounds = array<i64: 8, 896>}, {transform_indices = @transform_1, window_bounds = array<i64: 8, 128>}, {transform_indices = @transform_2, window_bounds = array<i64: 8, 128>}, {pipeline_mode = #tpu.pipeline_mode<synchronous>, transform_indices = @transform_3, window_bounds = array<i64: 896, 512>}, {pipeline_mode = #tpu.pipeline_mode<synchronous>, transform_indices = @transform_4, window_bounds = array<i64: 128, 512>}, {pipeline_mode = #tpu.pipeline_mode<synchronous>, transform_indices = @transform_5, window_bounds = array<i64: 1, 512>}, {pipeline_mode = #tpu.pipeline_mode<synchronous>, transform_indices = @transform_6, window_bounds = array<i64: 512, 256>}, {pipeline_mode = #tpu.pipeline_mode<synchronous>, transform_indices = @transform_7, window_bounds = array<i64: 1, 256>}, {pipeline_mode = #tpu.pipeline_mode<synchronous>, transform_indices = @transform_8, window_bounds = array<i64: 128, 512>}, {pipeline_mode = #tpu.pipeline_mode<synchronous>, transform_indices = @transform_9, window_bounds = array<i64: 128, 512>}, {pipeline_mode = #tpu.pipeline_mode<synchronous>, transform_indices = @transform_10, window_bounds = array<i64: 1, 512>}, {pipeline_mode = #tpu.pipeline_mode<synchronous>, transform_indices = @transform_11, window_bounds = array<i64: 512, 896>}, {pipeline_mode = #tpu.pipeline_mode<synchronous>, transform_indices = @transform_12, window_bounds = array<i64: 1, 896>}, {transform_indices = @transform_13, window_bounds = array<i64: 8, 896>}, {transform_indices = @transform_14, window_bounds = array<i64: 8, 128>}, {transform_indices = @transform_15, window_bounds = array<i64: 8, 128>}]} {
    %c0 = arith.constant 0 : index
    %c0_0 = arith.constant 0 : index
    %0 = vector.load %arg1[%c0, %c0_0] : memref<8x896xf32, #tpu.memory_space<vmem>>, vector<8x896xf32>
    %1 = arith.truncf %0 : vector<8x896xf32> to vector<8x896xbf16>
    %c0_1 = arith.constant 0 : index
    %c0_2 = arith.constant 0 : index
    %2 = vector.load %arg2[%c0_1, %c0_2] : memref<8x128xf32, #tpu.memory_space<vmem>>, vector<8x128xf32>
    %3 = arith.truncf %2 : vector<8x128xf32> to vector<8x128xbf16>
    %c0_3 = arith.constant 0 : index
    %c0_4 = arith.constant 0 : index
    %4 = vector.load %arg3[%c0_3, %c0_4] : memref<8x128xf32, #tpu.memory_space<vmem>>, vector<8x128xf32>
    %c0_5 = arith.constant 0 : index
    %c0_6 = arith.constant 0 : index
    %5 = vector.load %arg4[%c0_5, %c0_6] : memref<896x512xbf16, #tpu.memory_space<vmem>>, vector<896x512xbf16>
    %cst = arith.constant dense<0.000000e+00> : vector<8x512xf32>
    %6 = tpu.matmul %1, %5, %cst {dimension_numbers = #tpu.dot_dimension_numbers<[1], [0], [0], [1], [0, 0, 1, 1], [], []>} : vector<8x896xbf16>, vector<896x512xbf16>, vector<8x512xf32> -> vector<8x512xf32>
    %c0_7 = arith.constant 0 : index
    %c0_8 = arith.constant 0 : index
    %7 = vector.load %arg5[%c0_7, %c0_8] : memref<128x512xbf16, #tpu.memory_space<vmem>>, vector<128x512xbf16>
    %cst_9 = arith.constant dense<0.000000e+00> : vector<8x512xf32>
    %8 = tpu.matmul %3, %7, %cst_9 {dimension_numbers = #tpu.dot_dimension_numbers<[1], [0], [0], [1], [0, 0, 1, 1], [], []>} : vector<8x128xbf16>, vector<128x512xbf16>, vector<8x512xf32> -> vector<8x512xf32>
    %9 = arith.addf %6, %8 : vector<8x512xf32>
    %c0_10 = arith.constant 0 : index
    %c0_11 = arith.constant 0 : index
    %10 = vector.load %arg6[%c0_10, %c0_11] : memref<1x512xf32, #tpu.memory_space<vmem>>, vector<1x512xf32>
    %11 = vector.broadcast %10 : vector<1x512xf32> to vector<8x512xf32>
    %12 = arith.addf %9, %11 : vector<8x512xf32>
    %cst_12 = arith.constant 0.000000e+00 : f32
    %13 = vector.broadcast %cst_12 : f32 to vector<8x512xf32>
    %14 = arith.maximumf %12, %13 : vector<8x512xf32>
    %15 = arith.truncf %14 : vector<8x512xf32> to vector<8x512xbf16>
    %c0_13 = arith.constant 0 : index
    %c0_14 = arith.constant 0 : index
    %16 = vector.load %arg7[%c0_13, %c0_14] : memref<512x256xbf16, #tpu.memory_space<vmem>>, vector<512x256xbf16>
    %cst_15 = arith.constant dense<0.000000e+00> : vector<8x256xf32>
    %17 = tpu.matmul %15, %16, %cst_15 {dimension_numbers = #tpu.dot_dimension_numbers<[1], [0], [0], [1], [0, 0, 1, 1], [], []>} : vector<8x512xbf16>, vector<512x256xbf16>, vector<8x256xf32> -> vector<8x256xf32>
    %c0_16 = arith.constant 0 : index
    %c0_17 = arith.constant 0 : index
    %18 = vector.load %arg8[%c0_16, %c0_17] : memref<1x256xf32, #tpu.memory_space<vmem>>, vector<1x256xf32>
    %19 = vector.broadcast %18 : vector<1x256xf32> to vector<8x256xf32>
    %20 = arith.addf %17, %19 : vector<8x256xf32>
    %21 = vector.extract_strided_slice %20 {offsets = [0, 0], sizes = [8, 128], strides = [1, 1]} : vector<8x256xf32> to vector<8x128xf32>
    %22 = vector.extract_strided_slice %20 {offsets = [0, 128], sizes = [8, 128], strides = [1, 1]} : vector<8x256xf32> to vector<8x128xf32>
    %cst_18 = arith.constant 5.000000e-01 : f32
    %23 = vector.broadcast %cst_18 : f32 to vector<8x128xf32>
    %24 = arith.mulf %23, %22 : vector<8x128xf32>
    %25 = math.exp %24 : vector<8x128xf32>
    %26 = arith.mulf %4, %25 : vector<8x128xf32>
    %27 = arith.addf %21, %26 : vector<8x128xf32>
    %28 = arith.truncf %27 : vector<8x128xf32> to vector<8x128xbf16>
    %c0_19 = arith.constant 0 : index
    %c0_20 = arith.constant 0 : index
    %29 = vector.load %arg9[%c0_19, %c0_20] : memref<128x512xbf16, #tpu.memory_space<vmem>>, vector<128x512xbf16>
    %cst_21 = arith.constant dense<0.000000e+00> : vector<8x512xf32>
    %30 = tpu.matmul %28, %29, %cst_21 {dimension_numbers = #tpu.dot_dimension_numbers<[1], [0], [0], [1], [0, 0, 1, 1], [], []>} : vector<8x128xbf16>, vector<128x512xbf16>, vector<8x512xf32> -> vector<8x512xf32>
    %c0_22 = arith.constant 0 : index
    %c0_23 = arith.constant 0 : index
    %31 = vector.load %arg10[%c0_22, %c0_23] : memref<128x512xbf16, #tpu.memory_space<vmem>>, vector<128x512xbf16>
    %cst_24 = arith.constant dense<0.000000e+00> : vector<8x512xf32>
    %32 = tpu.matmul %3, %31, %cst_24 {dimension_numbers = #tpu.dot_dimension_numbers<[1], [0], [0], [1], [0, 0, 1, 1], [], []>} : vector<8x128xbf16>, vector<128x512xbf16>, vector<8x512xf32> -> vector<8x512xf32>
    %33 = arith.addf %30, %32 : vector<8x512xf32>
    %c0_25 = arith.constant 0 : index
    %c0_26 = arith.constant 0 : index
    %34 = vector.load %arg11[%c0_25, %c0_26] : memref<1x512xf32, #tpu.memory_space<vmem>>, vector<1x512xf32>
    %35 = vector.broadcast %34 : vector<1x512xf32> to vector<8x512xf32>
    %36 = arith.addf %33, %35 : vector<8x512xf32>
    %cst_27 = arith.constant 0.000000e+00 : f32
    %37 = vector.broadcast %cst_27 : f32 to vector<8x512xf32>
    %38 = arith.maximumf %36, %37 : vector<8x512xf32>
    %39 = arith.truncf %38 : vector<8x512xf32> to vector<8x512xbf16>
    %c0_28 = arith.constant 0 : index
    %c0_29 = arith.constant 0 : index
    %40 = vector.load %arg12[%c0_28, %c0_29] : memref<512x896xbf16, #tpu.memory_space<vmem>>, vector<512x896xbf16>
    %cst_30 = arith.constant dense<0.000000e+00> : vector<8x896xf32>
    %41 = tpu.matmul %39, %40, %cst_30 {dimension_numbers = #tpu.dot_dimension_numbers<[1], [0], [0], [1], [0, 0, 1, 1], [], []>} : vector<8x512xbf16>, vector<512x896xbf16>, vector<8x896xf32> -> vector<8x896xf32>
    %c0_31 = arith.constant 0 : index
    %c0_32 = arith.constant 0 : index
    %42 = vector.load %arg13[%c0_31, %c0_32] : memref<1x896xf32, #tpu.memory_space<vmem>>, vector<1x896xf32>
    %43 = vector.broadcast %42 : vector<1x896xf32> to vector<8x896xf32>
    %44 = arith.addf %41, %43 : vector<8x896xf32>
    %45 = arith.negf %44 : vector<8x896xf32>
    %46 = math.exp %45 : vector<8x896xf32>
    %cst_33 = arith.constant 1.000000e+00 : f32
    %47 = vector.broadcast %cst_33 : f32 to vector<8x896xf32>
    %48 = arith.addf %47, %46 : vector<8x896xf32>
    %49 = arith.divf %47, %48 : vector<8x896xf32>
    %c0_34 = arith.constant 0 : index
    %c0_35 = arith.constant 0 : index
    %50 = vector.load %arg14[%c0_34, %c0_35] : memref<8x896xf32, #tpu.memory_space<vmem>>, vector<8x896xf32>
    tpu.vector_store %arg14[%c0_34, %c0_35], %49 {strides = array<i32>} : memref<8x896xf32, #tpu.memory_space<vmem>>, vector<8x896xf32>,
    %c0_36 = arith.constant 0 : index
    %c0_37 = arith.constant 0 : index
    %51 = vector.load %arg15[%c0_36, %c0_37] : memref<8x128xf32, #tpu.memory_space<vmem>>, vector<8x128xf32>
    tpu.vector_store %arg15[%c0_36, %c0_37], %21 {strides = array<i32>} : memref<8x128xf32, #tpu.memory_space<vmem>>, vector<8x128xf32>,
    %c0_38 = arith.constant 0 : index
    %c0_39 = arith.constant 0 : index
    %52 = vector.load %arg16[%c0_38, %c0_39] : memref<8x128xf32, #tpu.memory_space<vmem>>, vector<8x128xf32>
    tpu.vector_store %arg16[%c0_38, %c0_39], %22 {strides = array<i32>} : memref<8x128xf32, #tpu.memory_space<vmem>>, vector<8x128xf32>,
    return
  }
  func.func @transform_0(%arg0: i32) -> (i32, i32) {
    %c0_i32 = arith.constant 0 : i32
    %c0_i32_0 = arith.constant 0 : i32
    return %arg0, %c0_i32 : i32, i32
  }
  func.func @transform_1(%arg0: i32) -> (i32, i32) {
    %c0_i32 = arith.constant 0 : i32
    %c0_i32_0 = arith.constant 0 : i32
    return %arg0, %c0_i32 : i32, i32
  }
  func.func @transform_2(%arg0: i32) -> (i32, i32) {
    %c0_i32 = arith.constant 0 : i32
    %c0_i32_0 = arith.constant 0 : i32
    return %arg0, %c0_i32 : i32, i32
  }
  func.func @transform_3(%arg0: i32) -> (i32, i32) {
    %c0_i32 = arith.constant 0 : i32
    %c0_i32_0 = arith.constant 0 : i32
    %c0_i32_1 = arith.constant 0 : i32
    return %c0_i32, %c0_i32_0 : i32, i32
  }
  func.func @transform_4(%arg0: i32) -> (i32, i32) {
    %c0_i32 = arith.constant 0 : i32
    %c0_i32_0 = arith.constant 0 : i32
    %c0_i32_1 = arith.constant 0 : i32
    return %c0_i32, %c0_i32_0 : i32, i32
  }
  func.func @transform_5(%arg0: i32) -> (i32, i32) {
    %c0_i32 = arith.constant 0 : i32
    %c0_i32_0 = arith.constant 0 : i32
    %c0_i32_1 = arith.constant 0 : i32
    return %c0_i32, %c0_i32_0 : i32, i32
  }
  func.func @transform_6(%arg0: i32) -> (i32, i32) {
    %c0_i32 = arith.constant 0 : i32
    %c0_i32_0 = arith.constant 0 : i32
    %c0_i32_1 = arith.constant 0 : i32
    return %c0_i32, %c0_i32_0 : i32, i32
  }
  func.func @transform_7(%arg0: i32) -> (i32, i32) {
    %c0_i32 = arith.constant 0 : i32
    %c0_i32_0 = arith.constant 0 : i32
    %c0_i32_1 = arith.constant 0 : i32
    return %c0_i32, %c0_i32_0 : i32, i32
  }
  func.func @transform_8(%arg0: i32) -> (i32, i32) {
    %c0_i32 = arith.constant 0 : i32
    %c0_i32_0 = arith.constant 0 : i32
    %c0_i32_1 = arith.constant 0 : i32
    return %c0_i32, %c0_i32_0 : i32, i32
  }
  func.func @transform_9(%arg0: i32) -> (i32, i32) {
    %c0_i32 = arith.constant 0 : i32
    %c0_i32_0 = arith.constant 0 : i32
    %c0_i32_1 = arith.constant 0 : i32
    return %c0_i32, %c0_i32_0 : i32, i32
  }
  func.func @transform_10(%arg0: i32) -> (i32, i32) {
    %c0_i32 = arith.constant 0 : i32
    %c0_i32_0 = arith.constant 0 : i32
    %c0_i32_1 = arith.constant 0 : i32
    return %c0_i32, %c0_i32_0 : i32, i32
  }
  func.func @transform_11(%arg0: i32) -> (i32, i32) {
    %c0_i32 = arith.constant 0 : i32
    %c0_i32_0 = arith.constant 0 : i32
    %c0_i32_1 = arith.constant 0 : i32
    return %c0_i32, %c0_i32_0 : i32, i32
  }
  func.func @transform_12(%arg0: i32) -> (i32, i32) {
    %c0_i32 = arith.constant 0 : i32
    %c0_i32_0 = arith.constant 0 : i32
    %c0_i32_1 = arith.constant 0 : i32
    return %c0_i32, %c0_i32_0 : i32, i32
  }
  func.func @transform_13(%arg0: i32) -> (i32, i32) {
    %c0_i32 = arith.constant 0 : i32
    %c0_i32_0 = arith.constant 0 : i32
    return %arg0, %c0_i32 : i32, i32
  }
  func.func @transform_14(%arg0: i32) -> (i32, i32) {
    %c0_i32 = arith.constant 0 : i32
    %c0_i32_0 = arith.constant 0 : i32
    return %arg0, %c0_i32 : i32, i32
  }
  func.func @transform_15(%arg0: i32) -> (i32, i32) {
    %c0_i32 = arith.constant 0 : i32
    %c0_i32_0 = arith.constant 0 : i32
    return %arg0, %c0_i32 : i32, i32
  }
}

</mosaic_0001>

<bundles_post_ra>
// kernel: tpu_custom_call.1
= control target key start
LH: loop header
LB: loop body
LE: loop exit
PB: predicated region body
PF: predicated region fallthrough
CT: control target
= control target key end

     0   :  { %21 = vsyncpa [#allocation3], 0  ;;  %s7296_s0 = inlined_call_operand.hbm [shape: f32[8,896], index: 0, kind: input, shape index: {}]   ;;  %s7297_s1 = inlined_call_operand.hbm [shape: f32[8,128], index: 1, kind: input, shape index: {}]   ;;  %s7298_s2 = inlined_call_operand.hbm [shape: f32[8,128], index: 2, kind: input, shape index: {}]   ;;  %s7299_s3 = inlined_call_operand.hbm [shape: bf16[896,512], index: 3, kind: input, shape index: {}]   ;;  %s7300_s4 = inlined_call_operand.hbm [shape: bf16[128,512], index: 4, kind: input, shape index: {}]   ;;  %s7301_s5 = inlined_call_operand.vmem [shape: f32[1,512], index: 5, kind: input, shape index: {}]   ;;  %s7302_s6 = inlined_call_operand.hbm [shape: bf16[512,256], index: 6, kind: input, shape index: {}]   ;;  %s7303_s7 = inlined_call_operand.hbm [shape: f32[1,256], index: 7, kind: input, shape index: {}]   ;;  %s7304_s8 = inlined_call_operand.hbm [shape: bf16[128,512], index: 8, kind: input, shape index: {}]   ;;  %s7305_s9 = inlined_call_operand.hbm [shape: bf16[128,512], index: 9, kind: input, shape index: {}]   ;;  %s7306_s10 = inlined_call_operand.vmem [shape: f32[1,512], index: 10, kind: input, shape index: {}]   ;;  %s7307_s11 = inlined_call_operand.hbm [shape: bf16[512,896], index: 11, kind: input, shape index: {}]   ;;  %s7308_s12 = inlined_call_operand.vmem [shape: f32[1,896], index: 12, kind: input, shape index: {}]   ;;  %s7309_s13 = inlined_call_operand.hbm [shape: f32[8,896], index: 13, kind: output, shape index: {0}]   ;;  %s7310_s14 = inlined_call_operand.hbm [shape: f32[8,128], index: 14, kind: output, shape index: {1}]   ;;  %s7311_s15 = inlined_call_operand.hbm [shape: f32[8,128], index: 15, kind: output, shape index: {2}]  }
   0x1   :  { %22 = vsyncpa [#allocation6], 0 }
   0x2   :  { %23 = vsyncpa [#allocation9], 0 }
   0x3   :  { %24 = vsyncpa [#allocation12], 0 }
   0x4   :  { %25 = vsyncpa [#allocation15], 0 }
   0x5   :  { %26 = vsyncpa [#allocation18], 0 }
   0x6   :  { %27 = vsyncpa [#allocation4], 0 }
   0x7   :  { %28 = vsyncpa [#allocation21], 0  ;;  %s6991_s18 = smov [#allocation5]   ;;  %s6992_s20 = smov [#allocation8]  }
   0x8   :  { %s45_s19 = sshll.u32 %s6991_s18, 4  ;;  %s64_s21 = sshll.u32 %s6992_s20, 4  ;;  %s46_s19 = int_to_ptr.vmem [resolvable:$true] %s45_s19  ;;  %s65_s21 = int_to_ptr.vmem [resolvable:$true] %s64_s21 }
   0x9   :  { %s6723_s22 = scalar_lea.vmem %s46_s19, 128  ;;  %p6728_p1 = scmp.lt.s32.totalorder %s46_s19, %s46_s19 }
   0xa   :  { %p6724_p0 = scmp.ne.s32.totalorder %s46_s19, %s6723_s22  ;;  %p6729_p2 = scmp.lt.s32.totalorder %s6723_s22, %s6723_s22 }
   0xc   :  { %p6730_p3 = por %p6729_p2, %p6728_p1 }
   0xe   :  { %p6731_p4 = pnand %p6730_p3, %p6724_p0 }
  0x10   :  { %6734 = shalt.err (!%p6731_p4)
}
  0x11   :  { %48 = dma.hbm_to_vmem [thread:$0]  %s7297_s1, 128, %s46_s19, [#allocation6]  }
  0x12   :  { %s6743_s25 = scalar_lea.vmem %s65_s21, 28672  ;;  %p6748_p6 = scmp.lt.s32.totalorder %s65_s21, %s65_s21 }
  0x13   :  { %p6744_p5 = scmp.ne.s32.totalorder %s65_s21, %s6743_s25  ;;  %p6749_p7 = scmp.lt.s32.totalorder %s6743_s25, %s6743_s25 }
  0x15   :  { %p6750_p8 = por %p6749_p7, %p6748_p6 }
  0x17   :  { %p6751_p9 = pnand %p6750_p8, %p6744_p5 }
  0x19   :  { %6754 = shalt.err (!%p6751_p9)
}
  0x1a   :  { %s6993_s26 = smov 256   ;;  %s6994_s27 = smov 16  }
  0x1b   :  { %70 = dma.hbm_to_vmem [thread:$0]  %s7299_s3, 28672, %s65_s21, [#allocation9], %s6993_s26, %s6993_s26, %s6994_s27  }
  0x1c   :  { %s6995_s30 = smov [#allocation11]  }
  0x1d   :  { %s90_s16 = sshll.u32 %s6995_s30, 4  ;;  %s91_s16 = int_to_ptr.vmem [resolvable:$true] %s90_s16 }
  0x1e   :  { %s6763_s1 = scalar_lea.vmem %s91_s16, 8192  ;;  %p6768_p11 = scmp.lt.s32.totalorder %s91_s16, %s91_s16 }
  0x1f   :  { %p6764_p10 = scmp.ne.s32.totalorder %s91_s16, %s6763_s1  ;;  %p6769_p12 = scmp.lt.s32.totalorder %s6763_s1, %s6763_s1 }
  0x21   :  { %p6770_p13 = por %p6769_p12, %p6768_p11 }
  0x23   :  { %p6771_p0 = pnand %p6770_p13, %p6764_p10 }
  0x25   :  { %6774 = shalt.err (!%p6771_p0)
}
  0x26   :  { %s6996_s17 = smov 128   ;;  %s6997_s18 = smov 8  }
  0x27   :  { %96 = dma.hbm_to_vmem [thread:$0]  %s7302_s6, 8192, %s91_s16, [#allocation12], %s6996_s17, %s6996_s17, %s6997_s18  }
  0x28   :  { %s6998_s22 = smov [#allocation14]   ;;  %s6999_s3 = smov [#allocation2]  }
  0x29   :  { %s112_s23 = sshll.u32 %s6998_s22, 4  ;;  %s35_s21 = sshll.u32 %s6999_s3, 4  ;;  %s113_s23 = int_to_ptr.vmem [resolvable:$true] %s112_s23  ;;  %s36_s21 = int_to_ptr.vmem [resolvable:$true] %s35_s21 }
  0x2a   :  { %s6783_s24 = scalar_lea.vmem %s113_s23, 4096  ;;  %p6788_p2 = scmp.lt.s32.totalorder %s113_s23, %s113_s23 }
  0x2b   :  { %p6784_p1 = scmp.ne.s32.totalorder %s113_s23, %s6783_s24  ;;  %p6789_p3 = scmp.lt.s32.totalorder %s6783_s24, %s6783_s24 }
  0x2d   :  { %p6790_p4 = por %p6789_p3, %p6788_p2 }
  0x2f   :  { %p6791_p5 = pnand %p6790_p4, %p6784_p1 }
  0x31   :  { %6794 = shalt.err (!%p6791_p5)
}
  0x32   :  { %118 = dma.hbm_to_vmem [thread:$0]  %s7304_s8, 4096, %s113_s23, [#allocation15], %s6993_s26, %s6993_s26, %s6994_s27  }
  0x33   :  { %s6803_s6 = scalar_lea.vmem %s36_s21, 896  ;;  %p6808_p7 = scmp.lt.s32.totalorder %s36_s21, %s36_s21 }
  0x34   :  { %p6804_p6 = scmp.ne.s32.totalorder %s36_s21, %s6803_s6  ;;  %p6809_p8 = scmp.lt.s32.totalorder %s6803_s6, %s6803_s6 }
  0x36   :  { %p6810_p9 = por %p6809_p8, %p6808_p7 }
  0x38   :  { %p6811_p10 = pnand %p6810_p9, %p6804_p6 }
  0x3a   :  { %6814 = shalt.err (!%p6811_p10)
}
  0x3b   :  { %38 = dma.hbm_to_vmem [thread:$0]  %s7296_s0, 896, %s36_s21, [#allocation3]  }
  0x3c   :  { %s7000_s16 = smov [#allocation7]   ;;  %s7001_s17 = smov [#allocation10]  }
  0x3d   :  { %s55_s1 = sshll.u32 %s7000_s16, 4  ;;  %s76_s18 = sshll.u32 %s7001_s17, 4  ;;  %s56_s1 = int_to_ptr.vmem [resolvable:$true] %s55_s1  ;;  %s77_s18 = int_to_ptr.vmem [resolvable:$true] %s76_s18 }
  0x3e   :  { %s6823_s19 = scalar_lea.vmem %s56_s1, 128  ;;  %p6828_p12 = scmp.lt.s32.totalorder %s56_s1, %s56_s1 }
  0x3f   :  { %p6824_p11 = scmp.ne.s32.totalorder %s56_s1, %s6823_s19  ;;  %p6829_p13 = scmp.lt.s32.totalorder %s6823_s19, %s6823_s19 }
  0x41   :  { %p6830_p0 = por %p6829_p13, %p6828_p12 }
  0x43   :  { %p6831_p1 = pnand %p6830_p0, %p6824_p11 }
  0x45   :  { %6834 = shalt.err (!%p6831_p1)
}
  0x46   :  { %58 = dma.hbm_to_vmem [thread:$0]  %s7298_s2, 128, %s56_s1, [#allocation6]  }
  0x47   :  { %s6843_s22 = scalar_lea.vmem %s77_s18, 4096  ;;  %p6848_p3 = scmp.lt.s32.totalorder %s77_s18, %s77_s18 }
  0x48   :  { %p6844_p2 = scmp.ne.s32.totalorder %s77_s18, %s6843_s22  ;;  %p6849_p4 = scmp.lt.s32.totalorder %s6843_s22, %s6843_s22 }
  0x4a   :  { %p6850_p5 = por %p6849_p4, %p6848_p3 }
  0x4c   :  { %p6851_p6 = pnand %p6850_p5, %p6844_p2 }
  0x4e   :  { %6854 = shalt.err (!%p6851_p6)
}
  0x4f   :  { %82 = dma.hbm_to_vmem [thread:$0]  %s7300_s4, 4096, %s77_s18, [#allocation9], %s6993_s26, %s6993_s26, %s6994_s27  }
  0x50   :  { %s7002_s3 = smov [#allocation13]   ;;  %s7003_s24 = smov [#allocation16]  }
  0x51   :  { %s103_s21 = sshll.u32 %s7002_s3, 4  ;;  %s124_s2 = sshll.u32 %s7003_s24, 4  ;;  %s104_s21 = int_to_ptr.vmem [resolvable:$true] %s103_s21  ;;  %s125_s2 = int_to_ptr.vmem [resolvable:$true] %s124_s2 }
  0x52   :  { %s6863_s25 = scalar_lea.vmem %s104_s21, 32  ;;  %p6868_p8 = scmp.lt.s32.totalorder %s104_s21, %s104_s21 }
  0x53   :  { %p6864_p7 = scmp.ne.s32.totalorder %s104_s21, %s6863_s25  ;;  %p6869_p9 = scmp.lt.s32.totalorder %s6863_s25, %s6863_s25 }
  0x55   :  { %p6870_p10 = por %p6869_p9, %p6868_p8 }
  0x57   :  { %p6871_p11 = pnand %p6870_p10, %p6864_p7 }
  0x59   :  { %6874 = shalt.err (!%p6871_p11)
}
  0x5a   :  { %106 = dma.hbm_to_vmem [thread:$0]  %s7303_s7, 32, %s104_s21, [#allocation12]  }
  0x5b   :  { %s6883_s29 = scalar_lea.vmem %s125_s2, 4096  ;;  %p6888_p13 = scmp.lt.s32.totalorder %s125_s2, %s125_s2 }
  0x5c   :  { %p6884_p12 = scmp.ne.s32.totalorder %s125_s2, %s6883_s29  ;;  %p6889_p0 = scmp.lt.s32.totalorder %s6883_s29, %s6883_s29 }
  0x5e   :  { %p6890_p1 = por %p6889_p0, %p6888_p13 }
  0x60   :  { %p6891_p2 = pnand %p6890_p1, %p6884_p12 }
  0x62   :  { %6894 = shalt.err (!%p6891_p2)
}
  0x63   :  { %130 = dma.hbm_to_vmem [thread:$0]  %s7305_s9, 4096, %s125_s2, [#allocation15], %s6993_s26, %s6993_s26, %s6994_s27  }
  0x64   :  { %s7004_s16 = smov [#allocation17]  }
  0x65   :  { %s138_s1 = sshll.u32 %s7004_s16, 4  ;;  %s139_s1 = int_to_ptr.vmem [resolvable:$true] %s138_s1 }
  0x66   :  { %s6903_s17 = scalar_lea.vmem %s139_s1, 28672  ;;  %p6908_p4 = scmp.lt.s32.totalorder %s139_s1, %s139_s1 }
  0x67   :  { %p6904_p3 = scmp.ne.s32.totalorder %s139_s1, %s6903_s17  ;;  %p6909_p5 = scmp.lt.s32.totalorder %s6903_s17, %s6903_s17 }
  0x69   :  { %p6910_p6 = por %p6909_p5, %p6908_p4 }
  0x6b   :  { %p6911_p7 = pnand %p6910_p6, %p6904_p3 }
  0x6d   :  { %6914 = shalt.err (!%p6911_p7)
}
  0x6e   :  { %s7005_s7 = smov 448   ;;  %s7006_s18 = smov 28  }
  0x6f   :  { %144 = dma.hbm_to_vmem [thread:$0]  %s7307_s11, 28672, %s139_s1, [#allocation18], %s7005_s7, %s7005_s7, %s7006_s18  }
  0x70   :  { %6975 = dma.done.wait [#allocation3], 896  }
  0x71   :  { %6976 = vsyncadd [#allocation3], 4294966400 }
  0x72   :  { %6977 = dma.done.wait [#allocation6], 256  }
  0x73   :  { %6978 = vsyncadd [#allocation6], 4294967040 }
  0x74   :  { %6979 = dma.done.wait [#allocation9], 32768  }
  0x75   :  { %6980 = vsyncadd [#allocation9], 4294934528 }
  0x76   :  { %6981 = dma.done.wait [#allocation12], 8224  }
  0x77   :  { %6982 = vsyncadd [#allocation12], 4294959072 }
  0x78   :  { %6983 = dma.done.wait [#allocation15], 8192  }
  0x79   :  { %6984 = vsyncadd [#allocation15], 4294959104 }
  0x7a   :  { %6985 = dma.done.wait [#allocation18], 28672  }
  0x7b   :  { %6986 = vsyncadd [#allocation18], 4294938624  ;;  %v7007_v0 = vmov 0   ;;  %v5789_v1 = vld [vmem:[#allocation10 + $0xe4] ss:$16 sps:$4 sm:$0xff]  }
  0x7c   :  { %643 = vmatprep.mubr.bf16.mxu0 %v7007_v0  ;;  %684 = vmatprep.mubr.bf16.mxu1 %v7007_v0  ;;  %v5791_v2 = vld [vmem:[#allocation10 + $0xec] ss:$16 sps:$4 sm:$0xff]   ;;  %v5793_v3 = vld [vmem:[#allocation10 + $0xe0] ss:$16 sps:$4 sm:$0xff]   ;;  %v5794_v4 = vld [vmem:[#allocation10 + $0xe8] ss:$16 sps:$4 sm:$0xff]  }
  0x7d   :  { %611 = vmatprep.subr.bf16.mxu0 %v5789_v1  ;;  %652 = vmatprep.subr.bf16.mxu1 %v5791_v2  ;;  %v5795_v5 = vld [vmem:[#allocation10 + $0xc4] ss:$16 sps:$4 sm:$0xff]   ;;  %v5797_v6 = vld [vmem:[#allocation10 + $0xcc] ss:$16 sps:$4 sm:$0xff]   ;;  %v5799_v7 = vld [vmem:[#allocation10 + $0xc0] ss:$16 sps:$4 sm:$0xff]  }
  0x7e   :  { %612 = vmatpush1.bf16.msra.mxu0 %v5793_v3  ;;  %653 = vmatpush1.bf16.msra.mxu1 %v5794_v4  ;;  %v5800_v8 = vld [vmem:[#allocation10 + $0xc8] ss:$16 sps:$4 sm:$0xff]   ;;  %v5801_v9 = vld [vmem:[#allocation10 + $0xa4] ss:$16 sps:$4 sm:$0xff]   ;;  %v5803_v10 = vld [vmem:[#allocation10 + $0xac] ss:$16 sps:$4 sm:$0xff]  }
  0x7f   :  { %613 = vmatprep.subr.bf16.mxu0 %v5795_v5  ;;  %654 = vmatprep.subr.bf16.mxu1 %v5797_v6  ;;  %v5805_v11 = vld [vmem:[#allocation10 + $0xa0] ss:$16 sps:$4 sm:$0xff]   ;;  %v5806_v12 = vld [vmem:[#allocation10 + $0xa8] ss:$16 sps:$4 sm:$0xff]   ;;  %v5807_v13 = vld [vmem:[#allocation10 + $0x84] ss:$16 sps:$4 sm:$0xff]  }
  0x80   :  { %v5809_v14 = vld [vmem:[#allocation10 + $0x8c] ss:$16 sps:$4 sm:$0xff]   ;;  %v5811_v15 = vld [vmem:[#allocation10 + $0x80] ss:$16 sps:$4 sm:$0xff]   ;;  %v5812_v16 = vld [vmem:[#allocation10 + $0x88] ss:$16 sps:$4 sm:$0xff]  }
  0x81   :  { %v5813_v17 = vld [vmem:[#allocation10 + $0x64] ss:$16 sps:$4 sm:$0xff]   ;;  %v5815_v18 = vld [vmem:[#allocation10 + $0x6c] ss:$16 sps:$4 sm:$0xff]   ;;  %v5817_v19 = vld [vmem:[#allocation10 + $0x60] ss:$16 sps:$4 sm:$0xff]  }
  0x82   :  { %614 = vmatpush1.bf16.msra.mxu0 %v5799_v7  ;;  %655 = vmatpush1.bf16.msra.mxu1 %v5800_v8  ;;  %v5818_v20 = vld [vmem:[#allocation10 + $0x68] ss:$16 sps:$4 sm:$0xff]   ;;  %v5819_v21 = vld [vmem:[#allocation10 + $0x44] ss:$16 sps:$4 sm:$0xff]   ;;  %v5821_v22 = vld [vmem:[#allocation10 + $0x4c] ss:$16 sps:$4 sm:$0xff]  }
  0x83   :  { %615 = vmatprep.subr.bf16.mxu0 %v5801_v9  ;;  %656 = vmatprep.subr.bf16.mxu1 %v5803_v10  ;;  %v5823_v23 = vld [vmem:[#allocation10 + $0x40] ss:$16 sps:$4 sm:$0xff]   ;;  %v5824_v24 = vld [vmem:[#allocation10 + $0x48] ss:$16 sps:$4 sm:$0xff]   ;;  %v5825_v25 = vld [vmem:[#allocation10 + $0x24] ss:$16 sps:$4 sm:$0xff]  }
  0x84   :  { %v5827_v26 = vld [vmem:[#allocation10 + $0x2c] ss:$16 sps:$4 sm:$0xff]   ;;  %v5829_v27 = vld [vmem:[#allocation10 + $0x20] ss:$16 sps:$4 sm:$0xff]   ;;  %v5830_v28 = vld [vmem:[#allocation10 + $0x28] ss:$16 sps:$4 sm:$0xff]  }
  0x85   :  { %v5831_v29 = vld [vmem:[#allocation10 + $0x4] ss:$16 sps:$4 sm:$0xff]   ;;  %v5833_v30 = vld [vmem:[#allocation10 + $0xc] ss:$16 sps:$4 sm:$0xff]   ;;  %v5835_v31 = vld [vmem:[#allocation10] ss:$16 sps:$4 sm:$0xff]  }
  0x86   :  { %616 = vmatpush1.bf16.msra.mxu0 %v5805_v11  ;;  %657 = vmatpush1.bf16.msra.mxu1 %v5806_v12  ;;  %v5836_v32 = vld [vmem:[#allocation10 + $0x8] ss:$16 sps:$4 sm:$0xff]   ;;  %v192_v33 = vld [vmem:[#allocation5] sm:$0xff]  ;;  %v179_v8 = vld [vmem:[#allocation2 + $0x8] sm:$0xff] }
  0x87   :  { %617 = vmatprep.subr.bf16.mxu0 %v5807_v13  ;;  %658 = vmatprep.subr.bf16.mxu1 %v5809_v14  ;;  %v5839_v34 = vld [vmem:[#allocation8 + $0xe4] ss:$16 sps:$4 sm:$0xff]   ;;  %v7135_v36 = vpack.c.bf16 %v192_v33, %v192_v33  ;;  %v5837_v37 = vld [vmem:[#allocation8 + $0xe0] ss:$16 sps:$4 sm:$0xff]   ;;  %v7139_v12 = vpack.c.bf16 %v179_v8, %v179_v8 }
  0x88   :  { %v5842_v35 = vld [vmem:[#allocation8 + $0x2e4] ss:$16 sps:$4 sm:$0xff]   ;;  %v5840_v38 = vld [vmem:[#allocation8 + $0x2e0] ss:$16 sps:$4 sm:$0xff]  }
  0x89   :  { %v5845_v39 = vld [vmem:[#allocation8 + $0xc4] ss:$16 sps:$4 sm:$0xff]   ;;  %v5843_v41 = vld [vmem:[#allocation8 + $0xc0] ss:$16 sps:$4 sm:$0xff]  }
  0x8a   :  { %618 = vmatpush1.bf16.msra.mxu0 %v5811_v15  ;;  %659 = vmatpush1.bf16.msra.mxu1 %v5812_v16  ;;  %v5848_v40 = vld [vmem:[#allocation8 + $0x2c4] ss:$16 sps:$4 sm:$0xff]   ;;  %v5846_v42 = vld [vmem:[#allocation8 + $0x2c0] ss:$16 sps:$4 sm:$0xff]  }
  0x8b   :  { %619 = vmatprep.subr.bf16.mxu0 %v5813_v17  ;;  %660 = vmatprep.subr.bf16.mxu1 %v5815_v18  ;;  %v5851_v43 = vld [vmem:[#allocation8 + $0xa4] ss:$16 sps:$4 sm:$0xff]   ;;  %v5849_v45 = vld [vmem:[#allocation8 + $0xa0] ss:$16 sps:$4 sm:$0xff]  }
  0x8c   :  { %v5854_v44 = vld [vmem:[#allocation8 + $0x2a4] ss:$16 sps:$4 sm:$0xff]   ;;  %v5852_v46 = vld [vmem:[#allocation8 + $0x2a0] ss:$16 sps:$4 sm:$0xff]  }
  0x8d   :  { %v5857_v47 = vld [vmem:[#allocation8 + $0x84] ss:$16 sps:$4 sm:$0xff]   ;;  %v5855_v49 = vld [vmem:[#allocation8 + $0x80] ss:$16 sps:$4 sm:$0xff]  }
  0x8e   :  { %620 = vmatpush1.bf16.msra.mxu0 %v5817_v19  ;;  %661 = vmatpush1.bf16.msra.mxu1 %v5818_v20  ;;  %v5860_v48 = vld [vmem:[#allocation8 + $0x284] ss:$16 sps:$4 sm:$0xff]   ;;  %v5858_v50 = vld [vmem:[#allocation8 + $0x280] ss:$16 sps:$4 sm:$0xff]  }
  0x8f   :  { %621 = vmatprep.subr.bf16.mxu0 %v5819_v21  ;;  %662 = vmatprep.subr.bf16.mxu1 %v5821_v22  ;;  %v5863_v51 = vld [vmem:[#allocation8 + $0x64] ss:$16 sps:$4 sm:$0xff]   ;;  %v5861_v53 = vld [vmem:[#allocation8 + $0x60] ss:$16 sps:$4 sm:$0xff]  }
  0x90   :  { %v5866_v52 = vld [vmem:[#allocation8 + $0x264] ss:$16 sps:$4 sm:$0xff]   ;;  %v5864_v54 = vld [vmem:[#allocation8 + $0x260] ss:$16 sps:$4 sm:$0xff]  }
  0x91   :  { %v5869_v55 = vld [vmem:[#allocation8 + $0x44] ss:$16 sps:$4 sm:$0xff]   ;;  %v5867_v57 = vld [vmem:[#allocation8 + $0x40] ss:$16 sps:$4 sm:$0xff]  }
  0x92   :  { %622 = vmatpush1.bf16.msra.mxu0 %v5823_v23  ;;  %663 = vmatpush1.bf16.msra.mxu1 %v5824_v24  ;;  %v5872_v56 = vld [vmem:[#allocation8 + $0x244] ss:$16 sps:$4 sm:$0xff]   ;;  %v5870_v58 = vld [vmem:[#allocation8 + $0x240] ss:$16 sps:$4 sm:$0xff]  }
  0x93   :  { %623 = vmatprep.subr.bf16.mxu0 %v5825_v25  ;;  %664 = vmatprep.subr.bf16.mxu1 %v5827_v26  ;;  %v5875_v59 = vld [vmem:[#allocation8 + $0x24] ss:$16 sps:$4 sm:$0xff]   ;;  %v5873_v61 = vld [vmem:[#allocation8 + $0x20] ss:$16 sps:$4 sm:$0xff]  }
  0x94   :  { %v5878_v60 = vld [vmem:[#allocation8 + $0x224] ss:$16 sps:$4 sm:$0xff]   ;;  %v5876_v62 = vld [vmem:[#allocation8 + $0x220] ss:$16 sps:$4 sm:$0xff]  }
  0x95   :  { %v5881_v63 = vld [vmem:[#allocation8 + $0x4] ss:$16 sps:$4 sm:$0xff]   ;;  %v5879_v2 = vld [vmem:[#allocation8] ss:$16 sps:$4 sm:$0xff]  }
  0x96   :  { %624 = vmatpush1.bf16.msra.mxu0 %v5829_v27  ;;  %665 = vmatpush1.bf16.msra.mxu1 %v5830_v28  ;;  %v5884_v1 = vld [vmem:[#allocation8 + $0x204] ss:$16 sps:$4 sm:$0xff]   ;;  %v5882_v3 = vld [vmem:[#allocation8 + $0x200] ss:$16 sps:$4 sm:$0xff]  }
  0x97   :  { %625 = vmatprep.subr.bf16.mxu0 %v5831_v29  ;;  %666 = vmatprep.subr.bf16.mxu1 %v5833_v30  ;;  %v5887_v4 = vld [vmem:[#allocation8 + $0x1e4] ss:$16 sps:$4 sm:$0xff]   ;;  %v5885_v6 = vld [vmem:[#allocation8 + $0x1e0] ss:$16 sps:$4 sm:$0xff]  }
  0x98   :  { %v5890_v5 = vld [vmem:[#allocation8 + $0x3e4] ss:$16 sps:$4 sm:$0xff]   ;;  %v5888_v7 = vld [vmem:[#allocation8 + $0x3e0] ss:$16 sps:$4 sm:$0xff]  }
  0x99   :  { %v181_v9 = vld [vmem:[#allocation2 + $0x18] sm:$0xff] }
  0x9a   :  { %626 = vmatpush1.bf16.msra.mxu0 %v5835_v31  ;;  %667 = vmatpush1.bf16.msra.mxu1 %v5836_v32  ;;  %v5893_v10 = vld [vmem:[#allocation8 + $0x1c4] ss:$16 sps:$4 sm:$0xff]   ;;  %v7141_v13 = vpack.c.bf16 %v181_v9, %v181_v9  ;;  %v5891_v14 = vld [vmem:[#allocation8 + $0x1c0] ss:$16 sps:$4 sm:$0xff]  }
  0x9b   :  { %1813 = vmatprep.subr.bf16.mxu0 %v5839_v34  ;;  %1854 = vmatprep.subr.bf16.mxu1 %v5842_v35  ;;  %v5896_v11 = vld [vmem:[#allocation8 + $0x3c4] ss:$16 sps:$4 sm:$0xff]   ;;  %v5894_v15 = vld [vmem:[#allocation8 + $0x3c0] ss:$16 sps:$4 sm:$0xff]  }
  0x9c   :  { %v5899_v16 = vld [vmem:[#allocation8 + $0x1a4] ss:$16 sps:$4 sm:$0xff]   ;;  %v5897_v18 = vld [vmem:[#allocation8 + $0x1a0] ss:$16 sps:$4 sm:$0xff]  }
  0x9d   :  { %644 = vmatmul.mubr.bf16.vlgmr.msra.gmra.mxu0 %v7135_v36  ;;  %685 = vmatmul.mubr.bf16.vlgmr.msra.gmra.mxu1 %v7135_v36  ;;  %v5902_v17 = vld [vmem:[#allocation8 + $0x3a4] ss:$16 sps:$4 sm:$0xff]   ;;  %v5900_v19 = vld [vmem:[#allocation8 + $0x3a0] ss:$16 sps:$4 sm:$0xff]  }
  0x9e   :  { %1814 = vmatpush1.bf16.msra.mxu0 %v5837_v37  ;;  %1855 = vmatpush1.bf16.msra.mxu1 %v5840_v38  ;;  %v5905_v20 = vld [vmem:[#allocation8 + $0x184] ss:$16 sps:$4 sm:$0xff]   ;;  %v5903_v22 = vld [vmem:[#allocation8 + $0x180] ss:$16 sps:$4 sm:$0xff]  }
  0x9f   :  { %1815 = vmatprep.subr.bf16.mxu0 %v5845_v39  ;;  %1856 = vmatprep.subr.bf16.mxu1 %v5848_v40  ;;  %v5908_v21 = vld [vmem:[#allocation8 + $0x384] ss:$16 sps:$4 sm:$0xff]   ;;  %v5906_v23 = vld [vmem:[#allocation8 + $0x380] ss:$16 sps:$4 sm:$0xff]  }
  0xa0   :  { %1845 = vmatprep.mubr.bf16.mxu0 %v7139_v12  ;;  %1886 = vmatprep.mubr.bf16.mxu1 %v7141_v13  ;;  %v5911_v24 = vld [vmem:[#allocation8 + $0x164] ss:$16 sps:$4 sm:$0xff]   ;;  %v5909_v26 = vld [vmem:[#allocation8 + $0x160] ss:$16 sps:$4 sm:$0xff]  }
  0xa1   :  { %v5914_v25 = vld [vmem:[#allocation8 + $0x364] ss:$16 sps:$4 sm:$0xff]   ;;  %v5912_v27 = vld [vmem:[#allocation8 + $0x360] ss:$16 sps:$4 sm:$0xff]  }
  0xa2   :  { %1816 = vmatpush1.bf16.msra.mxu0 %v5843_v41  ;;  %1857 = vmatpush1.bf16.msra.mxu1 %v5846_v42  ;;  %v5917_v28 = vld [vmem:[#allocation8 + $0x144] ss:$16 sps:$4 sm:$0xff]   ;;  %v5915_v30 = vld [vmem:[#allocation8 + $0x140] ss:$16 sps:$4 sm:$0xff]   ;;  %v178_v41 = vld [vmem:[#allocation2] sm:$0xff] }
  0xa3   :  { %1817 = vmatprep.subr.bf16.mxu0 %v5851_v43  ;;  %1858 = vmatprep.subr.bf16.mxu1 %v5854_v44  ;;  %v5920_v29 = vld [vmem:[#allocation8 + $0x344] ss:$16 sps:$4 sm:$0xff]   ;;  %v5918_v31 = vld [vmem:[#allocation8 + $0x340] ss:$16 sps:$4 sm:$0xff]   ;;  %v180_v42 = vld [vmem:[#allocation2 + $0x10] sm:$0xff] }
  0xa4   :  { %v5923_v32 = vld [vmem:[#allocation8 + $0x124] ss:$16 sps:$4 sm:$0xff]   ;;  %v5921_v34 = vld [vmem:[#allocation8 + $0x120] ss:$16 sps:$4 sm:$0xff]  }
  0xa5   :  { %v5926_v33 = vld [vmem:[#allocation8 + $0x324] ss:$16 sps:$4 sm:$0xff]   ;;  %v5924_v35 = vld [vmem:[#allocation8 + $0x320] ss:$16 sps:$4 sm:$0xff]  }
  0xa6   :  { %1818 = vmatpush1.bf16.msra.mxu0 %v5849_v45  ;;  %1859 = vmatpush1.bf16.msra.mxu1 %v5852_v46  ;;  %v5929_v37 = vld [vmem:[#allocation8 + $0x104] ss:$16 sps:$4 sm:$0xff]   ;;  %v5927_v39 = vld [vmem:[#allocation8 + $0x100] ss:$16 sps:$4 sm:$0xff]   ;;  %v7145_v45 = vpack.c.bf16 %v178_v41, %v178_v41  ;;  %v7147_v46 = vpack.c.bf16 %v180_v42, %v180_v42  ;;  %v6016_v41 = vld [vmem:[#allocation8 + $0x4c] ss:$16 sps:$4 sm:$0xff]  }
  0xa7   :  { %1819 = vmatprep.subr.bf16.mxu0 %v5857_v47  ;;  %1860 = vmatprep.subr.bf16.mxu1 %v5860_v48  ;;  %v5932_v38 = vld [vmem:[#allocation8 + $0x304] ss:$16 sps:$4 sm:$0xff]   ;;  %v5930_v40 = vld [vmem:[#allocation8 + $0x300] ss:$16 sps:$4 sm:$0xff]  }
  0xa8   :  { %v5935_v43 = vld [vmem:[#allocation8 + $0x4e4] ss:$16 sps:$4 sm:$0xff]   ;;  %v5933_v47 = vld [vmem:[#allocation8 + $0x4e0] ss:$16 sps:$4 sm:$0xff]  }
  0xa9   :  { %v5938_v44 = vld [vmem:[#allocation8 + $0x6e4] ss:$16 sps:$4 sm:$0xff]   ;;  %v5936_v48 = vld [vmem:[#allocation8 + $0x6e0] ss:$16 sps:$4 sm:$0xff]  }
  0xaa   :  { %1820 = vmatpush1.bf16.msra.mxu0 %v5855_v49  ;;  %1861 = vmatpush1.bf16.msra.mxu1 %v5858_v50  ;;  %v5941_v49 = vld [vmem:[#allocation8 + $0x4c4] ss:$16 sps:$4 sm:$0xff]   ;;  %v6011_v42 = vld [vmem:[#allocation8 + $0x540] ss:$16 sps:$4 sm:$0xff]  }
  0xab   :  { %1821 = vmatprep.subr.bf16.mxu0 %v5863_v51  ;;  %1862 = vmatprep.subr.bf16.mxu1 %v5866_v52  ;;  %v5944_v50 = vld [vmem:[#allocation8 + $0x6c4] ss:$16 sps:$4 sm:$0xff]   ;;  %v5939_v51 = vld [vmem:[#allocation8 + $0x4c0] ss:$16 sps:$4 sm:$0xff]  }
  0xac   :  { %v5942_v52 = vld [vmem:[#allocation8 + $0x6c0] ss:$16 sps:$4 sm:$0xff]   ;;  %v5971_v8 = vld [vmem:[#allocation8 + $0x424] ss:$16 sps:$4 sm:$0xff]  }
  0xad   :  { %v5974_v9 = vld [vmem:[#allocation8 + $0x624] ss:$16 sps:$4 sm:$0xff]  }
  0xae   :  { %1822 = vmatpush1.bf16.msra.mxu0 %v5861_v53  ;;  %1863 = vmatpush1.bf16.msra.mxu1 %v5864_v54  ;;  %v5947_v53 = vld [vmem:[#allocation8 + $0x4a4] ss:$16 sps:$4 sm:$0xff]  }
  0xaf   :  { %1823 = vmatprep.subr.bf16.mxu0 %v5869_v55  ;;  %1864 = vmatprep.subr.bf16.mxu1 %v5872_v56  ;;  %v5950_v54 = vld [vmem:[#allocation8 + $0x6a4] ss:$16 sps:$4 sm:$0xff]   ;;  %v5945_v55 = vld [vmem:[#allocation8 + $0x4a0] ss:$16 sps:$4 sm:$0xff]  }
  0xb0   :  { %v5948_v56 = vld [vmem:[#allocation8 + $0x6a0] ss:$16 sps:$4 sm:$0xff]  }
  0xb2   :  { %1824 = vmatpush1.bf16.msra.mxu0 %v5867_v57  ;;  %1865 = vmatpush1.bf16.msra.mxu1 %v5870_v58  ;;  %v5953_v57 = vld [vmem:[#allocation8 + $0x484] ss:$16 sps:$4 sm:$0xff]  }
  0xb3   :  { %1825 = vmatprep.subr.bf16.mxu0 %v5875_v59  ;;  %1866 = vmatprep.subr.bf16.mxu1 %v5878_v60  ;;  %v5956_v58 = vld [vmem:[#allocation8 + $0x684] ss:$16 sps:$4 sm:$0xff]   ;;  %v5951_v59 = vld [vmem:[#allocation8 + $0x480] ss:$16 sps:$4 sm:$0xff]  }
  0xb4   :  { %v5954_v60 = vld [vmem:[#allocation8 + $0x680] ss:$16 sps:$4 sm:$0xff]  }
  0xb6   :  { %1826 = vmatpush1.bf16.msra.mxu0 %v5873_v61  ;;  %1867 = vmatpush1.bf16.msra.mxu1 %v5876_v62  ;;  %v5959_v61 = vld [vmem:[#allocation8 + $0x464] ss:$16 sps:$4 sm:$0xff]  }
  0xb7   :  { %1827 = vmatprep.subr.bf16.mxu0 %v5881_v63  ;;  %1868 = vmatprep.subr.bf16.mxu1 %v5884_v1  ;;  %v183_v62 = vld [vmem:[#allocation2 + $0x28] sm:$0xff] }
  0xb8   :  { %v5962_v63 = vld [vmem:[#allocation8 + $0x664] ss:$16 sps:$4 sm:$0xff]   ;;  %v7152_v1 = vpack.c.bf16 %v183_v62, %v183_v62  ;;  %v6035_v62 = vld [vmem:[#allocation8 + $0x1c8] ss:$16 sps:$4 sm:$0xff]  }
  0xba   :  { %1828 = vmatpush1.bf16.msra.mxu0 %v5879_v2  ;;  %1869 = vmatpush1.bf16.msra.mxu1 %v5882_v3  ;;  %v5957_v2 = vld [vmem:[#allocation8 + $0x460] ss:$16 sps:$4 sm:$0xff]  }
  0xbb   :  { %1829 = vmatprep.subr.bf16.mxu0 %v5887_v4  ;;  %1870 = vmatprep.subr.bf16.mxu1 %v5890_v5  ;;  %v5960_v3 = vld [vmem:[#allocation8 + $0x660] ss:$16 sps:$4 sm:$0xff]   ;;  %v5965_v4 = vld [vmem:[#allocation8 + $0x444] ss:$16 sps:$4 sm:$0xff]  }
  0xbc   :  { %v5968_v5 = vld [vmem:[#allocation8 + $0x644] ss:$16 sps:$4 sm:$0xff]  }
  0xbe   :  { %1830 = vmatpush2.bf16.msra.mxu0 %v5885_v6  ;;  %1871 = vmatpush2.bf16.msra.mxu1 %v5888_v7  ;;  %v5963_v6 = vld [vmem:[#allocation8 + $0x440] ss:$16 sps:$4 sm:$0xff]  }
  0xbf   :  { %1831 = vmatprep.subr.bf16.mxu0 %v5893_v10  ;;  %1872 = vmatprep.subr.bf16.mxu1 %v5896_v11  ;;  %v5966_v7 = vld [vmem:[#allocation8 + $0x640] ss:$16 sps:$4 sm:$0xff]  }
  0xc0   :  { %v5969_v10 = vld [vmem:[#allocation8 + $0x420] ss:$16 sps:$4 sm:$0xff]  }
  0xc1   :  { %v5972_v11 = vld [vmem:[#allocation8 + $0x620] ss:$16 sps:$4 sm:$0xff]  }
  0xc2   :  { %1832 = vmatpush2.bf16.msra.mxu0 %v5891_v14  ;;  %1873 = vmatpush2.bf16.msra.mxu1 %v5894_v15  ;;  %v5977_v14 = vld [vmem:[#allocation8 + $0x404] ss:$16 sps:$4 sm:$0xff]  }
  0xc3   :  { %1833 = vmatprep.subr.bf16.mxu0 %v5899_v16  ;;  %1874 = vmatprep.subr.bf16.mxu1 %v5902_v17  ;;  %v5980_v15 = vld [vmem:[#allocation8 + $0x604] ss:$16 sps:$4 sm:$0xff]   ;;  %v5975_v16 = vld [vmem:[#allocation8 + $0x400] ss:$16 sps:$4 sm:$0xff]  }
  0xc4   :  { %v5978_v17 = vld [vmem:[#allocation8 + $0x600] ss:$16 sps:$4 sm:$0xff]  }
  0xc6   :  { %1834 = vmatpush2.bf16.msra.mxu0 %v5897_v18  ;;  %1875 = vmatpush2.bf16.msra.mxu1 %v5900_v19  ;;  %v5983_v18 = vld [vmem:[#allocation8 + $0x5e4] ss:$16 sps:$4 sm:$0xff]   ;;  %v184_v19 = vld [vmem:[#allocation2 + $0x30] sm:$0xff] }
  0xc7   :  { %1835 = vmatprep.subr.bf16.mxu0 %v5905_v20  ;;  %1876 = vmatprep.subr.bf16.mxu1 %v5908_v21  ;;  %v5986_v20 = vld [vmem:[#allocation8 + $0xec] ss:$16 sps:$4 sm:$0xff]   ;;  %v5981_v21 = vld [vmem:[#allocation8 + $0x5e0] ss:$16 sps:$4 sm:$0xff]  }
  0xca   :  { %1836 = vmatpush2.bf16.msra.mxu0 %v5903_v22  ;;  %1877 = vmatpush2.bf16.msra.mxu1 %v5906_v23  ;;  %v7155_v22 = vpack.c.bf16 %v184_v19, %v184_v19  ;;  %v5984_v23 = vld [vmem:[#allocation8 + $0xe8] ss:$16 sps:$4 sm:$0xff]   ;;  %v6067_v19 = vld [vmem:[#allocation8 + $0x12c] ss:$16 sps:$4 sm:$0xff]  }
  0xcb   :  { %1837 = vmatprep.subr.bf16.mxu0 %v5911_v24  ;;  %1878 = vmatprep.subr.bf16.mxu1 %v5914_v25  ;;  %v5989_v24 = vld [vmem:[#allocation8 + $0x5c4] ss:$16 sps:$4 sm:$0xff]   ;;  %v5992_v25 = vld [vmem:[#allocation8 + $0xcc] ss:$16 sps:$4 sm:$0xff]  }
  0xce   :  { %1838 = vmatpush2.bf16.msra.mxu0 %v5909_v26  ;;  %1879 = vmatpush2.bf16.msra.mxu1 %v5912_v27  ;;  %v5987_v26 = vld [vmem:[#allocation8 + $0x5c0] ss:$16 sps:$4 sm:$0xff]   ;;  %v5990_v27 = vld [vmem:[#allocation8 + $0xc8] ss:$16 sps:$4 sm:$0xff]  }
  0xcf   :  { %1839 = vmatprep.subr.bf16.mxu0 %v5917_v28  ;;  %1880 = vmatprep.subr.bf16.mxu1 %v5920_v29  ;;  %v5995_v28 = vld [vmem:[#allocation8 + $0x5a4] ss:$16 sps:$4 sm:$0xff]   ;;  %v5998_v29 = vld [vmem:[#allocation8 + $0xac] ss:$16 sps:$4 sm:$0xff]  }
  0xd2   :  { %1840 = vmatpush2.bf16.msra.mxu0 %v5915_v30  ;;  %1881 = vmatpush2.bf16.msra.mxu1 %v5918_v31  ;;  %v5993_v30 = vld [vmem:[#allocation8 + $0x5a0] ss:$16 sps:$4 sm:$0xff]   ;;  %v5996_v31 = vld [vmem:[#allocation8 + $0xa8] ss:$16 sps:$4 sm:$0xff]  }
  0xd3   :  { %1841 = vmatprep.subr.bf16.mxu0 %v5923_v32  ;;  %1882 = vmatprep.subr.bf16.mxu1 %v5926_v33  ;;  %v6001_v32 = vld [vmem:[#allocation8 + $0x584] ss:$16 sps:$4 sm:$0xff]   ;;  %v6004_v33 = vld [vmem:[#allocation8 + $0x8c] ss:$16 sps:$4 sm:$0xff]  }
  0xd6   :  { %1842 = vmatpush2.bf16.msra.mxu0 %v5921_v34  ;;  %1883 = vmatpush2.bf16.msra.mxu1 %v5924_v35  ;;  %v5999_v34 = vld [vmem:[#allocation8 + $0x580] ss:$16 sps:$4 sm:$0xff]   ;;  %v6002_v35 = vld [vmem:[#allocation8 + $0x88] ss:$16 sps:$4 sm:$0xff]  }
  0xd7   :  { %1843 = vmatprep.subr.bf16.mxu0 %v5929_v37  ;;  %1884 = vmatprep.subr.bf16.mxu1 %v5932_v38  ;;  %v6007_v37 = vld [vmem:[#allocation8 + $0x564] ss:$16 sps:$4 sm:$0xff]   ;;  %v6010_v38 = vld [vmem:[#allocation8 + $0x6c] ss:$16 sps:$4 sm:$0xff]  }
  0xda   :  { %1844 = vmatpush2.bf16.msra.mxu0 %v5927_v39  ;;  %1885 = vmatpush2.bf16.msra.mxu1 %v5930_v40  ;;  %v6005_v39 = vld [vmem:[#allocation8 + $0x560] ss:$16 sps:$4 sm:$0xff]   ;;  %v6008_v40 = vld [vmem:[#allocation8 + $0x68] ss:$16 sps:$4 sm:$0xff]  }
  0xdb   :  { %1895 = vmatprep.subr.bf16.mxu0 %v5935_v43  ;;  %1936 = vmatprep.subr.bf16.mxu1 %v5938_v44  ;;  %v6014_v43 = vld [vmem:[#allocation8 + $0x48] ss:$16 sps:$4 sm:$0xff]   ;;  %v6019_v44 = vld [vmem:[#allocation8 + $0x524] ss:$16 sps:$4 sm:$0xff]  }
  0xdd   :  { %1846 = vmatmul.mubr.bf16.vlgmr.msra.gmra.mxu0 %v7145_v45  ;;  %1887 = vmatmul.mubr.bf16.vlgmr.msra.gmra.mxu1 %v7147_v46 }
  0xde   :  { %1896 = vmatpush1.bf16.msra.mxu0 %v5933_v47  ;;  %1937 = vmatpush1.bf16.msra.mxu1 %v5936_v48  ;;  %v6022_v47 = vld [vmem:[#allocation8 + $0x2c] ss:$16 sps:$4 sm:$0xff]   ;;  %v6017_v48 = vld [vmem:[#allocation8 + $0x520] ss:$16 sps:$4 sm:$0xff]  }
  0xdf   :  { %1897 = vmatprep.subr.bf16.mxu0 %v5941_v49  ;;  %1938 = vmatprep.subr.bf16.mxu1 %v5944_v50  ;;  %v6020_v49 = vld [vmem:[#allocation8 + $0x28] ss:$16 sps:$4 sm:$0xff]   ;;  %v6025_v50 = vld [vmem:[#allocation8 + $0x504] ss:$16 sps:$4 sm:$0xff]  }
  0xe0   :  { %1968 = vmatprep.mubr.bf16.mxu1 %v7007_v0  ;;  %1927 = vmatprep.mubr.bf16.mxu0 %v7152_v1 }
  0xe2   :  { %1898 = vmatpush1.bf16.msra.mxu0 %v5939_v51  ;;  %1939 = vmatpush1.bf16.msra.mxu1 %v5942_v52  ;;  %v6028_v51 = vld [vmem:[#allocation8 + $0xc] ss:$16 sps:$4 sm:$0xff]   ;;  %v6023_v52 = vld [vmem:[#allocation8 + $0x500] ss:$16 sps:$4 sm:$0xff]  }
  0xe3   :  { %1899 = vmatprep.subr.bf16.mxu0 %v5947_v53  ;;  %1940 = vmatprep.subr.bf16.mxu1 %v5950_v54  ;;  %v6026_v53 = vld [vmem:[#allocation8 + $0x8] ss:$16 sps:$4 sm:$0xff]  }
  0xe4   :  { %v182_v54 = vld [vmem:[#allocation2 + $0x20] sm:$0xff] }
  0xe6   :  { %1900 = vmatpush1.bf16.msra.mxu0 %v5945_v55  ;;  %1941 = vmatpush1.bf16.msra.mxu1 %v5948_v56  ;;  %v6031_v55 = vld [vmem:[#allocation8 + $0x1ec] ss:$16 sps:$4 sm:$0xff]  }
  0xe7   :  { %1901 = vmatprep.subr.bf16.mxu0 %v5953_v57  ;;  %1942 = vmatprep.subr.bf16.mxu1 %v5956_v58  ;;  %v6034_v56 = vld [vmem:[#allocation8 + $0x2ec] ss:$16 sps:$4 sm:$0xff]   ;;  %v7159_v57 = vpack.c.bf16 %v182_v54, %v182_v54  ;;  %v6029_v58 = vld [vmem:[#allocation8 + $0x1e8] ss:$16 sps:$4 sm:$0xff]  }
  0xe8   :  { %v6113_v54 = vld [vmem:[#allocation8 + $0x328] ss:$16 sps:$4 sm:$0xff]  }
  0xea   :  { %1902 = vmatpush1.bf16.msra.mxu0 %v5951_v59  ;;  %1943 = vmatpush1.bf16.msra.mxu1 %v5954_v60  ;;  %v6032_v59 = vld [vmem:[#allocation8 + $0x2e8] ss:$16 sps:$4 sm:$0xff]   ;;  %v6037_v60 = vld [vmem:[#allocation8 + $0x1cc] ss:$16 sps:$4 sm:$0xff]  }
  0xeb   :  { %1903 = vmatprep.subr.bf16.mxu0 %v5959_v61  ;;  %1944 = vmatprep.subr.bf16.mxu1 %v5962_v63  ;;  %v6040_v61 = vld [vmem:[#allocation8 + $0x2cc] ss:$16 sps:$4 sm:$0xff]   ;;  %v6038_v63 = vld [vmem:[#allocation8 + $0x2c8] ss:$16 sps:$4 sm:$0xff]  }
  0xee   :  { %1904 = vmatpush1.bf16.msra.mxu0 %v5957_v2  ;;  %1945 = vmatpush1.bf16.msra.mxu1 %v5960_v3  ;;  %v6043_v2 = vld [vmem:[#allocation8 + $0x1ac] ss:$16 sps:$4 sm:$0xff]  }
  0xef   :  { %1905 = vmatprep.subr.bf16.mxu0 %v5965_v4  ;;  %1946 = vmatprep.subr.bf16.mxu1 %v5968_v5  ;;  %v6046_v3 = vld [vmem:[#allocation8 + $0x2ac] ss:$16 sps:$4 sm:$0xff]   ;;  %v6041_v4 = vld [vmem:[#allocation8 + $0x1a8] ss:$16 sps:$4 sm:$0xff]  }
  0xf0   :  { %v6044_v5 = vld [vmem:[#allocation8 + $0x2a8] ss:$16 sps:$4 sm:$0xff]  }
  0xf2   :  { %1906 = vmatpush1.bf16.msra.mxu0 %v5963_v6  ;;  %1947 = vmatpush1.bf16.msra.mxu1 %v5966_v7  ;;  %v6049_v6 = vld [vmem:[#allocation8 + $0x18c] ss:$16 sps:$4 sm:$0xff]  }
  0xf3   :  { %1907 = vmatprep.subr.bf16.mxu0 %v5971_v8  ;;  %1948 = vmatprep.subr.bf16.mxu1 %v5974_v9  ;;  %v6052_v7 = vld [vmem:[#allocation8 + $0x28c] ss:$16 sps:$4 sm:$0xff]   ;;  %v6047_v8 = vld [vmem:[#allocation8 + $0x188] ss:$16 sps:$4 sm:$0xff]  }
  0xf4   :  { %v6050_v9 = vld [vmem:[#allocation8 + $0x288] ss:$16 sps:$4 sm:$0xff]  }
  0xf6   :  { %1908 = vmatpush1.bf16.msra.mxu0 %v5969_v10  ;;  %1949 = vmatpush1.bf16.msra.mxu1 %v5972_v11  ;;  %v6055_v10 = vld [vmem:[#allocation8 + $0x16c] ss:$16 sps:$4 sm:$0xff]  }
  0xf7   :  { %1909 = vmatprep.subr.bf16.mxu0 %v5977_v14  ;;  %1950 = vmatprep.subr.bf16.mxu1 %v5980_v15  ;;  %v6058_v11 = vld [vmem:[#allocation8 + $0x26c] ss:$16 sps:$4 sm:$0xff]   ;;  %v6053_v14 = vld [vmem:[#allocation8 + $0x168] ss:$16 sps:$4 sm:$0xff]  }
  0xf8   :  { %v6056_v15 = vld [vmem:[#allocation8 + $0x268] ss:$16 sps:$4 sm:$0xff]  }
  0xfa   :  { %1910 = vmatpush1.bf16.msra.mxu0 %v5975_v16  ;;  %1951 = vmatpush1.bf16.msra.mxu1 %v5978_v17  ;;  %v6064_v16 = vld [vmem:[#allocation8 + $0x24c] ss:$16 sps:$4 sm:$0xff]   ;;  %v6059_v17 = vld [vmem:[#allocation8 + $0x148] ss:$16 sps:$4 sm:$0xff]  }
  0xfb   :  { %1911 = vmatprep.subr.bf16.mxu0 %v5983_v18  ;;  %1977 = vmatprep.subr.bf16.mxu1 %v5986_v20  ;;  %v6062_v18 = vld [vmem:[#allocation8 + $0x248] ss:$16 sps:$4 sm:$0xff]   ;;  %v6070_v20 = vld [vmem:[#allocation8 + $0x22c] ss:$16 sps:$4 sm:$0xff]  }
  0xfd   :  { %1969 = vmatmul.mubr.bf16.vlgmr.msra.gmra.mxu1 %v7155_v22 }
  0xfe   :  { %1912 = vmatpush2.bf16.msra.mxu0 %v5981_v21  ;;  %1978 = vmatpush1.bf16.msra.mxu1 %v5984_v23  ;;  %v6065_v21 = vld [vmem:[#allocation8 + $0x128] ss:$16 sps:$4 sm:$0xff]  }
  0xff   :  { %1913 = vmatprep.subr.bf16.mxu0 %v5989_v24  ;;  %1979 = vmatprep.subr.bf16.mxu1 %v5992_v25  ;;  %v6068_v23 = vld [vmem:[#allocation8 + $0x228] ss:$16 sps:$4 sm:$0xff]   ;;  %v6073_v24 = vld [vmem:[#allocation8 + $0x10c] ss:$16 sps:$4 sm:$0xff]  }
 0x100   :  { %2009 = vmatprep.mubr.bf16.mxu1 %v7139_v12  ;;  %v6013_v12 = vld [vmem:[#allocation8 + $0x544] ss:$16 sps:$4 sm:$0xff]   ;;  %v6076_v25 = vld [vmem:[#allocation8 + $0x20c] ss:$16 sps:$4 sm:$0xff]  }
 0x102   :  { %1914 = vmatpush2.bf16.msra.mxu0 %v5987_v26  ;;  %1980 = vmatpush1.bf16.msra.mxu1 %v5990_v27  ;;  %v6071_v26 = vld [vmem:[#allocation8 + $0x108] ss:$16 sps:$4 sm:$0xff]  }
 0x103   :  { %1915 = vmatprep.subr.bf16.mxu0 %v5995_v28  ;;  %1981 = vmatprep.subr.bf16.mxu1 %v5998_v29  ;;  %v6074_v27 = vld [vmem:[#allocation8 + $0x208] ss:$16 sps:$4 sm:$0xff]   ;;  %v6079_v28 = vld [vmem:[#allocation8 + $0x3ec] ss:$16 sps:$4 sm:$0xff]  }
 0x104   :  { %v6082_v29 = vld [vmem:[#allocation8 + $0x4ec] ss:$16 sps:$4 sm:$0xff]  }
 0x106   :  { %1916 = vmatpush2.bf16.msra.mxu0 %v5993_v30  ;;  %1982 = vmatpush1.bf16.msra.mxu1 %v5996_v31  ;;  %v6077_v30 = vld [vmem:[#allocation8 + $0x3e8] ss:$16 sps:$4 sm:$0xff]  }
 0x107   :  { %1917 = vmatprep.subr.bf16.mxu0 %v6001_v32  ;;  %1983 = vmatprep.subr.bf16.mxu1 %v6004_v33  ;;  %v6080_v31 = vld [vmem:[#allocation8 + $0x4e8] ss:$16 sps:$4 sm:$0xff]   ;;  %v6085_v32 = vld [vmem:[#allocation8 + $0x3cc] ss:$16 sps:$4 sm:$0xff]  }
 0x108   :  { %v6088_v33 = vld [vmem:[#allocation8 + $0x4cc] ss:$16 sps:$4 sm:$0xff]  }
 0x10a   :  { %1918 = vmatpush2.bf16.msra.mxu0 %v5999_v34  ;;  %1984 = vmatpush1.bf16.msra.mxu1 %v6002_v35  ;;  %v6083_v34 = vld [vmem:[#allocation8 + $0x3c8] ss:$16 sps:$4 sm:$0xff]  }
 0x10b   :  { %1919 = vmatprep.subr.bf16.mxu0 %v6007_v37  ;;  %1985 = vmatprep.subr.bf16.mxu1 %v6010_v38  ;;  %v6086_v35 = vld [vmem:[#allocation8 + $0x4c8] ss:$16 sps:$4 sm:$0xff]   ;;  %v6091_v37 = vld [vmem:[#allocation8 + $0x3ac] ss:$16 sps:$4 sm:$0xff]  }
 0x10c   :  { %v6094_v38 = vld [vmem:[#allocation8 + $0x4ac] ss:$16 sps:$4 sm:$0xff]  }
 0x10e   :  { %1920 = vmatpush2.bf16.msra.mxu0 %v6005_v39  ;;  %1986 = vmatpush1.bf16.msra.mxu1 %v6008_v40  ;;  %v6089_v39 = vld [vmem:[#allocation8 + $0x3a8] ss:$16 sps:$4 sm:$0xff]  }
 0x10f   :  { %1921 = vmatprep.subr.bf16.mxu0 %v6013_v12  ;;  %1987 = vmatprep.subr.bf16.mxu1 %v6016_v41  ;;  %v6092_v40 = vld [vmem:[#allocation8 + $0x4a8] ss:$16 sps:$4 sm:$0xff]   ;;  %v6097_v12 = vld [vmem:[#allocation8 + $0x38c] ss:$16 sps:$4 sm:$0xff]  }
 0x110   :  { %v6100_v41 = vld [vmem:[#allocation8 + $0x48c] ss:$16 sps:$4 sm:$0xff]  }
 0x112   :  { %1922 = vmatpush2.bf16.msra.mxu0 %v6011_v42  ;;  %1988 = vmatpush1.bf16.msra.mxu1 %v6014_v43  ;;  %v6095_v42 = vld [vmem:[#allocation8 + $0x388] ss:$16 sps:$4 sm:$0xff]   ;;  %v6103_v43 = vld [vmem:[#allocation8 + $0x36c] ss:$16 sps:$4 sm:$0xff]  }
 0x113   :  { %1923 = vmatprep.subr.bf16.mxu0 %v6019_v44  ;;  %1989 = vmatprep.subr.bf16.mxu1 %v6022_v47  ;;  %v6106_v44 = vld [vmem:[#allocation8 + $0x46c] ss:$16 sps:$4 sm:$0xff]   ;;  %v6101_v47 = vld [vmem:[#allocation8 + $0x368] ss:$16 sps:$4 sm:$0xff]  }
 0x116   :  { %1924 = vmatpush2.bf16.msra.mxu0 %v6017_v48  ;;  %1990 = vmatpush1.bf16.msra.mxu1 %v6020_v49  ;;  %v6104_v48 = vld [vmem:[#allocation8 + $0x468] ss:$16 sps:$4 sm:$0xff]   ;;  %v6109_v49 = vld [vmem:[#allocation8 + $0x34c] ss:$16 sps:$4 sm:$0xff]  }
 0x117   :  { %1925 = vmatprep.subr.bf16.mxu0 %v6025_v50  ;;  %1991 = vmatprep.subr.bf16.mxu1 %v6028_v51  ;;  %v6107_v50 = vld [vmem:[#allocation8 + $0x348] ss:$16 sps:$4 sm:$0xff]  }
 0x118   :  { %v6110_v51 = vld [vmem:[#allocation8 + $0x448] ss:$16 sps:$4 sm:$0xff]  }
 0x11a   :  { %1926 = vmatpush2.bf16.msra.mxu0 %v6023_v52  ;;  %1992 = vmatpush1.bf16.msra.mxu1 %v6026_v53  ;;  %v6115_v52 = vld [vmem:[#allocation8 + $0x32c] ss:$16 sps:$4 sm:$0xff]  }
 0x11b   :  { %1993 = vmatprep.subr.bf16.mxu1 %v6031_v55  ;;  %2018 = vmatprep.subr.bf16.mxu0 %v6034_v56  ;;  %v6118_v53 = vld [vmem:[#allocation8 + $0x42c] ss:$16 sps:$4 sm:$0xff]   ;;  %v6116_v55 = vld [vmem:[#allocation8 + $0x428] ss:$16 sps:$4 sm:$0xff]  }
 0x11c   :  { %v6121_v56 = vld [vmem:[#allocation8 + $0x30c] ss:$16 sps:$4 sm:$0xff]  }
 0x11d   :  { %1928 = vmatmul.mubr.bf16.vlgmr.msra.gmra.mxu0 %v7159_v57 }
 0x11e   :  { %1994 = vmatpush2.bf16.msra.mxu1 %v6029_v58  ;;  %2019 = vmatpush1.bf16.msra.mxu0 %v6032_v59  ;;  %v6124_v58 = vld [vmem:[#allocation8 + $0x40c] ss:$16 sps:$4 sm:$0xff]   ;;  %v6119_v59 = vld [vmem:[#allocation8 + $0x308] ss:$16 sps:$4 sm:$0xff]  }
 0x11f   :  { %1995 = vmatprep.subr.bf16.mxu1 %v6037_v60  ;;  %2020 = vmatprep.subr.bf16.mxu0 %v6040_v61  ;;  %v6122_v60 = vld [vmem:[#allocation8 + $0x408] ss:$16 sps:$4 sm:$0xff]   ;;  %v6127_v61 = vld [vmem:[#allocation8 + $0x5ec] ss:$16 sps:$4 sm:$0xff]  }
 0x120   :  { %2050 = vmatprep.mubr.bf16.mxu0 %v7141_v13  ;;  %v6061_v13 = vld [vmem:[#allocation8 + $0x14c] ss:$16 sps:$4 sm:$0xff]  }
 0x122   :  { %1996 = vmatpush2.bf16.msra.mxu1 %v6035_v62  ;;  %2021 = vmatpush1.bf16.msra.mxu0 %v6038_v63  ;;  %v6130_v62 = vld [vmem:[#allocation8 + $0x6ec] ss:$16 sps:$4 sm:$0xff]   ;;  %v6125_v63 = vld [vmem:[#allocation8 + $0x5e8] ss:$16 sps:$4 sm:$0xff]  }
 0x123   :  { %1997 = vmatprep.subr.bf16.mxu1 %v6043_v2  ;;  %2022 = vmatprep.subr.bf16.mxu0 %v6046_v3  ;;  %v6128_v2 = vld [vmem:[#allocation8 + $0x6e8] ss:$16 sps:$4 sm:$0xff]   ;;  %v6133_v3 = vld [vmem:[#allocation8 + $0x5cc] ss:$16 sps:$4 sm:$0xff]  }
 0x126   :  { %1998 = vmatpush2.bf16.msra.mxu1 %v6041_v4  ;;  %2023 = vmatpush1.bf16.msra.mxu0 %v6044_v5  ;;  %v6136_v4 = vld [vmem:[#allocation8 + $0x6cc] ss:$16 sps:$4 sm:$0xff]   ;;  %v6131_v5 = vld [vmem:[#allocation8 + $0x5c8] ss:$16 sps:$4 sm:$0xff]  }
 0x127   :  { %1999 = vmatprep.subr.bf16.mxu1 %v6049_v6  ;;  %2024 = vmatprep.subr.bf16.mxu0 %v6052_v7 }
 0x12a   :  { %2000 = vmatpush2.bf16.msra.mxu1 %v6047_v8  ;;  %2025 = vmatpush1.bf16.msra.mxu0 %v6050_v9  ;;  %v6134_v8 = vld [vmem:[#allocation8 + $0x6c8] ss:$16 sps:$4 sm:$0xff]   ;;  %v6139_v9 = vld [vmem:[#allocation8 + $0x5ac] ss:$16 sps:$4 sm:$0xff]  }
 0x12b   :  { %2001 = vmatprep.subr.bf16.mxu1 %v6055_v10  ;;  %2026 = vmatprep.subr.bf16.mxu0 %v6058_v11 }
 0x12e   :  { %2002 = vmatpush2.bf16.msra.mxu1 %v6053_v14  ;;  %2027 = vmatpush1.bf16.msra.mxu0 %v6056_v15  ;;  %v6142_v14 = vld [vmem:[#allocation8 + $0x6ac] ss:$16 sps:$4 sm:$0xff]   ;;  %v6137_v15 = vld [vmem:[#allocation8 + $0x5a8] ss:$16 sps:$4 sm:$0xff]  }
 0x12f   :  { %2003 = vmatprep.subr.bf16.mxu1 %v6061_v13  ;;  %2028 = vmatprep.subr.bf16.mxu0 %v6064_v16  ;;  %v6140_v13 = vld [vmem:[#allocation8 + $0x6a8] ss:$16 sps:$4 sm:$0xff]  }
 0x132   :  { %2004 = vmatpush2.bf16.msra.mxu1 %v6059_v17  ;;  %2029 = vmatpush1.bf16.msra.mxu0 %v6062_v18  ;;  %v6145_v18 = vld [vmem:[#allocation8 + $0x58c] ss:$16 sps:$4 sm:$0xff]  }
 0x133   :  { %2005 = vmatprep.subr.bf16.mxu1 %v6067_v19  ;;  %2030 = vmatprep.subr.bf16.mxu0 %v6070_v20 }
 0x136   :  { %2006 = vmatpush2.bf16.msra.mxu1 %v6065_v21  ;;  %2031 = vmatpush1.bf16.msra.mxu0 %v6068_v23  ;;  %v6143_v21 = vld [vmem:[#allocation8 + $0x588] ss:$16 sps:$4 sm:$0xff]  }
 0x137   :  { %2007 = vmatprep.subr.bf16.mxu1 %v6073_v24  ;;  %2032 = vmatprep.subr.bf16.mxu0 %v6076_v25  ;;  %v6146_v23 = vld [vmem:[#allocation8 + $0x688] ss:$16 sps:$4 sm:$0xff]   ;;  %v6151_v24 = vld [vmem:[#allocation8 + $0x56c] ss:$16 sps:$4 sm:$0xff]  }
 0x138   :  { %v6154_v25 = vld [vmem:[#allocation8 + $0x66c] ss:$16 sps:$4 sm:$0xff]  }
 0x13a   :  { %2008 = vmatpush2.bf16.msra.mxu1 %v6071_v26  ;;  %2033 = vmatpush1.bf16.msra.mxu0 %v6074_v27  ;;  %v6149_v26 = vld [vmem:[#allocation8 + $0x568] ss:$16 sps:$4 sm:$0xff]  }
 0x13b   :  { %2034 = vmatprep.subr.bf16.mxu0 %v6079_v28  ;;  %2059 = vmatprep.subr.bf16.mxu1 %v6082_v29  ;;  %v6152_v27 = vld [vmem:[#allocation8 + $0x668] ss:$16 sps:$4 sm:$0xff]   ;;  %v6157_v28 = vld [vmem:[#allocation8 + $0x54c] ss:$16 sps:$4 sm:$0xff]  }
 0x13c   :  { %v6160_v29 = vld [vmem:[#allocation8 + $0x64c] ss:$16 sps:$4 sm:$0xff]  }
 0x13d   :  { %2010 = vmatmul.mubr.bf16.vlgmr.msra.gmra.mxu1 %v7145_v45  ;;  %v6098_v45 = vld [vmem:[#allocation8 + $0x488] ss:$16 sps:$4 sm:$0xff]  }
 0x13e   :  { %2035 = vmatpush2.bf16.msra.mxu0 %v6077_v30  ;;  %2060 = vmatpush1.bf16.msra.mxu1 %v6080_v31  ;;  %v6155_v30 = vld [vmem:[#allocation8 + $0x548] ss:$16 sps:$4 sm:$0xff]  }
 0x13f   :  { %2036 = vmatprep.subr.bf16.mxu0 %v6085_v32  ;;  %2061 = vmatprep.subr.bf16.mxu1 %v6088_v33  ;;  %v6158_v31 = vld [vmem:[#allocation8 + $0x648] ss:$16 sps:$4 sm:$0xff]   ;;  %v6163_v32 = vld [vmem:[#allocation8 + $0x52c] ss:$16 sps:$4 sm:$0xff]  }
 0x140   :  { %2091 = vmatprep.mubr.bf16.mxu1 %v7152_v1  ;;  %v6112_v1 = vld [vmem:[#allocation8 + $0x44c] ss:$16 sps:$4 sm:$0xff]  }
 0x141   :  { %v6166_v33 = vld [vmem:[#allocation8 + $0x62c] ss:$16 sps:$4 sm:$0xff]  }
 0x142   :  { %2037 = vmatpush2.bf16.msra.mxu0 %v6083_v34  ;;  %2062 = vmatpush1.bf16.msra.mxu1 %v6086_v35  ;;  %v6161_v34 = vld [vmem:[#allocation8 + $0x528] ss:$16 sps:$4 sm:$0xff]  }
 0x143   :  { %2038 = vmatprep.subr.bf16.mxu0 %v6091_v37  ;;  %2063 = vmatprep.subr.bf16.mxu1 %v6094_v38  ;;  %v6164_v35 = vld [vmem:[#allocation8 + $0x628] ss:$16 sps:$4 sm:$0xff]   ;;  %v6169_v37 = vld [vmem:[#allocation8 + $0x50c] ss:$16 sps:$4 sm:$0xff]  }
 0x144   :  { %v6172_v38 = vld [vmem:[#allocation8 + $0x60c] ss:$16 sps:$4 sm:$0xff]  }
 0x146   :  { %2039 = vmatpush2.bf16.msra.mxu0 %v6089_v39  ;;  %2064 = vmatpush1.bf16.msra.mxu1 %v6092_v40  ;;  %v6167_v39 = vld [vmem:[#allocation8 + $0x508] ss:$16 sps:$4 sm:$0xff]  }
 0x147   :  { %2040 = vmatprep.subr.bf16.mxu0 %v6097_v12  ;;  %2065 = vmatprep.subr.bf16.mxu1 %v6100_v41  ;;  %v6170_v40 = vld [vmem:[#allocation8 + $0x608] ss:$16 sps:$4 sm:$0xff]   ;;  %v6175_v12 = vld [vmem:[#allocation11 + $0x74] ss:$8 sps:$4 sm:$0xff]  }
 0x148   :  { %v6173_v41 = vld [vmem:[#allocation11 + $0x70] ss:$8 sps:$4 sm:$0xff]  }
 0x14a   :  { %2041 = vmatpush2.bf16.msra.mxu0 %v6095_v42  ;;  %2066 = vmatpush1.bf16.msra.mxu1 %v6098_v45  ;;  %v6178_v42 = vld [vmem:[#allocation11 + $0x64] ss:$8 sps:$4 sm:$0xff]   ;;  %v6176_v45 = vld [vmem:[#allocation11 + $0x60] ss:$8 sps:$4 sm:$0xff]  }
 0x14b   :  { %2042 = vmatprep.subr.bf16.mxu0 %v6103_v43  ;;  %2067 = vmatprep.subr.bf16.mxu1 %v6106_v44  ;;  %v6181_v43 = vld [vmem:[#allocation11 + $0x54] ss:$8 sps:$4 sm:$0xff]   ;;  %v6179_v44 = vld [vmem:[#allocation11 + $0x50] ss:$8 sps:$4 sm:$0xff]  }
 0x14e   :  { %2043 = vmatpush2.bf16.msra.mxu0 %v6101_v47  ;;  %2068 = vmatpush1.bf16.msra.mxu1 %v6104_v48  ;;  %v6184_v47 = vld [vmem:[#allocation11 + $0x44] ss:$8 sps:$4 sm:$0xff]   ;;  %v6221_v48 = vld [vmem:[#allocation11 + $0x170] ss:$8 sps:$4 sm:$0xff]  }
 0x14f   :  { %2044 = vmatprep.subr.bf16.mxu0 %v6109_v49  ;;  %2069 = vmatprep.subr.bf16.mxu1 %v6112_v1  ;;  %v6223_v49 = vld [vmem:[#allocation11 + $0x174] ss:$8 sps:$4 sm:$0xff]   ;;  %v6226_v1 = vld [vmem:[#allocation11 + $0x164] ss:$8 sps:$4 sm:$0xff]  }
 0x152   :  { %2045 = vmatpush2.bf16.msra.mxu0 %v6107_v50  ;;  %2070 = vmatpush1.bf16.msra.mxu1 %v6110_v51  ;;  %v6182_v50 = vld [vmem:[#allocation11 + $0x40] ss:$8 sps:$4 sm:$0xff]   ;;  %v6187_v51 = vld [vmem:[#allocation11 + $0x34] ss:$8 sps:$4 sm:$0xff]  }
 0x153   :  { %2046 = vmatprep.subr.bf16.mxu0 %v6115_v52  ;;  %2071 = vmatprep.subr.bf16.mxu1 %v6118_v53  ;;  %v6224_v52 = vld [vmem:[#allocation11 + $0x160] ss:$8 sps:$4 sm:$0xff]   ;;  %v6229_v53 = vld [vmem:[#allocation11 + $0x154] ss:$8 sps:$4 sm:$0xff]  }
 0x156   :  { %2047 = vmatpush2.bf16.msra.mxu0 %v6113_v54  ;;  %2072 = vmatpush1.bf16.msra.mxu1 %v6116_v55  ;;  %v6190_v54 = vld [vmem:[#allocation11 + $0x24] ss:$8 sps:$4 sm:$0xff]  }
 0x157   :  { %2048 = vmatprep.subr.bf16.mxu0 %v6121_v56  ;;  %2073 = vmatprep.subr.bf16.mxu1 %v6124_v58  ;;  %v6232_v55 = vld [vmem:[#allocation11 + $0x144] ss:$8 sps:$4 sm:$0xff]   ;;  %v6188_v56 = vld [vmem:[#allocation11 + $0x20] ss:$8 sps:$4 sm:$0xff]  }
 0x158   :  { %v6230_v58 = vld [vmem:[#allocation11 + $0x140] ss:$8 sps:$4 sm:$0xff]  }
 0x15a   :  { %2049 = vmatpush2.bf16.msra.mxu0 %v6119_v59  ;;  %2074 = vmatpush1.bf16.msra.mxu1 %v6122_v60  ;;  %v6193_v59 = vld [vmem:[#allocation11 + $0x14] ss:$8 sps:$4 sm:$0xff]  }
 0x15b   :  { %2075 = vmatprep.subr.bf16.mxu1 %v6127_v61  ;;  %2100 = vmatprep.subr.bf16.mxu0 %v6130_v62  ;;  %v6235_v60 = vld [vmem:[#allocation11 + $0x134] ss:$8 sps:$4 sm:$0xff]   ;;  %v6191_v61 = vld [vmem:[#allocation11 + $0x10] ss:$8 sps:$4 sm:$0xff]  }
 0x15c   :  { %v6233_v62 = vld [vmem:[#allocation11 + $0x130] ss:$8 sps:$4 sm:$0xff]  }
 0x15d   :  { %v7165_v6 = vpop.f32.mrf.mxu0  ;;  %v7167_v7 = vpop.f32.mrf.mxu1  ;;  %2051 = vmatmul.mubr.bf16.vlgmr.msra.gmra.mxu0 %v7147_v46  ;;  %v6148_v46 = vld [vmem:[#allocation8 + $0x68c] ss:$16 sps:$4 sm:$0xff]  }
 0x15e   :  { %2076 = vmatpush2.bf16.msra.mxu1 %v6125_v63  ;;  %2101 = vmatpush1.bf16.msra.mxu0 %v6128_v2  ;;  %v6196_v63 = vld [vmem:[#allocation11 + $0x4] ss:$8 sps:$4 sm:$0xff]   ;;  %v6194_v2 = vld [vmem:[#allocation11] ss:$8 sps:$4 sm:$0xff]  }
 0x15f   :  { %v7170_v10 = vpop.f32.mrf.mxu0  ;;  %v7172_v11 = vpop.f32.mrf.mxu1  ;;  %2077 = vmatprep.subr.bf16.mxu1 %v6133_v3  ;;  %2102 = vmatprep.subr.bf16.mxu0 %v6136_v4  ;;  %v6199_v3 = vld [vmem:[#allocation11 + $0xf4] ss:$8 sps:$4 sm:$0xff]   ;;  %v6197_v4 = vld [vmem:[#allocation11 + $0xf0] ss:$8 sps:$4 sm:$0xff]  }
 0x160   :  { %2132 = vmatprep.mubr.bf16.mxu0 %v7007_v0 }
 0x161   :  { %v649_v16 = vpop.f32.mrf.mxu0  ;;  %v690_v17 = vpop.f32.mrf.mxu1 }
 0x162   :  { %2078 = vmatpush2.bf16.msra.mxu1 %v6131_v5  ;;  %2103 = vmatpush1.bf16.msra.mxu0 %v6134_v8  ;;  %v6202_v5 = vld [vmem:[#allocation11 + $0xe4] ss:$8 sps:$4 sm:$0xff]   ;;  %v6200_v8 = vld [vmem:[#allocation11 + $0xe0] ss:$8 sps:$4 sm:$0xff]  }
 0x163   :  { %v650_v19 = vpop.f32.mrf.mxu0  ;;  %v691_v20 = vpop.f32.mrf.mxu1  ;;  %2079 = vmatprep.subr.bf16.mxu1 %v6139_v9  ;;  %2104 = vmatprep.subr.bf16.mxu0 %v6142_v14  ;;  %v6236_v17 = vld [vmem:[#allocation11 + $0x120] ss:$8 sps:$4 sm:$0xff]  }
 0x164   :  { %v6203_v20 = vld [vmem:[#allocation11 + $0xd0] ss:$8 sps:$4 sm:$0xff]  }
 0x166   :  { %2080 = vmatpush2.bf16.msra.mxu1 %v6137_v15  ;;  %2105 = vmatpush1.bf16.msra.mxu0 %v6140_v13  ;;  %v6205_v15 = vld [vmem:[#allocation11 + $0xd4] ss:$8 sps:$4 sm:$0xff]   ;;  %v6238_v13 = vld [vmem:[#allocation11 + $0x124] ss:$8 sps:$4 sm:$0xff]  }
 0x167   :  { %2081 = vmatprep.subr.bf16.mxu1 %v6145_v18  ;;  %2106 = vmatprep.subr.bf16.mxu0 %v6148_v46 }
 0x16a   :  { %2082 = vmatpush2.bf16.msra.mxu1 %v6143_v21  ;;  %2107 = vmatpush1.bf16.msra.mxu0 %v6146_v23 }
 0x16b   :  { %2083 = vmatprep.subr.bf16.mxu1 %v6151_v24  ;;  %2108 = vmatprep.subr.bf16.mxu0 %v6154_v25  ;;  %v6241_v24 = vld [vmem:[#allocation11 + $0x114] ss:$8 sps:$4 sm:$0xff]   ;;  %v6239_v25 = vld [vmem:[#allocation11 + $0x110] ss:$8 sps:$4 sm:$0xff]  }
 0x16e   :  { %2084 = vmatpush2.bf16.msra.mxu1 %v6149_v26  ;;  %2109 = vmatpush1.bf16.msra.mxu0 %v6152_v27 }
 0x16f   :  { %2085 = vmatprep.subr.bf16.mxu1 %v6157_v28  ;;  %2110 = vmatprep.subr.bf16.mxu0 %v6160_v29  ;;  %v6244_v28 = vld [vmem:[#allocation11 + $0x104] ss:$8 sps:$4 sm:$0xff]   ;;  %v6242_v29 = vld [vmem:[#allocation11 + $0x100] ss:$8 sps:$4 sm:$0xff]  }
 0x172   :  { %2086 = vmatpush2.bf16.msra.mxu1 %v6155_v30  ;;  %2111 = vmatpush1.bf16.msra.mxu0 %v6158_v31  ;;  %v6247_v30 = vld [vmem:[#allocation11 + $0x1f4] ss:$8 sps:$4 sm:$0xff]   ;;  %v6206_v31 = vld [vmem:[#allocation11 + $0xc0] ss:$8 sps:$4 sm:$0xff]  }
 0x173   :  { %2087 = vmatprep.subr.bf16.mxu1 %v6163_v32  ;;  %2112 = vmatprep.subr.bf16.mxu0 %v6166_v33  ;;  %v6211_v32 = vld [vmem:[#allocation11 + $0xb4] ss:$8 sps:$4 sm:$0xff]   ;;  %v6245_v33 = vld [vmem:[#allocation11 + $0x1f0] ss:$8 sps:$4 sm:$0xff]  }
 0x176   :  { %2088 = vmatpush2.bf16.msra.mxu1 %v6161_v34  ;;  %2113 = vmatpush1.bf16.msra.mxu0 %v6164_v35  ;;  %v6250_v34 = vld [vmem:[#allocation11 + $0x1e4] ss:$8 sps:$4 sm:$0xff]   ;;  %v6209_v35 = vld [vmem:[#allocation11 + $0xb0] ss:$8 sps:$4 sm:$0xff]  }
 0x177   :  { %2089 = vmatprep.subr.bf16.mxu1 %v6169_v37  ;;  %2114 = vmatprep.subr.bf16.mxu0 %v6172_v38  ;;  %v6214_v37 = vld [vmem:[#allocation11 + $0xa4] ss:$8 sps:$4 sm:$0xff]   ;;  %v6248_v38 = vld [vmem:[#allocation11 + $0x1e0] ss:$8 sps:$4 sm:$0xff]  }
 0x17a   :  { %2090 = vmatpush2.bf16.msra.mxu1 %v6167_v39  ;;  %2115 = vmatpush1.bf16.msra.mxu0 %v6170_v40  ;;  %v6253_v39 = vld [vmem:[#allocation11 + $0x1d4] ss:$8 sps:$4 sm:$0xff]   ;;  %v6212_v40 = vld [vmem:[#allocation11 + $0xa0] ss:$8 sps:$4 sm:$0xff]  }
 0x17b   :  { %2571 = vmatprep.subr.bf16.mxu0 %v6175_v12  ;;  %2612 = vmatprep.subr.bf16.mxu1 %v6223_v49  ;;  %v6217_v12 = vld [vmem:[#allocation11 + $0x94] ss:$8 sps:$4 sm:$0xff]   ;;  %v6257_v49 = vld [vmem:[#allocation11 + $0x1b0] ss:$8 sps:$4 sm:$0xff]  }
 0x17d   :  { %2092 = vmatmul.mubr.bf16.vlgmr.msra.gmra.mxu1 %v7159_v57  ;;  %2133 = vmatmul.mubr.bf16.vlgmr.msra.gmra.mxu0 %v7155_v22  ;;  %v6185_v22 = vld [vmem:[#allocation11 + $0x30] ss:$8 sps:$4 sm:$0xff]  }
 0x17e   :  { %2572 = vmatpush1.bf16.msra.mxu0 %v6173_v41  ;;  %2613 = vmatpush1.bf16.msra.mxu1 %v6221_v48  ;;  %v6227_v57 = vld [vmem:[#allocation11 + $0x150] ss:$8 sps:$4 sm:$0xff]   ;;  %v6218_v48 = vld [vmem:[#allocation11 + $0x80] ss:$8 sps:$4 sm:$0xff]  }
 0x17f   :  { %2573 = vmatprep.subr.bf16.mxu0 %v6178_v42  ;;  %2614 = vmatprep.subr.bf16.mxu1 %v6226_v1  ;;  %v6251_v41 = vld [vmem:[#allocation11 + $0x1d0] ss:$8 sps:$4 sm:$0xff]   ;;  %v6256_v42 = vld [vmem:[#allocation11 + $0x1c4] ss:$8 sps:$4 sm:$0xff]  }
 0x182   :  { %2574 = vmatpush1.bf16.msra.mxu0 %v6176_v45  ;;  %2615 = vmatpush1.bf16.msra.mxu1 %v6224_v52  ;;  %v6215_v45 = vld [vmem:[#allocation11 + $0x90] ss:$8 sps:$4 sm:$0xff]  }
 0x183   :  { %2575 = vmatprep.subr.bf16.mxu0 %v6181_v43  ;;  %2616 = vmatprep.subr.bf16.mxu1 %v6229_v53  ;;  %v6220_v43 = vld [vmem:[#allocation11 + $0x84] ss:$8 sps:$4 sm:$0xff]  }
 0x186   :  { %2576 = vmatpush1.bf16.msra.mxu0 %v6179_v44  ;;  %2617 = vmatpush1.bf16.msra.mxu1 %v6227_v57  ;;  %v6254_v44 = vld [vmem:[#allocation11 + $0x1c0] ss:$8 sps:$4 sm:$0xff]   ;;  %v6263_v57 = vld [vmem:[#allocation11 + $0x190] ss:$8 sps:$4 sm:$0xff]  }
 0x187   :  { %2577 = vmatprep.subr.bf16.mxu0 %v6184_v47  ;;  %2618 = vmatprep.subr.bf16.mxu1 %v6232_v55  ;;  %v6259_v47 = vld [vmem:[#allocation11 + $0x1b4] ss:$8 sps:$4 sm:$0xff]   ;;  %v6268_v55 = vld [vmem:[#allocation11 + $0x184] ss:$8 sps:$4 sm:$0xff]  }
 0x18a   :  { %2578 = vmatpush1.bf16.msra.mxu0 %v6182_v50  ;;  %2619 = vmatpush1.bf16.msra.mxu1 %v6230_v58  ;;  %v6262_v50 = vld [vmem:[#allocation11 + $0x1a4] ss:$8 sps:$4 sm:$0xff]   ;;  %v2143_v58 = vlaneseq }
 0x18b   :  { %2579 = vmatprep.subr.bf16.mxu0 %v6187_v51  ;;  %2620 = vmatprep.subr.bf16.mxu1 %v6235_v60  ;;  %v6260_v51 = vld [vmem:[#allocation11 + $0x1a0] ss:$8 sps:$4 sm:$0xff]  }
 0x18e   :  { %2580 = vmatpush1.bf16.msra.mxu0 %v6185_v22  ;;  %2621 = vmatpush1.bf16.msra.mxu1 %v6233_v62  ;;  %v6265_v22 = vld [vmem:[#allocation11 + $0x194] ss:$8 sps:$4 sm:$0xff]   ;;  %v7194_v62 = vld [vmem:[%s7301_s5] sm:$0xf] }
 0x18f   :  { %2581 = vmatprep.subr.bf16.mxu0 %v6190_v54  ;;  %2622 = vmatprep.subr.bf16.mxu1 %v6238_v13 }
 0x192   :  { %2582 = vmatpush1.bf16.msra.mxu0 %v6188_v56  ;;  %2623 = vmatpush1.bf16.msra.mxu1 %v6236_v17  ;;  %v6266_v56 = vld [vmem:[#allocation11 + $0x180] ss:$8 sps:$4 sm:$0xff]  }
 0x193   :  { %2583 = vmatprep.subr.bf16.mxu0 %v6193_v59  ;;  %2624 = vmatprep.subr.bf16.mxu1 %v6241_v24  ;;  %v7184_v59 = vshrl.u32 %v2143_v58, 7 }
 0x196   :  { %2584 = vmatpush1.bf16.msra.mxu0 %v6191_v61  ;;  %2625 = vmatpush1.bf16.msra.mxu1 %v6239_v25  ;;  %v7189_v61 = vsub.s32 0, %v7184_v59 }
 0x197   :  { %2585 = vmatprep.subr.bf16.mxu0 %v6196_v63  ;;  %2626 = vmatprep.subr.bf16.mxu1 %v6244_v28  ;;  %v7197_v63 = vsub.s32 1, %v7184_v59 }
 0x19a   :  { %2586 = vmatpush1.bf16.msra.mxu0 %v6194_v2  ;;  %2627 = vmatpush1.bf16.msra.mxu1 %v6242_v29 }
 0x19b   :  { %2587 = vmatprep.subr.bf16.mxu0 %v6199_v3  ;;  %2628 = vmatprep.subr.bf16.mxu1 %v6247_v30  ;;  %v6269_v30 = vld [vmem:[#allocation16 + $0xe0] ss:$16 sps:$4 sm:$0xff]  }
 0x19d   :  { %v1847_v9 = vpop.f32.mrf.mxu0  ;;  %v1888_v14 = vpop.f32.mrf.mxu1 }
 0x19e   :  { %v1848_v16 = vadd.f32 %v1847_v9, %v7165_v6  ;;  %2588 = vmatpush2.bf16.msra.mxu0 %v6197_v4  ;;  %v6208_v6 = vld [vmem:[#allocation11 + $0xc4] ss:$8 sps:$4 sm:$0xff]   ;;  %2629 = vmatpush2.bf16.msra.mxu1 %v6245_v33 }
 0x19f   :  { %v7178_v18 = vpop.f32.mrf.mxu0  ;;  %v7180_v46 = vpop.f32.mrf.mxu1  ;;  %2589 = vmatprep.subr.bf16.mxu0 %v6202_v5  ;;  %2630 = vmatprep.subr.bf16.mxu1 %v6250_v34  ;;  %v2146_v5 = vrot.slane %v7194_v62, %v7189_v61  ;;  %v6277_v33 = vld [vmem:[#allocation16 + $0xc4] ss:$16 sps:$4 sm:$0xff]   ;;  %v6275_v34 = vld [vmem:[#allocation16 + $0xc0] ss:$16 sps:$4 sm:$0xff]  }
 0x1a0   :  { %v7182_v19 = vadd.f32 %v1888_v14, %v1848_v16  ;;  %v1850_v60 = vadd.f32 %v7178_v18, %v7170_v10  ;;  %v2150_v14 = vrot.slane %v7194_v62, %v7197_v63 }
 0x1a1   :  { %v1851_v21 = vpop.f32.mrf.mxu0  ;;  %v1892_v23 = vpop.f32.mrf.mxu1 }
 0x1a2   :  { %2590 = vmatpush2.bf16.msra.mxu0 %v6200_v8  ;;  %2631 = vmatpush2.bf16.msra.mxu1 %v6248_v38  ;;  %v1891_v3 = vadd.f32 %v7180_v46, %v1850_v60  ;;  %v6289_v38 = vld [vmem:[#allocation16 + $0x84] ss:$16 sps:$4 sm:$0xff]  }
 0x1a3   :  { %v1852_v26 = vpop.f32.mrf.mxu0  ;;  %v1893_v27 = vpop.f32.mrf.mxu1  ;;  %2591 = vmatprep.subr.bf16.mxu0 %v6205_v15  ;;  %2632 = vmatprep.subr.bf16.mxu1 %v6253_v39 }
 0x1a6   :  { %2592 = vmatpush2.bf16.msra.mxu0 %v6203_v20  ;;  %2633 = vmatpush2.bf16.msra.mxu1 %v6251_v41 }
 0x1a7   :  { %2593 = vmatprep.subr.bf16.mxu0 %v6208_v6  ;;  %2634 = vmatprep.subr.bf16.mxu1 %v6256_v42  ;;  %v7212_v42 = vsub.s32 3, %v7184_v59 }
 0x1aa   :  { %2594 = vmatpush2.bf16.msra.mxu0 %v6206_v31  ;;  %2635 = vmatpush2.bf16.msra.mxu1 %v6254_v44  ;;  %v6271_v31 = vld [vmem:[#allocation16 + $0xe4] ss:$16 sps:$4 sm:$0xff]  }
 0x1ab   :  { %2595 = vmatprep.subr.bf16.mxu0 %v6211_v32  ;;  %2636 = vmatprep.subr.bf16.mxu1 %v6259_v47  ;;  %v6274_v32 = vld [vmem:[#allocation16 + $0xec] ss:$16 sps:$4 sm:$0xff]   ;;  %v6295_v47 = vld [vmem:[#allocation16 + $0x64] ss:$16 sps:$4 sm:$0xff]  }
 0x1ae   :  { %2596 = vmatpush2.bf16.msra.mxu0 %v6209_v35  ;;  %2637 = vmatpush2.bf16.msra.mxu1 %v6257_v49  ;;  %v6283_v35 = vld [vmem:[#allocation16 + $0xa4] ss:$16 sps:$4 sm:$0xff]  }
 0x1af   :  { %2597 = vmatprep.subr.bf16.mxu0 %v6214_v37  ;;  %2638 = vmatprep.subr.bf16.mxu1 %v6262_v50  ;;  %v6281_v37 = vld [vmem:[#allocation16 + $0xa0] ss:$16 sps:$4 sm:$0xff]  }
 0x1b2   :  { %2598 = vmatpush2.bf16.msra.mxu0 %v6212_v40  ;;  %2639 = vmatpush2.bf16.msra.mxu1 %v6260_v51  ;;  %v7208_v40 = vsub.s32 2, %v7184_v59 }
 0x1b3   :  { %2599 = vmatprep.subr.bf16.mxu0 %v6217_v12  ;;  %2640 = vmatprep.subr.bf16.mxu1 %v6265_v22 }
 0x1b6   :  { %2600 = vmatpush2.bf16.msra.mxu0 %v6215_v45  ;;  %2641 = vmatpush2.bf16.msra.mxu1 %v6263_v57  ;;  %v6287_v45 = vld [vmem:[#allocation16 + $0x80] ss:$16 sps:$4 sm:$0xff]  }
 0x1b7   :  { %2601 = vmatprep.subr.bf16.mxu0 %v6220_v43  ;;  %2642 = vmatprep.subr.bf16.mxu1 %v6268_v55 }
 0x1ba   :  { %2602 = vmatpush2.bf16.msra.mxu0 %v6218_v48  ;;  %2643 = vmatpush2.bf16.msra.mxu1 %v6266_v56 }
 0x1bb   :  { %2883 = vmatprep.subr.bf16.mxu0 %v6271_v31  ;;  %2924 = vmatprep.subr.bf16.mxu1 %v6274_v32  ;;  %v6322_v31 = vld [vmem:[#allocation14 + $0xec] ss:$16 sps:$4 sm:$0xff]   ;;  %v6320_v32 = vld [vmem:[#allocation14 + $0xe8] ss:$16 sps:$4 sm:$0xff]  }
 0x1bd   :  { %v1970_v1 = vpop.f32.mrf.mxu1 }
 0x1bf   :  { %v1972_v52 = vpop.f32.mrf.mxu1 }
 0x1c1   :  { %v1974_v53 = vpop.f32.mrf.mxu1 }
 0x1c2   :  { %v6293_v53 = vld [vmem:[#allocation16 + $0x60] ss:$16 sps:$4 sm:$0xff]  }
 0x1c3   :  { %v1975_v54 = vpop.f32.mrf.mxu1 }
 0x1c4   :  { %v6301_v54 = vld [vmem:[#allocation16 + $0x44] ss:$16 sps:$4 sm:$0xff]  }
 0x1dd   :  { %v1929_v2 = vpop.f32.mrf.mxu0 }
 0x1de   :  { %v1930_v4 = vadd.f32 %v1929_v2, %v7182_v19 }
 0x1df   :  { %v1931_v10 = vpop.f32.mrf.mxu0 }
 0x1e0   :  { %v1971_v8 = vadd.f32 %v1970_v1, %v1930_v4  ;;  %v1932_v9 = vadd.f32 %v1931_v10, %v1891_v3  ;;  %v6299_v3 = vld [vmem:[#allocation16 + $0x40] ss:$16 sps:$4 sm:$0xff]  }
 0x1e1   :  { %v1933_v15 = vpop.f32.mrf.mxu0 }
 0x1e2   :  { %v2163_v13 = vadd.f32 %v2146_v5, %v1971_v8  ;;  %v1973_v16 = vadd.f32 %v1972_v52, %v1932_v9  ;;  %v6307_v5 = vld [vmem:[#allocation16 + $0x24] ss:$16 sps:$4 sm:$0xff]   ;;  %v6272_v9 = vld [vmem:[#allocation16 + $0xe8] ss:$16 sps:$4 sm:$0xff]   ;;  %v6280_v15 = vld [vmem:[#allocation16 + $0xcc] ss:$16 sps:$4 sm:$0xff]  }
 0x1e3   :  { %v1934_v17 = vpop.f32.mrf.mxu0 }
 0x1e4   :  { %v2164_v18 = vadd.f32 %v2150_v14, %v1973_v16  ;;  %v2167_v20 = vmax.f32 %v2163_v13, 0.0  ;;  %v6313_v13 = vld [vmem:[#allocation16 + $0x4] ss:$16 sps:$4 sm:$0xff]   ;;  %v6278_v16 = vld [vmem:[#allocation16 + $0xc8] ss:$16 sps:$4 sm:$0xff]  }
 0x1e5   :  { %v6311_v17 = vld [vmem:[#allocation16] ss:$16 sps:$4 sm:$0xff]  }
 0x1e6   :  { %v2168_v21 = vmax.f32 %v2164_v18, 0.0  ;;  %v2171_v46 = vpack.c.bf16 %v2167_v20, %v2167_v20  ;;  %v6286_v18 = vld [vmem:[#allocation16 + $0xac] ss:$16 sps:$4 sm:$0xff]   ;;  %v6319_v20 = vld [vmem:[#allocation14 + $0xe4] ss:$16 sps:$4 sm:$0xff]  }
 0x1e8   :  { %v2172_v23 = vpack.c.bf16 %v2168_v21, %v2168_v21  ;;  %v6284_v21 = vld [vmem:[#allocation16 + $0xa8] ss:$16 sps:$4 sm:$0xff]  }
 0x1ea   :  { %2603 = vmatprep.mubr.bf16.mxu0 %v2172_v23  ;;  %v6317_v23 = vld [vmem:[#allocation14 + $0xe0] ss:$16 sps:$4 sm:$0xff]  }
 0x1eb   :  { %2604 = vmatmul.mubr.bf16.vlgmr.msra.gmra.mxu0 %v2171_v46  ;;  %v6292_v46 = vld [vmem:[#allocation16 + $0x8c] ss:$16 sps:$4 sm:$0xff]  }
 0x1ec   :  { %2915 = vmatprep.mubr.bf16.mxu0 %v7007_v0  ;;  %2884 = vmatpush1.bf16.msra.mxu0 %v6269_v30  ;;  %v6314_v30 = vld [vmem:[#allocation16 + $0x8] ss:$16 sps:$4 sm:$0xff]  }
 0x1ed   :  { %2885 = vmatprep.subr.bf16.mxu0 %v6277_v33  ;;  %v6325_v33 = vld [vmem:[#allocation14 + $0xc4] ss:$16 sps:$4 sm:$0xff]  }
 0x1f0   :  { %2886 = vmatpush1.bf16.msra.mxu0 %v6275_v34  ;;  %v6328_v34 = vld [vmem:[#allocation14 + $0xcc] ss:$16 sps:$4 sm:$0xff]  }
 0x1f1   :  { %2887 = vmatprep.subr.bf16.mxu0 %v6283_v35  ;;  %v6323_v35 = vld [vmem:[#allocation14 + $0xc0] ss:$16 sps:$4 sm:$0xff]  }
 0x1f4   :  { %2888 = vmatpush1.bf16.msra.mxu0 %v6281_v37  ;;  %v6326_v37 = vld [vmem:[#allocation14 + $0xc8] ss:$16 sps:$4 sm:$0xff]  }
 0x1f5   :  { %2889 = vmatprep.subr.bf16.mxu0 %v6289_v38  ;;  %v6331_v38 = vld [vmem:[#allocation14 + $0xa4] ss:$16 sps:$4 sm:$0xff]  }
 0x1f8   :  { %2890 = vmatpush1.bf16.msra.mxu0 %v6287_v45  ;;  %v6340_v45 = vld [vmem:[#allocation14 + $0x8c] ss:$16 sps:$4 sm:$0xff]  }
 0x1f9   :  { %2891 = vmatprep.subr.bf16.mxu0 %v6295_v47  ;;  %v6341_v47 = vld [vmem:[#allocation14 + $0x60] ss:$16 sps:$4 sm:$0xff]  }
 0x1fc   :  { %2892 = vmatpush1.bf16.msra.mxu0 %v6293_v53  ;;  %v6353_v53 = vld [vmem:[#allocation14 + $0x20] ss:$16 sps:$4 sm:$0xff]  }
 0x1fd   :  { %v2011_v19 = vpop.f32.mrf.mxu1  ;;  %2893 = vmatprep.subr.bf16.mxu0 %v6301_v54  ;;  %v6364_v54 = vld [vmem:[#allocation14 + $0xc] ss:$16 sps:$4 sm:$0xff]  }
 0x1fe   :  { %v2012_v39 = vadd.f32 %v2011_v19, %v7167_v7  ;;  %v2154_v7 = vrot.slane %v7194_v62, %v7208_v40  ;;  %v6290_v19 = vld [vmem:[#allocation16 + $0x88] ss:$16 sps:$4 sm:$0xff]  }
 0x1ff   :  { %v2013_v24 = vpop.f32.mrf.mxu1 }
 0x200   :  { %v2014_v12 = vadd.f32 %v2013_v24, %v7172_v11  ;;  %v2158_v11 = vrot.slane %v7194_v62, %v7212_v42  ;;  %2894 = vmatpush1.bf16.msra.mxu0 %v6299_v3  ;;  %v6305_v62 = vld [vmem:[#allocation16 + $0x20] ss:$16 sps:$4 sm:$0xff]   ;;  %v6298_v24 = vld [vmem:[#allocation16 + $0x6c] ss:$16 sps:$4 sm:$0xff]  }
 0x201   :  { %v2015_v25 = vpop.f32.mrf.mxu1  ;;  %2895 = vmatprep.subr.bf16.mxu0 %v6307_v5 }
 0x202   :  { %v6296_v25 = vld [vmem:[#allocation16 + $0x68] ss:$16 sps:$4 sm:$0xff]  }
 0x203   :  { %v2016_v26 = vpop.f32.mrf.mxu1 }
 0x204   :  { %2896 = vmatpush1.bf16.msra.mxu0 %v6305_v62  ;;  %v6304_v26 = vld [vmem:[#allocation16 + $0x4c] ss:$16 sps:$4 sm:$0xff]  }
 0x205   :  { %2897 = vmatprep.subr.bf16.mxu0 %v6313_v13 }
 0x208   :  { %2898 = vmatpush1.bf16.msra.mxu0 %v6311_v17 }
 0x209   :  { %3125 = vmatprep.subr.bf16.mxu0 %v6319_v20 }
 0x20b   :  { %2916 = vmatmul.mubr.bf16.vlgmr.msra.gmra.mxu0 %v7135_v36 }
 0x20c   :  { %3126 = vmatpush1.bf16.msra.mxu0 %v6317_v23  ;;  %3157 = vmatprep.mubr.bf16.mxu0 %v7007_v0 }
 0x20d   :  { %3127 = vmatprep.subr.bf16.mxu0 %v6325_v33  ;;  %v6376_v33 = vld [vmem:[#allocation17 + $0x4d4] ss:$28 sps:$4 sm:$0xff]  }
 0x210   :  { %3128 = vmatpush1.bf16.msra.mxu0 %v6323_v35  ;;  %v6374_v35 = vld [vmem:[#allocation17 + $0x4d0] ss:$28 sps:$4 sm:$0xff]  }
 0x211   :  { %3129 = vmatprep.subr.bf16.mxu0 %v6331_v38  ;;  %v6382_v38 = vld [vmem:[#allocation17 + $0x49c] ss:$28 sps:$4 sm:$0xff]  }
 0x21d   :  { %v2052_v27 = vpop.f32.mrf.mxu0 }
 0x21e   :  { %v2053_v41 = vadd.f32 %v2052_v27, %v2012_v39  ;;  %v6302_v27 = vld [vmem:[#allocation16 + $0x48] ss:$16 sps:$4 sm:$0xff]   ;;  %v6334_v39 = vld [vmem:[#allocation14 + $0xac] ss:$16 sps:$4 sm:$0xff]  }
 0x21f   :  { %v2054_v6 = vpop.f32.mrf.mxu0 }
 0x220   :  { %v2055_v48 = vadd.f32 %v2054_v6, %v2014_v12  ;;  %v6310_v6 = vld [vmem:[#allocation16 + $0x2c] ss:$16 sps:$4 sm:$0xff]   ;;  %v6329_v12 = vld [vmem:[#allocation14 + $0xa0] ss:$16 sps:$4 sm:$0xff]  }
 0x221   :  { %v2056_v28 = vpop.f32.mrf.mxu0  ;;  %3130 = vmatpush1.bf16.msra.mxu0 %v6329_v12  ;;  %v6377_v12 = vld [vmem:[#allocation17 + $0x118] ss:$28 sps:$4 sm:$0xff]  }
 0x222   :  { %v6308_v28 = vld [vmem:[#allocation16 + $0x28] ss:$16 sps:$4 sm:$0xff]  }
 0x223   :  { %v2057_v29 = vpop.f32.mrf.mxu0 }
 0x224   :  { %v6316_v29 = vld [vmem:[#allocation16 + $0xc] ss:$16 sps:$4 sm:$0xff]  }
 0x23d   :  { %v2093_v43 = vpop.f32.mrf.mxu1  ;;  %v2134_v44 = vpop.f32.mrf.mxu0 }
 0x23e   :  { %v2094_v49 = vadd.f32 %v2093_v43, %v2053_v41  ;;  %v6332_v41 = vld [vmem:[#allocation14 + $0xa8] ss:$16 sps:$4 sm:$0xff]   ;;  %v6335_v43 = vld [vmem:[#allocation14 + $0x80] ss:$16 sps:$4 sm:$0xff]  }
 0x23f   :  { %v2095_v1 = vpop.f32.mrf.mxu1  ;;  %v2136_v50 = vpop.f32.mrf.mxu0 }
 0x240   :  { %v2135_v51 = vadd.f32 %v2134_v44, %v2094_v49  ;;  %v2096_v52 = vadd.f32 %v2095_v1, %v2055_v48  ;;  %v6343_v44 = vld [vmem:[#allocation14 + $0x64] ss:$16 sps:$4 sm:$0xff]   ;;  %v6344_v48 = vld [vmem:[#allocation14 + $0x68] ss:$16 sps:$4 sm:$0xff]   ;;  %v6346_v49 = vld [vmem:[#allocation14 + $0x6c] ss:$16 sps:$4 sm:$0xff]  }
 0x241   :  { %v2097_v22 = vpop.f32.mrf.mxu1  ;;  %v2138_v57 = vpop.f32.mrf.mxu0  ;;  %v6352_v1 = vld [vmem:[#allocation14 + $0x4c] ss:$16 sps:$4 sm:$0xff]  }
 0x242   :  { %v2165_v55 = vadd.f32 %v2154_v7, %v2135_v51  ;;  %v2137_v56 = vadd.f32 %v2136_v50, %v2096_v52  ;;  %v6349_v7 = vld [vmem:[#allocation14 + $0x44] ss:$16 sps:$4 sm:$0xff]   ;;  %v6347_v50 = vld [vmem:[#allocation14 + $0x40] ss:$16 sps:$4 sm:$0xff]   ;;  %v6350_v51 = vld [vmem:[#allocation14 + $0x48] ss:$16 sps:$4 sm:$0xff]  }
 0x243   :  { %v2098_v58 = vpop.f32.mrf.mxu1  ;;  %v2139_v60 = vpop.f32.mrf.mxu0  ;;  %v6355_v52 = vld [vmem:[#allocation14 + $0x24] ss:$16 sps:$4 sm:$0xff]   ;;  %v6356_v22 = vld [vmem:[#allocation14 + $0x28] ss:$16 sps:$4 sm:$0xff]  }
 0x244   :  { %v2166_v2 = vadd.f32 %v2158_v11, %v2137_v56  ;;  %v2169_v4 = vmax.f32 %v2165_v55, 0.0  ;;  %v6358_v11 = vld [vmem:[#allocation14 + $0x2c] ss:$16 sps:$4 sm:$0xff]   ;;  %v6361_v57 = vld [vmem:[#allocation14 + $0x4] ss:$16 sps:$4 sm:$0xff]  }
 0x245   :  { %v6359_v55 = vld [vmem:[#allocation14] ss:$16 sps:$4 sm:$0xff]   ;;  %v6362_v56 = vld [vmem:[#allocation14 + $0x8] ss:$16 sps:$4 sm:$0xff]  }
 0x246   :  { %v2170_v10 = vmax.f32 %v2166_v2, 0.0  ;;  %v2173_v14 = vpack.c.bf16 %v2169_v4, %v2169_v4  ;;  %v6367_v58 = vld [vmem:[#allocation17 + $0x18c] ss:$28 sps:$4 sm:$0xff]  }
 0x247   :  { %v6370_v60 = vld [vmem:[#allocation17 + $0x50c] ss:$28 sps:$4 sm:$0xff]  }
 0x248   :  { %v2174_v8 = vpack.c.bf16 %v2170_v10, %v2170_v10  ;;  %v2239_v10 = vld [vmem:[#allocation13] sm:$0x3] }
 0x24a   :  { %2644 = vmatprep.mubr.bf16.mxu1 %v2174_v8  ;;  %v2244_v8 = vrot.slane %v2239_v10, %v7189_v61 }
 0x24b   :  { %2645 = vmatmul.mubr.bf16.vlgmr.msra.gmra.mxu1 %v2173_v14 }
 0x24c   :  { %2925 = vmatpush1.bf16.msra.mxu1 %v6272_v9  ;;  %2956 = vmatprep.mubr.bf16.mxu1 %v7007_v0  ;;  %v2248_v9 = vrot.slane %v2239_v10, %v7197_v63  ;;  %v6416_v10 = vld [vmem:[#allocation17 + $0x6c8] ss:$28 sps:$4 sm:$0xff]  }
 0x24d   :  { %2926 = vmatprep.subr.bf16.mxu1 %v6280_v15 }
 0x250   :  { %2927 = vmatpush1.bf16.msra.mxu1 %v6278_v16 }
 0x251   :  { %2928 = vmatprep.subr.bf16.mxu1 %v6286_v18 }
 0x254   :  { %2929 = vmatpush1.bf16.msra.mxu1 %v6284_v21 }
 0x255   :  { %2930 = vmatprep.subr.bf16.mxu1 %v6292_v46 }
 0x258   :  { %2931 = vmatpush1.bf16.msra.mxu1 %v6290_v19 }
 0x259   :  { %2932 = vmatprep.subr.bf16.mxu1 %v6298_v24 }
 0x25c   :  { %2933 = vmatpush1.bf16.msra.mxu1 %v6296_v25 }
 0x25d   :  { %2934 = vmatprep.subr.bf16.mxu1 %v6304_v26  ;;  %v194_v26 = vld [vmem:[#allocation7] sm:$0xff] }
 0x260   :  { %2935 = vmatpush1.bf16.msra.mxu1 %v6302_v27 }
 0x261   :  { %2936 = vmatprep.subr.bf16.mxu1 %v6310_v6 }
 0x264   :  { %2937 = vmatpush1.bf16.msra.mxu1 %v6308_v28 }
 0x265   :  { %2938 = vmatprep.subr.bf16.mxu1 %v6316_v29  ;;  %v6365_v29 = vld [vmem:[#allocation17 + $0x188] ss:$28 sps:$4 sm:$0xff]  }
 0x268   :  { %2939 = vmatpush1.bf16.msra.mxu1 %v6314_v30  ;;  %v6368_v30 = vld [vmem:[#allocation17 + $0x508] ss:$28 sps:$4 sm:$0xff]  }
 0x269   :  { %3166 = vmatprep.subr.bf16.mxu1 %v6322_v31 }
 0x26b   :  { %2957 = vmatmul.mubr.bf16.vlgmr.msra.gmra.mxu1 %v7135_v36  ;;  %v6337_v36 = vld [vmem:[#allocation14 + $0x84] ss:$16 sps:$4 sm:$0xff]  }
 0x26c   :  { %3167 = vmatpush1.bf16.msra.mxu1 %v6320_v32  ;;  %3198 = vmatprep.mubr.bf16.mxu1 %v7007_v0  ;;  %v6338_v0 = vld [vmem:[#allocation14 + $0x88] ss:$16 sps:$4 sm:$0xff]   ;;  %v6373_v32 = vld [vmem:[#allocation17 + $0x154] ss:$28 sps:$4 sm:$0xff]  }
 0x26d   :  { %3168 = vmatprep.subr.bf16.mxu1 %v6328_v34  ;;  %3131 = vmatprep.subr.bf16.mxu0 %v6337_v36  ;;  %v6371_v34 = vld [vmem:[#allocation17 + $0x150] ss:$28 sps:$4 sm:$0xff]  }
 0x26e   :  { %3132 = vmatpush1.bf16.msra.mxu0 %v6335_v43  ;;  %v6388_v43 = vld [vmem:[#allocation17 + $0x464] ss:$28 sps:$4 sm:$0xff]  }
 0x26f   :  { %3133 = vmatprep.subr.bf16.mxu0 %v6343_v44  ;;  %v6383_v44 = vld [vmem:[#allocation17 + $0xe0] ss:$28 sps:$4 sm:$0xff]  }
 0x270   :  { %3169 = vmatpush1.bf16.msra.mxu1 %v6326_v37  ;;  %v6379_v37 = vld [vmem:[#allocation17 + $0x11c] ss:$28 sps:$4 sm:$0xff]  }
 0x271   :  { %3170 = vmatprep.subr.bf16.mxu1 %v6334_v39 }
 0x272   :  { %3134 = vmatpush1.bf16.msra.mxu0 %v6341_v47  ;;  %v6386_v47 = vld [vmem:[#allocation17 + $0x460] ss:$28 sps:$4 sm:$0xff]  }
 0x273   :  { %3135 = vmatprep.subr.bf16.mxu0 %v6349_v7  ;;  %v6394_v7 = vld [vmem:[#allocation17 + $0x42c] ss:$28 sps:$4 sm:$0xff]  }
 0x274   :  { %3171 = vmatpush1.bf16.msra.mxu1 %v6332_v41  ;;  %v6380_v41 = vld [vmem:[#allocation17 + $0x498] ss:$28 sps:$4 sm:$0xff]  }
 0x275   :  { %3172 = vmatprep.subr.bf16.mxu1 %v6340_v45  ;;  %v6385_v45 = vld [vmem:[#allocation17 + $0xe4] ss:$28 sps:$4 sm:$0xff]  }
 0x276   :  { %3136 = vmatpush1.bf16.msra.mxu0 %v6347_v50  ;;  %v6392_v50 = vld [vmem:[#allocation17 + $0x428] ss:$28 sps:$4 sm:$0xff]  }
 0x277   :  { %3137 = vmatprep.subr.bf16.mxu0 %v6355_v52  ;;  %v6400_v52 = vld [vmem:[#allocation17 + $0x3f4] ss:$28 sps:$4 sm:$0xff]  }
 0x278   :  { %3173 = vmatpush1.bf16.msra.mxu1 %v6338_v0 }
 0x279   :  { %3174 = vmatprep.subr.bf16.mxu1 %v6346_v49  ;;  %v6391_v49 = vld [vmem:[#allocation17 + $0xac] ss:$28 sps:$4 sm:$0xff]  }
 0x27a   :  { %3138 = vmatpush1.bf16.msra.mxu0 %v6353_v53  ;;  %v6398_v53 = vld [vmem:[#allocation17 + $0x3f0] ss:$28 sps:$4 sm:$0xff]  }
 0x27b   :  { %3139 = vmatprep.subr.bf16.mxu0 %v6361_v57  ;;  %v6406_v57 = vld [vmem:[#allocation17 + $0x3bc] ss:$28 sps:$4 sm:$0xff]  }
 0x27c   :  { %3175 = vmatpush1.bf16.msra.mxu1 %v6344_v48 }
 0x27d   :  { %3176 = vmatprep.subr.bf16.mxu1 %v6352_v1  ;;  %v6389_v1 = vld [vmem:[#allocation17 + $0xa8] ss:$28 sps:$4 sm:$0xff]  }
 0x27e   :  { %3140 = vmatpush1.bf16.msra.mxu0 %v6359_v55  ;;  %v6404_v55 = vld [vmem:[#allocation17 + $0x3b8] ss:$28 sps:$4 sm:$0xff]  }
 0x27f   :  { %4686 = vmatprep.subr.bf16.mxu0 %v6367_v58  ;;  %v6412_v58 = vld [vmem:[#allocation17 + $0x384] ss:$28 sps:$4 sm:$0xff]  }
 0x280   :  { %3177 = vmatpush1.bf16.msra.mxu1 %v6350_v51  ;;  %v6397_v51 = vld [vmem:[#allocation17 + $0x74] ss:$28 sps:$4 sm:$0xff]  }
 0x281   :  { %3178 = vmatprep.subr.bf16.mxu1 %v6358_v11  ;;  %v6395_v11 = vld [vmem:[#allocation17 + $0x70] ss:$28 sps:$4 sm:$0xff]  }
 0x284   :  { %3179 = vmatpush1.bf16.msra.mxu1 %v6356_v22  ;;  %v6403_v22 = vld [vmem:[#allocation17 + $0x3c] ss:$28 sps:$4 sm:$0xff]  }
 0x285   :  { %3180 = vmatprep.subr.bf16.mxu1 %v6364_v54  ;;  %v6401_v54 = vld [vmem:[#allocation17 + $0x38] ss:$28 sps:$4 sm:$0xff]  }
 0x288   :  { %3181 = vmatpush1.bf16.msra.mxu1 %v6362_v56  ;;  %v6409_v56 = vld [vmem:[#allocation17 + $0x4] ss:$28 sps:$4 sm:$0xff]  }
 0x289   :  { %4727 = vmatprep.subr.bf16.mxu1 %v6370_v60  ;;  %v6407_v60 = vld [vmem:[#allocation17] ss:$28 sps:$4 sm:$0xff]  }
 0x2ab   :  { %v2605_v2 = vpop.f32.mrf.mxu0 }
 0x2ac   :  { %v2606_v62 = vadd.f32 %v2605_v2, %v2244_v8  ;;  %v6410_v2 = vld [vmem:[#allocation17 + $0x380] ss:$28 sps:$4 sm:$0xff]   ;;  %v6421_v8 = vld [vmem:[#allocation17 + $0x314] ss:$28 sps:$4 sm:$0xff]  }
 0x2ad   :  { %v2607_v3 = vpop.f32.mrf.mxu0 }
 0x2ae   :  { %v2608_v15 = vadd.f32 %v2607_v3, %v2248_v9  ;;  %v6415_v3 = vld [vmem:[#allocation17 + $0x34c] ss:$28 sps:$4 sm:$0xff]   ;;  %v6424_v9 = vld [vmem:[#allocation17 + $0x694] ss:$28 sps:$4 sm:$0xff]  }
 0x2af   :  { %v2609_v4 = vpop.f32.mrf.mxu0 }
 0x2b0   :  { %v6418_v4 = vld [vmem:[#allocation17 + $0x6cc] ss:$28 sps:$4 sm:$0xff]  }
 0x2b1   :  { %v2610_v5 = vpop.f32.mrf.mxu0 }
 0x2b2   :  { %v6413_v5 = vld [vmem:[#allocation17 + $0x348] ss:$28 sps:$4 sm:$0xff]  }
 0x2cb   :  { %v7225_v46 = vpop.f32.mrf.mxu0 }
 0x2cd   :  { %v7227_v19 = vpop.f32.mrf.mxu0 }
 0x2cf   :  { %v2921_v24 = vpop.f32.mrf.mxu0 }
 0x2d0   :  { %v6439_v24 = vld [vmem:[#allocation17 + $0x26c] ss:$28 sps:$4 sm:$0xff]  }
 0x2d1   :  { %v2922_v25 = vpop.f32.mrf.mxu0 }
 0x2d2   :  { %v6442_v25 = vld [vmem:[#allocation17 + $0x5ec] ss:$28 sps:$4 sm:$0xff]  }
 0x30b   :  { %v2646_v14 = vpop.f32.mrf.mxu1 }
 0x30c   :  { %v2647_v13 = vadd.f32 %v2646_v14, %v2606_v62  ;;  %v6419_v62 = vld [vmem:[#allocation17 + $0x310] ss:$28 sps:$4 sm:$0xff]  }
 0x30d   :  { %v2648_v16 = vpop.f32.mrf.mxu1  ;;  %v6422_v14 = vld [vmem:[#allocation17 + $0x690] ss:$28 sps:$4 sm:$0xff]  }
 0x30e   :  { %5061 = vst [vmem:[#allocation20] sm:$0xff] %v2647_v13  ;;  %v2649_v17 = vadd.f32 %v2648_v16, %v2608_v15  ;;  %v6427_v15 = vld [vmem:[#allocation17 + $0x2dc] ss:$28 sps:$4 sm:$0xff]  }
 0x30f   :  { %v2650_v18 = vpop.f32.mrf.mxu1  ;;  %v6425_v16 = vld [vmem:[#allocation17 + $0x2d8] ss:$28 sps:$4 sm:$0xff]  }
 0x310   :  { %v2653_v20 = vmul.f32 0.5, %v2649_v17  ;;  %5062 = vst [vmem:[#allocation22] sm:$0xff] %v2649_v17  ;;  %v6428_v17 = vld [vmem:[#allocation17 + $0x658] ss:$28 sps:$4 sm:$0xff]   ;;  %v6433_v18 = vld [vmem:[#allocation17 + $0x2a4] ss:$28 sps:$4 sm:$0xff]  }
 0x311   :  { %v2651_v21 = vpop.f32.mrf.mxu1 }
 0x312   :  { %v2654_v23 = vmul.f32 1.442695, %v2653_v20  ;;  %v6436_v20 = vld [vmem:[#allocation17 + $0x624] ss:$28 sps:$4 sm:$0xff]  }
 0x313   :  { %v6431_v21 = vld [vmem:[#allocation17 + $0x2a0] ss:$28 sps:$4 sm:$0xff]  }
 0x314   :  { %6685 = vpow2.f32 %v2654_v23  ;;  %v6434_v23 = vld [vmem:[#allocation17 + $0x620] ss:$28 sps:$4 sm:$0xff]  }
 0x321   :  { %v6686_v27 = vpop.eup %6685 }
 0x322   :  { %v2656_v6 = vmul.f32 %v6686_v27, %v194_v26  ;;  %v6437_v26 = vld [vmem:[#allocation17 + $0x268] ss:$28 sps:$4 sm:$0xff]  }
 0x323   :  { %v6440_v27 = vld [vmem:[#allocation17 + $0x5e8] ss:$28 sps:$4 sm:$0xff]  }
 0x324   :  { %v2657_v28 = vadd.f32 %v2656_v6, %v2647_v13  ;;  %v6430_v13 = vld [vmem:[#allocation17 + $0x65c] ss:$28 sps:$4 sm:$0xff]   ;;  %v6445_v6 = vld [vmem:[#allocation17 + $0x234] ss:$28 sps:$4 sm:$0xff]  }
 0x326   :  { %v2658_v31 = vpack.c.bf16 %v2657_v28, %v2657_v28  ;;  %v6448_v28 = vld [vmem:[#allocation17 + $0x5b4] ss:$28 sps:$4 sm:$0xff]  }
 0x328   :  { %3158 = vmatmul.mubr.bf16.vlgmr.msra.gmra.mxu0 %v2658_v31  ;;  %3199 = vmatmul.mubr.bf16.vlgmr.msra.gmra.mxu1 %v2658_v31  ;;  %v6451_v31 = vld [vmem:[#allocation17 + $0x1fc] ss:$28 sps:$4 sm:$0xff]  }
 0x329   :  { %4687 = vmatpush1.bf16.msra.mxu0 %v6365_v29  ;;  %4728 = vmatpush1.bf16.msra.mxu1 %v6368_v30  ;;  %v6443_v29 = vld [vmem:[#allocation17 + $0x230] ss:$28 sps:$4 sm:$0xff]  }
 0x32a   :  { %4688 = vmatprep.subr.bf16.mxu0 %v6373_v32  ;;  %4729 = vmatprep.subr.bf16.mxu1 %v6376_v33  ;;  %v6446_v30 = vld [vmem:[#allocation17 + $0x5b0] ss:$28 sps:$4 sm:$0xff]   ;;  %v6454_v32 = vld [vmem:[#allocation17 + $0x57c] ss:$28 sps:$4 sm:$0xff]  }
 0x32b   :  { %v7229_v39 = vpop.f32.mrf.mxu1  ;;  %v6449_v33 = vld [vmem:[#allocation17 + $0x1f8] ss:$28 sps:$4 sm:$0xff]  }
 0x32d   :  { %4689 = vmatpush1.bf16.msra.mxu0 %v6371_v34  ;;  %4730 = vmatpush1.bf16.msra.mxu1 %v6374_v35  ;;  %v7231_v36 = vpop.f32.mrf.mxu1  ;;  %v6452_v34 = vld [vmem:[#allocation17 + $0x578] ss:$28 sps:$4 sm:$0xff]   ;;  %v6457_v35 = vld [vmem:[#allocation17 + $0x1c4] ss:$28 sps:$4 sm:$0xff]  }
 0x32e   :  { %4690 = vmatprep.subr.bf16.mxu0 %v6379_v37  ;;  %4731 = vmatprep.subr.bf16.mxu1 %v6382_v38  ;;  %v6460_v37 = vld [vmem:[#allocation17 + $0x544] ss:$28 sps:$4 sm:$0xff]  }
 0x32f   :  { %v2962_v0 = vpop.f32.mrf.mxu1  ;;  %v6455_v38 = vld [vmem:[#allocation17 + $0x1c0] ss:$28 sps:$4 sm:$0xff]  }
 0x331   :  { %4691 = vmatpush1.bf16.msra.mxu0 %v6377_v12  ;;  %4732 = vmatpush1.bf16.msra.mxu1 %v6380_v41  ;;  %v2963_v48 = vpop.f32.mrf.mxu1  ;;  %v6458_v12 = vld [vmem:[#allocation17 + $0x540] ss:$28 sps:$4 sm:$0xff]   ;;  %v6463_v41 = vld [vmem:[#allocation17 + $0x194] ss:$28 sps:$4 sm:$0xff]  }
 0x332   :  { %4692 = vmatprep.subr.bf16.mxu0 %v6385_v45  ;;  %4733 = vmatprep.subr.bf16.mxu1 %v6388_v43  ;;  %v6466_v45 = vld [vmem:[#allocation17 + $0x514] ss:$28 sps:$4 sm:$0xff]  }
 0x333   :  { %v3207_v43 = vld [vmem:[%s7306_s10] sm:$0xf] }
 0x334   :  { %v3212_v0 = vrot.slane %v3207_v43, %v7189_v61 }
 0x335   :  { %4693 = vmatpush1.bf16.msra.mxu0 %v6383_v44  ;;  %4734 = vmatpush1.bf16.msra.mxu1 %v6386_v47  ;;  %v3220_v44 = vrot.slane %v3207_v43, %v7208_v40 }
 0x336   :  { %4694 = vmatprep.subr.bf16.mxu0 %v6391_v49  ;;  %4735 = vmatprep.subr.bf16.mxu1 %v6394_v7 }
 0x339   :  { %4695 = vmatpush1.bf16.msra.mxu0 %v6389_v1  ;;  %4736 = vmatpush1.bf16.msra.mxu1 %v6392_v50  ;;  %v3216_v1 = vrot.slane %v3207_v43, %v7197_v63  ;;  %v3224_v50 = vrot.slane %v3207_v43, %v7212_v42  ;;  %v6511_v43 = vld [vmem:[#allocation17 + $0x354] ss:$28 sps:$4 sm:$0xff]  }
 0x33a   :  { %4696 = vmatprep.subr.bf16.mxu0 %v6397_v51  ;;  %4737 = vmatprep.subr.bf16.mxu1 %v6400_v52 }
 0x33d   :  { %4697 = vmatpush1.bf16.msra.mxu0 %v6395_v11  ;;  %4738 = vmatpush1.bf16.msra.mxu1 %v6398_v53 }
 0x33e   :  { %4698 = vmatprep.subr.bf16.mxu0 %v6403_v22  ;;  %4739 = vmatprep.subr.bf16.mxu1 %v6406_v57 }
 0x341   :  { %4699 = vmatpush1.bf16.msra.mxu0 %v6401_v54  ;;  %4740 = vmatpush1.bf16.msra.mxu1 %v6404_v55 }
 0x342   :  { %4700 = vmatprep.subr.bf16.mxu0 %v6409_v56  ;;  %4741 = vmatprep.subr.bf16.mxu1 %v6412_v58 }
 0x345   :  { %4701 = vmatpush1.bf16.msra.mxu0 %v6407_v60  ;;  %4742 = vmatpush1.bf16.msra.mxu1 %v6410_v2 }
 0x346   :  { %4702 = vmatprep.subr.bf16.mxu0 %v6415_v3  ;;  %4743 = vmatprep.subr.bf16.mxu1 %v6418_v4 }
 0x349   :  { %4703 = vmatpush2.bf16.msra.mxu0 %v6413_v5  ;;  %4744 = vmatpush2.bf16.msra.mxu1 %v6416_v10 }
 0x34a   :  { %4704 = vmatprep.subr.bf16.mxu0 %v6421_v8  ;;  %4745 = vmatprep.subr.bf16.mxu1 %v6424_v9  ;;  %v6461_v8 = vld [vmem:[#allocation17 + $0x190] ss:$28 sps:$4 sm:$0xff]  }
 0x34b   :  { %v6464_v9 = vld [vmem:[#allocation17 + $0x510] ss:$28 sps:$4 sm:$0xff]  }
 0x34d   :  { %4705 = vmatpush2.bf16.msra.mxu0 %v6419_v62  ;;  %4746 = vmatpush2.bf16.msra.mxu1 %v6422_v14  ;;  %v6472_v14 = vld [vmem:[#allocation17 + $0x4dc] ss:$28 sps:$4 sm:$0xff]  }
 0x34e   :  { %4706 = vmatprep.subr.bf16.mxu0 %v6427_v15  ;;  %4747 = vmatprep.subr.bf16.mxu1 %v6430_v13  ;;  %v6467_v15 = vld [vmem:[#allocation17 + $0x158] ss:$28 sps:$4 sm:$0xff]  }
 0x34f   :  { %v6470_v13 = vld [vmem:[#allocation17 + $0x4d8] ss:$28 sps:$4 sm:$0xff]  }
 0x351   :  { %4707 = vmatpush2.bf16.msra.mxu0 %v6425_v16  ;;  %4748 = vmatpush2.bf16.msra.mxu1 %v6428_v17  ;;  %v6475_v16 = vld [vmem:[#allocation17 + $0x124] ss:$28 sps:$4 sm:$0xff]  }
 0x352   :  { %4708 = vmatprep.subr.bf16.mxu0 %v6433_v18  ;;  %4749 = vmatprep.subr.bf16.mxu1 %v6436_v20  ;;  %v6478_v17 = vld [vmem:[#allocation17 + $0x4a4] ss:$28 sps:$4 sm:$0xff]  }
 0x353   :  { %v6473_v18 = vld [vmem:[#allocation17 + $0x120] ss:$28 sps:$4 sm:$0xff]  }
 0x354   :  { %v6476_v20 = vld [vmem:[#allocation17 + $0x4a0] ss:$28 sps:$4 sm:$0xff]  }
 0x355   :  { %4709 = vmatpush2.bf16.msra.mxu0 %v6431_v21  ;;  %4750 = vmatpush2.bf16.msra.mxu1 %v6434_v23  ;;  %v6481_v21 = vld [vmem:[#allocation17 + $0xec] ss:$28 sps:$4 sm:$0xff]  }
 0x356   :  { %4710 = vmatprep.subr.bf16.mxu0 %v6439_v24  ;;  %4751 = vmatprep.subr.bf16.mxu1 %v6442_v25  ;;  %v6484_v23 = vld [vmem:[#allocation17 + $0x46c] ss:$28 sps:$4 sm:$0xff]  }
 0x357   :  { %v6479_v24 = vld [vmem:[#allocation17 + $0xe8] ss:$28 sps:$4 sm:$0xff]  }
 0x358   :  { %v6482_v25 = vld [vmem:[#allocation17 + $0x468] ss:$28 sps:$4 sm:$0xff]  }
 0x359   :  { %4711 = vmatpush2.bf16.msra.mxu0 %v6437_v26  ;;  %4752 = vmatpush2.bf16.msra.mxu1 %v6440_v27  ;;  %v6487_v26 = vld [vmem:[#allocation17 + $0xb4] ss:$28 sps:$4 sm:$0xff]  }
 0x35a   :  { %4712 = vmatprep.subr.bf16.mxu0 %v6445_v6  ;;  %4753 = vmatprep.subr.bf16.mxu1 %v6448_v28  ;;  %v6490_v27 = vld [vmem:[#allocation17 + $0x434] ss:$28 sps:$4 sm:$0xff]  }
 0x35b   :  { %v6485_v6 = vld [vmem:[#allocation17 + $0xb0] ss:$28 sps:$4 sm:$0xff]  }
 0x35c   :  { %v6488_v28 = vld [vmem:[#allocation17 + $0x430] ss:$28 sps:$4 sm:$0xff]  }
 0x35d   :  { %4713 = vmatpush2.bf16.msra.mxu0 %v6443_v29  ;;  %4754 = vmatpush2.bf16.msra.mxu1 %v6446_v30  ;;  %v6493_v29 = vld [vmem:[#allocation17 + $0x7c] ss:$28 sps:$4 sm:$0xff]  }
 0x35e   :  { %4714 = vmatprep.subr.bf16.mxu0 %v6451_v31  ;;  %4755 = vmatprep.subr.bf16.mxu1 %v6454_v32  ;;  %v6496_v30 = vld [vmem:[#allocation17 + $0x3fc] ss:$28 sps:$4 sm:$0xff]  }
 0x35f   :  { %v6491_v31 = vld [vmem:[#allocation17 + $0x78] ss:$28 sps:$4 sm:$0xff]  }
 0x360   :  { %v6494_v32 = vld [vmem:[#allocation17 + $0x3f8] ss:$28 sps:$4 sm:$0xff]  }
 0x361   :  { %4715 = vmatpush2.bf16.msra.mxu0 %v6449_v33  ;;  %4756 = vmatpush2.bf16.msra.mxu1 %v6452_v34  ;;  %v6499_v33 = vld [vmem:[#allocation17 + $0x44] ss:$28 sps:$4 sm:$0xff]  }
 0x362   :  { %4716 = vmatprep.subr.bf16.mxu0 %v6457_v35  ;;  %4757 = vmatprep.subr.bf16.mxu1 %v6460_v37  ;;  %v6502_v34 = vld [vmem:[#allocation17 + $0x3c4] ss:$28 sps:$4 sm:$0xff]  }
 0x363   :  { %v6497_v35 = vld [vmem:[#allocation17 + $0x40] ss:$28 sps:$4 sm:$0xff]  }
 0x364   :  { %v6500_v37 = vld [vmem:[#allocation17 + $0x3c0] ss:$28 sps:$4 sm:$0xff]  }
 0x365   :  { %4717 = vmatpush2.bf16.msra.mxu0 %v6455_v38  ;;  %4758 = vmatpush2.bf16.msra.mxu1 %v6458_v12  ;;  %v6505_v38 = vld [vmem:[#allocation17 + $0xc] ss:$28 sps:$4 sm:$0xff]  }
 0x366   :  { %4768 = vmatprep.subr.bf16.mxu0 %v6463_v41  ;;  %4809 = vmatprep.subr.bf16.mxu1 %v6466_v45  ;;  %v6508_v12 = vld [vmem:[#allocation17 + $0x38c] ss:$28 sps:$4 sm:$0xff]  }
 0x367   :  { %v6503_v41 = vld [vmem:[#allocation17 + $0x8] ss:$28 sps:$4 sm:$0xff]  }
 0x368   :  { %v6506_v45 = vld [vmem:[#allocation17 + $0x388] ss:$28 sps:$4 sm:$0xff]  }
 0x3e8   :  { %v3159_v47 = vpop.f32.mrf.mxu0  ;;  %v3200_v48 = vpop.f32.mrf.mxu1 }
 0x3e9   :  { %v3160_v49 = vadd.f32 %v3159_v47, %v7225_v46  ;;  %v3201_v7 = vadd.f32 %v3200_v48, %v7229_v39  ;;  %v6512_v47 = vld [vmem:[#allocation17 + $0x6d0] ss:$28 sps:$4 sm:$0xff]   ;;  %v6517_v48 = vld [vmem:[#allocation17 + $0x31c] ss:$28 sps:$4 sm:$0xff]  }
 0x3ea   :  { %v3161_v51 = vpop.f32.mrf.mxu0  ;;  %v3202_v52 = vpop.f32.mrf.mxu1 }
 0x3eb   :  { %v3229_v11 = vadd.f32 %v3212_v0, %v3160_v49  ;;  %v3231_v53 = vadd.f32 %v3220_v44, %v3201_v7  ;;  %v3162_v22 = vadd.f32 %v3161_v51, %v7227_v19  ;;  %v3203_v57 = vadd.f32 %v3202_v52, %v7231_v36  ;;  %v6469_v36 = vld [vmem:[#allocation17 + $0x15c] ss:$28 sps:$4 sm:$0xff]   ;;  %v6514_v0 = vld [vmem:[#allocation17 + $0x6d4] ss:$28 sps:$4 sm:$0xff]   ;;  %v6526_v51 = vld [vmem:[#allocation17 + $0x664] ss:$28 sps:$4 sm:$0xff]  }
 0x3ec   :  { %v3163_v54 = vpop.f32.mrf.mxu0  ;;  %v3204_v55 = vpop.f32.mrf.mxu1  ;;  %v6509_v44 = vld [vmem:[#allocation17 + $0x350] ss:$28 sps:$4 sm:$0xff]   ;;  %v6520_v49 = vld [vmem:[#allocation17 + $0x69c] ss:$28 sps:$4 sm:$0xff]  }
 0x3ed   :  { %v3230_v56 = vadd.f32 %v3216_v1, %v3162_v22  ;;  %v3232_v58 = vadd.f32 %v3224_v50, %v3203_v57  ;;  %v3233_v60 = vmax.f32 %v3229_v11, 0.0  ;;  %v3235_v46 = vmax.f32 %v3231_v53, 0.0  ;;  %v6515_v7 = vld [vmem:[#allocation17 + $0x318] ss:$28 sps:$4 sm:$0xff]   ;;  %v6523_v50 = vld [vmem:[#allocation17 + $0x2e4] ss:$28 sps:$4 sm:$0xff]  }
 0x3ee   :  { %v3164_v2 = vpop.f32.mrf.mxu0  ;;  %v3205_v39 = vpop.f32.mrf.mxu1  ;;  %v6518_v1 = vld [vmem:[#allocation17 + $0x698] ss:$28 sps:$4 sm:$0xff]   ;;  %v6521_v52 = vld [vmem:[#allocation17 + $0x2e0] ss:$28 sps:$4 sm:$0xff]   ;;  %v6529_v53 = vld [vmem:[#allocation17 + $0x2ac] ss:$28 sps:$4 sm:$0xff]  }
 0x3ef   :  { %v3234_v3 = vmax.f32 %v3230_v56, 0.0  ;;  %v3236_v4 = vmax.f32 %v3232_v58, 0.0  ;;  %v7248_v62 = vpack.c.bf16 %v3233_v60, %v3233_v60  ;;  %v7250_v19 = vpack.c.bf16 %v3235_v46, %v3235_v46  ;;  %v6524_v11 = vld [vmem:[#allocation17 + $0x660] ss:$28 sps:$4 sm:$0xff]   ;;  %v6532_v22 = vld [vmem:[#allocation17 + $0x62c] ss:$28 sps:$4 sm:$0xff]  }
 0x3f0   :  { %v6527_v57 = vld [vmem:[#allocation17 + $0x2a8] ss:$28 sps:$4 sm:$0xff]   ;;  %v6535_v55 = vld [vmem:[#allocation17 + $0x274] ss:$28 sps:$4 sm:$0xff]   ;;  %v6541_v46 = vld [vmem:[#allocation17 + $0x23c] ss:$28 sps:$4 sm:$0xff]  }
 0x3f1   :  { %v7244_v5 = vpack.c.bf16 %v3234_v3, %v3234_v3  ;;  %v7246_v10 = vpack.c.bf16 %v3236_v4, %v3236_v4  ;;  %v6530_v54 = vld [vmem:[#allocation17 + $0x628] ss:$28 sps:$4 sm:$0xff]   ;;  %v6538_v56 = vld [vmem:[#allocation17 + $0x5f4] ss:$28 sps:$4 sm:$0xff]   ;;  %v6544_v2 = vld [vmem:[#allocation17 + $0x5bc] ss:$28 sps:$4 sm:$0xff]  }
 0x3f2   :  { %v6533_v58 = vld [vmem:[#allocation17 + $0x270] ss:$28 sps:$4 sm:$0xff]   ;;  %v6539_v39 = vld [vmem:[#allocation17 + $0x238] ss:$28 sps:$4 sm:$0xff]   ;;  %v6547_v4 = vld [vmem:[#allocation17 + $0x204] ss:$28 sps:$4 sm:$0xff]  }
 0x3f3   :  { %4718 = vmatprep.mubr.bf16.mxu0 %v7244_v5  ;;  %4759 = vmatprep.mubr.bf16.mxu1 %v7246_v10  ;;  %v6536_v60 = vld [vmem:[#allocation17 + $0x5f0] ss:$28 sps:$4 sm:$0xff]   ;;  %v6542_v3 = vld [vmem:[#allocation17 + $0x5b8] ss:$28 sps:$4 sm:$0xff]  }
 0x3f4   :  { %4719 = vmatmul.mubr.bf16.vlgmr.msra.gmra.mxu0 %v7248_v62  ;;  %4760 = vmatmul.mubr.bf16.vlgmr.msra.gmra.mxu1 %v7250_v19 }
 0x3f5   :  { %4769 = vmatpush1.bf16.msra.mxu0 %v6461_v8  ;;  %4810 = vmatpush1.bf16.msra.mxu1 %v6464_v9  ;;  %v6550_v8 = vld [vmem:[#allocation17 + $0x584] ss:$28 sps:$4 sm:$0xff]  }
 0x3f6   :  { %4800 = vmatprep.mubr.bf16.mxu0 %v7244_v5  ;;  %4841 = vmatprep.mubr.bf16.mxu1 %v7246_v10  ;;  %v6545_v9 = vld [vmem:[#allocation17 + $0x200] ss:$28 sps:$4 sm:$0xff]  }
 0x3f7   :  { %4770 = vmatprep.subr.bf16.mxu0 %v6469_v36  ;;  %4811 = vmatprep.subr.bf16.mxu1 %v6472_v14  ;;  %v6548_v36 = vld [vmem:[#allocation17 + $0x580] ss:$28 sps:$4 sm:$0xff]   ;;  %v6553_v14 = vld [vmem:[#allocation17 + $0x1cc] ss:$28 sps:$4 sm:$0xff]  }
 0x3f9   :  { %4771 = vmatpush1.bf16.msra.mxu0 %v6467_v15  ;;  %4812 = vmatpush1.bf16.msra.mxu1 %v6470_v13  ;;  %v6556_v15 = vld [vmem:[#allocation17 + $0x54c] ss:$28 sps:$4 sm:$0xff]  }
 0x3fa   :  { %4772 = vmatprep.subr.bf16.mxu0 %v6475_v16  ;;  %4813 = vmatprep.subr.bf16.mxu1 %v6478_v17  ;;  %v6551_v13 = vld [vmem:[#allocation17 + $0x1c8] ss:$28 sps:$4 sm:$0xff]   ;;  %v6559_v17 = vld [vmem:[#allocation17 + $0x19c] ss:$28 sps:$4 sm:$0xff]  }
 0x3fb   :  { %v6554_v16 = vld [vmem:[#allocation17 + $0x548] ss:$28 sps:$4 sm:$0xff]  }
 0x3fd   :  { %4773 = vmatpush1.bf16.msra.mxu0 %v6473_v18  ;;  %4814 = vmatpush1.bf16.msra.mxu1 %v6476_v20  ;;  %v6562_v18 = vld [vmem:[#allocation17 + $0x51c] ss:$28 sps:$4 sm:$0xff]  }
 0x3fe   :  { %4774 = vmatprep.subr.bf16.mxu0 %v6481_v21  ;;  %4815 = vmatprep.subr.bf16.mxu1 %v6484_v23  ;;  %v6557_v20 = vld [vmem:[#allocation17 + $0x198] ss:$28 sps:$4 sm:$0xff]   ;;  %v6565_v23 = vld [vmem:[#allocation17 + $0x164] ss:$28 sps:$4 sm:$0xff]  }
 0x3ff   :  { %v6560_v21 = vld [vmem:[#allocation17 + $0x518] ss:$28 sps:$4 sm:$0xff]  }
 0x401   :  { %4775 = vmatpush1.bf16.msra.mxu0 %v6479_v24  ;;  %4816 = vmatpush1.bf16.msra.mxu1 %v6482_v25  ;;  %v6568_v24 = vld [vmem:[#allocation17 + $0x4e4] ss:$28 sps:$4 sm:$0xff]  }
 0x402   :  { %4776 = vmatprep.subr.bf16.mxu0 %v6487_v26  ;;  %4817 = vmatprep.subr.bf16.mxu1 %v6490_v27  ;;  %v6563_v25 = vld [vmem:[#allocation17 + $0x160] ss:$28 sps:$4 sm:$0xff]   ;;  %v6571_v27 = vld [vmem:[#allocation17 + $0x12c] ss:$28 sps:$4 sm:$0xff]  }
 0x403   :  { %v6566_v26 = vld [vmem:[#allocation17 + $0x4e0] ss:$28 sps:$4 sm:$0xff]  }
 0x405   :  { %4777 = vmatpush1.bf16.msra.mxu0 %v6485_v6  ;;  %4818 = vmatpush1.bf16.msra.mxu1 %v6488_v28  ;;  %v6574_v6 = vld [vmem:[#allocation17 + $0x4ac] ss:$28 sps:$4 sm:$0xff]  }
 0x406   :  { %4778 = vmatprep.subr.bf16.mxu0 %v6493_v29  ;;  %4819 = vmatprep.subr.bf16.mxu1 %v6496_v30  ;;  %v6569_v28 = vld [vmem:[#allocation17 + $0x128] ss:$28 sps:$4 sm:$0xff]   ;;  %v6577_v30 = vld [vmem:[#allocation17 + $0xf4] ss:$28 sps:$4 sm:$0xff]  }
 0x407   :  { %v6572_v29 = vld [vmem:[#allocation17 + $0x4a8] ss:$28 sps:$4 sm:$0xff]  }
 0x409   :  { %4779 = vmatpush1.bf16.msra.mxu0 %v6491_v31  ;;  %4820 = vmatpush1.bf16.msra.mxu1 %v6494_v32  ;;  %v6580_v31 = vld [vmem:[#allocation17 + $0x474] ss:$28 sps:$4 sm:$0xff]  }
 0x40a   :  { %4780 = vmatprep.subr.bf16.mxu0 %v6499_v33  ;;  %4821 = vmatprep.subr.bf16.mxu1 %v6502_v34  ;;  %v6575_v32 = vld [vmem:[#allocation17 + $0xf0] ss:$28 sps:$4 sm:$0xff]   ;;  %v6583_v34 = vld [vmem:[#allocation17 + $0xbc] ss:$28 sps:$4 sm:$0xff]  }
 0x40b   :  { %v6578_v33 = vld [vmem:[#allocation17 + $0x470] ss:$28 sps:$4 sm:$0xff]  }
 0x40d   :  { %4781 = vmatpush1.bf16.msra.mxu0 %v6497_v35  ;;  %4822 = vmatpush1.bf16.msra.mxu1 %v6500_v37  ;;  %v6586_v35 = vld [vmem:[#allocation17 + $0x43c] ss:$28 sps:$4 sm:$0xff]  }
 0x40e   :  { %4782 = vmatprep.subr.bf16.mxu0 %v6505_v38  ;;  %4823 = vmatprep.subr.bf16.mxu1 %v6508_v12  ;;  %v6581_v37 = vld [vmem:[#allocation17 + $0xb8] ss:$28 sps:$4 sm:$0xff]   ;;  %v6589_v12 = vld [vmem:[#allocation17 + $0x84] ss:$28 sps:$4 sm:$0xff]  }
 0x40f   :  { %v6584_v38 = vld [vmem:[#allocation17 + $0x438] ss:$28 sps:$4 sm:$0xff]  }
 0x411   :  { %4783 = vmatpush1.bf16.msra.mxu0 %v6503_v41  ;;  %4824 = vmatpush1.bf16.msra.mxu1 %v6506_v45  ;;  %v6592_v41 = vld [vmem:[#allocation17 + $0x404] ss:$28 sps:$4 sm:$0xff]  }
 0x412   :  { %4784 = vmatprep.subr.bf16.mxu0 %v6511_v43  ;;  %4825 = vmatprep.subr.bf16.mxu1 %v6514_v0  ;;  %v6587_v45 = vld [vmem:[#allocation17 + $0x80] ss:$28 sps:$4 sm:$0xff]   ;;  %v6595_v0 = vld [vmem:[#allocation17 + $0x4c] ss:$28 sps:$4 sm:$0xff]  }
 0x413   :  { %v6590_v43 = vld [vmem:[#allocation17 + $0x400] ss:$28 sps:$4 sm:$0xff]  }
 0x415   :  { %4785 = vmatpush2.bf16.msra.mxu0 %v6509_v44  ;;  %4826 = vmatpush2.bf16.msra.mxu1 %v6512_v47  ;;  %v6598_v44 = vld [vmem:[#allocation17 + $0x3cc] ss:$28 sps:$4 sm:$0xff]  }
 0x416   :  { %4786 = vmatprep.subr.bf16.mxu0 %v6517_v48  ;;  %4827 = vmatprep.subr.bf16.mxu1 %v6520_v49  ;;  %v6593_v47 = vld [vmem:[#allocation17 + $0x48] ss:$28 sps:$4 sm:$0xff]   ;;  %v6601_v49 = vld [vmem:[#allocation17 + $0x14] ss:$28 sps:$4 sm:$0xff]  }
 0x417   :  { %v6596_v48 = vld [vmem:[#allocation17 + $0x3c8] ss:$28 sps:$4 sm:$0xff]  }
 0x419   :  { %4787 = vmatpush2.bf16.msra.mxu0 %v6515_v7  ;;  %4828 = vmatpush2.bf16.msra.mxu1 %v6518_v1  ;;  %v6604_v7 = vld [vmem:[#allocation17 + $0x394] ss:$28 sps:$4 sm:$0xff]  }
 0x41a   :  { %4788 = vmatprep.subr.bf16.mxu0 %v6523_v50  ;;  %4829 = vmatprep.subr.bf16.mxu1 %v6526_v51  ;;  %v6599_v1 = vld [vmem:[#allocation17 + $0x10] ss:$28 sps:$4 sm:$0xff]   ;;  %v6607_v51 = vld [vmem:[#allocation17 + $0x35c] ss:$28 sps:$4 sm:$0xff]  }
 0x41b   :  { %v6602_v50 = vld [vmem:[#allocation17 + $0x390] ss:$28 sps:$4 sm:$0xff]  }
 0x41d   :  { %4789 = vmatpush2.bf16.msra.mxu0 %v6521_v52  ;;  %4830 = vmatpush2.bf16.msra.mxu1 %v6524_v11  ;;  %v6610_v52 = vld [vmem:[#allocation17 + $0x6dc] ss:$28 sps:$4 sm:$0xff]  }
 0x41e   :  { %4790 = vmatprep.subr.bf16.mxu0 %v6529_v53  ;;  %4831 = vmatprep.subr.bf16.mxu1 %v6532_v22  ;;  %v6605_v11 = vld [vmem:[#allocation17 + $0x358] ss:$28 sps:$4 sm:$0xff]   ;;  %v6613_v22 = vld [vmem:[#allocation17 + $0x324] ss:$28 sps:$4 sm:$0xff]  }
 0x41f   :  { %v6608_v53 = vld [vmem:[#allocation17 + $0x6d8] ss:$28 sps:$4 sm:$0xff]  }
 0x421   :  { %4791 = vmatpush2.bf16.msra.mxu0 %v6527_v57  ;;  %4832 = vmatpush2.bf16.msra.mxu1 %v6530_v54  ;;  %v6616_v57 = vld [vmem:[#allocation17 + $0x6a4] ss:$28 sps:$4 sm:$0xff]  }
 0x422   :  { %4792 = vmatprep.subr.bf16.mxu0 %v6535_v55  ;;  %4833 = vmatprep.subr.bf16.mxu1 %v6538_v56  ;;  %v6611_v54 = vld [vmem:[#allocation17 + $0x320] ss:$28 sps:$4 sm:$0xff]   ;;  %v6619_v56 = vld [vmem:[#allocation17 + $0x2ec] ss:$28 sps:$4 sm:$0xff]  }
 0x423   :  { %v6614_v55 = vld [vmem:[#allocation17 + $0x6a0] ss:$28 sps:$4 sm:$0xff]  }
 0x425   :  { %4793 = vmatpush2.bf16.msra.mxu0 %v6533_v58  ;;  %4834 = vmatpush2.bf16.msra.mxu1 %v6536_v60  ;;  %v6622_v58 = vld [vmem:[#allocation17 + $0x66c] ss:$28 sps:$4 sm:$0xff]  }
 0x426   :  { %4794 = vmatprep.subr.bf16.mxu0 %v6541_v46  ;;  %4835 = vmatprep.subr.bf16.mxu1 %v6544_v2  ;;  %v6617_v60 = vld [vmem:[#allocation17 + $0x2e8] ss:$28 sps:$4 sm:$0xff]   ;;  %v6625_v2 = vld [vmem:[#allocation17 + $0x2b4] ss:$28 sps:$4 sm:$0xff]  }
 0x427   :  { %v6620_v46 = vld [vmem:[#allocation17 + $0x668] ss:$28 sps:$4 sm:$0xff]  }
 0x429   :  { %4795 = vmatpush2.bf16.msra.mxu0 %v6539_v39  ;;  %4836 = vmatpush2.bf16.msra.mxu1 %v6542_v3  ;;  %v6628_v39 = vld [vmem:[#allocation17 + $0x634] ss:$28 sps:$4 sm:$0xff]  }
 0x42a   :  { %4796 = vmatprep.subr.bf16.mxu0 %v6547_v4  ;;  %4837 = vmatprep.subr.bf16.mxu1 %v6550_v8  ;;  %v6623_v3 = vld [vmem:[#allocation17 + $0x2b0] ss:$28 sps:$4 sm:$0xff]   ;;  %v6631_v8 = vld [vmem:[#allocation17 + $0x27c] ss:$28 sps:$4 sm:$0xff]  }
 0x42b   :  { %v6626_v4 = vld [vmem:[#allocation17 + $0x630] ss:$28 sps:$4 sm:$0xff]  }
 0x42d   :  { %4797 = vmatpush2.bf16.msra.mxu0 %v6545_v9  ;;  %4838 = vmatpush2.bf16.msra.mxu1 %v6548_v36  ;;  %v6634_v9 = vld [vmem:[#allocation17 + $0x5fc] ss:$28 sps:$4 sm:$0xff]  }
 0x42e   :  { %4798 = vmatprep.subr.bf16.mxu0 %v6553_v14  ;;  %4839 = vmatprep.subr.bf16.mxu1 %v6556_v15  ;;  %v6629_v36 = vld [vmem:[#allocation17 + $0x278] ss:$28 sps:$4 sm:$0xff]   ;;  %v6637_v15 = vld [vmem:[#allocation17 + $0x244] ss:$28 sps:$4 sm:$0xff]  }
 0x42f   :  { %v6632_v14 = vld [vmem:[#allocation17 + $0x5f8] ss:$28 sps:$4 sm:$0xff]  }
 0x431   :  { %4799 = vmatpush2.bf16.msra.mxu0 %v6551_v13  ;;  %4840 = vmatpush2.bf16.msra.mxu1 %v6554_v16  ;;  %v6640_v13 = vld [vmem:[#allocation17 + $0x5c4] ss:$28 sps:$4 sm:$0xff]  }
 0x432   :  { %4850 = vmatprep.subr.bf16.mxu0 %v6559_v17  ;;  %4891 = vmatprep.subr.bf16.mxu1 %v6562_v18  ;;  %v6635_v16 = vld [vmem:[#allocation17 + $0x240] ss:$28 sps:$4 sm:$0xff]   ;;  %v6643_v18 = vld [vmem:[#allocation17 + $0x20c] ss:$28 sps:$4 sm:$0xff]  }
 0x433   :  { %v6638_v17 = vld [vmem:[#allocation17 + $0x5c0] ss:$28 sps:$4 sm:$0xff]  }
 0x434   :  { %4801 = vmatmul.mubr.bf16.vlgmr.msra.gmra.mxu0 %v7248_v62  ;;  %4842 = vmatmul.mubr.bf16.vlgmr.msra.gmra.mxu1 %v7250_v19 }
 0x435   :  { %4851 = vmatpush1.bf16.msra.mxu0 %v6557_v20  ;;  %4882 = vmatprep.mubr.bf16.mxu0 %v7244_v5  ;;  %v6646_v20 = vld [vmem:[#allocation17 + $0x58c] ss:$28 sps:$4 sm:$0xff]  }
 0x436   :  { %4892 = vmatpush1.bf16.msra.mxu1 %v6560_v21  ;;  %4923 = vmatprep.mubr.bf16.mxu1 %v7246_v10  ;;  %v6641_v21 = vld [vmem:[#allocation17 + $0x208] ss:$28 sps:$4 sm:$0xff]  }
 0x437   :  { %4852 = vmatprep.subr.bf16.mxu0 %v6565_v23  ;;  %4893 = vmatprep.subr.bf16.mxu1 %v6568_v24  ;;  %v6644_v23 = vld [vmem:[#allocation17 + $0x588] ss:$28 sps:$4 sm:$0xff]   ;;  %v6649_v24 = vld [vmem:[#allocation17 + $0x1d4] ss:$28 sps:$4 sm:$0xff]  }
 0x439   :  { %4853 = vmatpush1.bf16.msra.mxu0 %v6563_v25  ;;  %v6652_v25 = vld [vmem:[#allocation17 + $0x554] ss:$28 sps:$4 sm:$0xff]  }
 0x43a   :  { %4894 = vmatpush1.bf16.msra.mxu1 %v6566_v26  ;;  %4854 = vmatprep.subr.bf16.mxu0 %v6571_v27  ;;  %v6647_v26 = vld [vmem:[#allocation17 + $0x1d0] ss:$28 sps:$4 sm:$0xff]  }
 0x43b   :  { %4895 = vmatprep.subr.bf16.mxu1 %v6574_v6  ;;  %v6650_v27 = vld [vmem:[#allocation17 + $0x550] ss:$28 sps:$4 sm:$0xff]   ;;  %v6653_v6 = vld [vmem:[#allocation17 + $0x360] ss:$28 sps:$4 sm:$0xff]  }
 0x43d   :  { %4855 = vmatpush1.bf16.msra.mxu0 %v6569_v28  ;;  %v6654_v28 = vld [vmem:[#allocation17 + $0x6e0] ss:$28 sps:$4 sm:$0xff]  }
 0x43e   :  { %4896 = vmatpush1.bf16.msra.mxu1 %v6572_v29  ;;  %4856 = vmatprep.subr.bf16.mxu0 %v6577_v30  ;;  %v6655_v29 = vld [vmem:[#allocation17 + $0x1a0] ss:$28 sps:$4 sm:$0xff]  }
 0x43f   :  { %4897 = vmatprep.subr.bf16.mxu1 %v6580_v31  ;;  %v6656_v30 = vld [vmem:[#allocation17 + $0x520] ss:$28 sps:$4 sm:$0xff]   ;;  %v6657_v31 = vld [vmem:[#allocation17 + $0x328] ss:$28 sps:$4 sm:$0xff]  }
 0x441   :  { %4857 = vmatpush1.bf16.msra.mxu0 %v6575_v32  ;;  %v6658_v32 = vld [vmem:[#allocation17 + $0x6a8] ss:$28 sps:$4 sm:$0xff]  }
 0x442   :  { %4898 = vmatpush1.bf16.msra.mxu1 %v6578_v33  ;;  %4858 = vmatprep.subr.bf16.mxu0 %v6583_v34  ;;  %v6659_v33 = vld [vmem:[#allocation17 + $0x168] ss:$28 sps:$4 sm:$0xff]  }
 0x443   :  { %4899 = vmatprep.subr.bf16.mxu1 %v6586_v35  ;;  %v6660_v34 = vld [vmem:[#allocation17 + $0x4e8] ss:$28 sps:$4 sm:$0xff]   ;;  %v6661_v35 = vld [vmem:[#allocation17 + $0x2f0] ss:$28 sps:$4 sm:$0xff]  }
 0x445   :  { %4859 = vmatpush1.bf16.msra.mxu0 %v6581_v37  ;;  %v6662_v37 = vld [vmem:[#allocation17 + $0x670] ss:$28 sps:$4 sm:$0xff]  }
 0x446   :  { %4900 = vmatpush1.bf16.msra.mxu1 %v6584_v38  ;;  %4860 = vmatprep.subr.bf16.mxu0 %v6589_v12  ;;  %v6663_v38 = vld [vmem:[#allocation17 + $0x130] ss:$28 sps:$4 sm:$0xff]  }
 0x447   :  { %4901 = vmatprep.subr.bf16.mxu1 %v6592_v41  ;;  %v6664_v12 = vld [vmem:[#allocation17 + $0x4b0] ss:$28 sps:$4 sm:$0xff]   ;;  %v6665_v41 = vld [vmem:[#allocation17 + $0x2b8] ss:$28 sps:$4 sm:$0xff]  }
 0x449   :  { %4861 = vmatpush1.bf16.msra.mxu0 %v6587_v45  ;;  %v6666_v45 = vld [vmem:[#allocation17 + $0x638] ss:$28 sps:$4 sm:$0xff]  }
 0x44a   :  { %4902 = vmatpush1.bf16.msra.mxu1 %v6590_v43  ;;  %4862 = vmatprep.subr.bf16.mxu0 %v6595_v0  ;;  %v6667_v43 = vld [vmem:[#allocation17 + $0xf8] ss:$28 sps:$4 sm:$0xff]   ;;  %v6669_v0 = vld [vmem:[#allocation17 + $0x280] ss:$28 sps:$4 sm:$0xff]  }
 0x44b   :  { %4903 = vmatprep.subr.bf16.mxu1 %v6598_v44  ;;  %v6670_v44 = vld [vmem:[#allocation17 + $0x600] ss:$28 sps:$4 sm:$0xff]  }
 0x44d   :  { %4863 = vmatpush1.bf16.msra.mxu0 %v6593_v47  ;;  %v6672_v47 = vld [vmem:[#allocation17 + $0x440] ss:$28 sps:$4 sm:$0xff]  }
 0x44e   :  { %4904 = vmatpush1.bf16.msra.mxu1 %v6596_v48  ;;  %4864 = vmatprep.subr.bf16.mxu0 %v6601_v49  ;;  %v6673_v48 = vld [vmem:[#allocation17 + $0x248] ss:$28 sps:$4 sm:$0xff]  }
 0x44f   :  { %4905 = vmatprep.subr.bf16.mxu1 %v6604_v7  ;;  %v6674_v49 = vld [vmem:[#allocation17 + $0x5c8] ss:$28 sps:$4 sm:$0xff]  }
 0x450   :  { %v6675_v7 = vld [vmem:[#allocation17 + $0x88] ss:$28 sps:$4 sm:$0xff]  }
 0x451   :  { %4865 = vmatpush1.bf16.msra.mxu0 %v6599_v1  ;;  %v6676_v1 = vld [vmem:[#allocation17 + $0x408] ss:$28 sps:$4 sm:$0xff]  }
 0x452   :  { %4906 = vmatpush1.bf16.msra.mxu1 %v6602_v50  ;;  %4866 = vmatprep.subr.bf16.mxu0 %v6607_v51  ;;  %v6677_v50 = vld [vmem:[#allocation17 + $0x210] ss:$28 sps:$4 sm:$0xff]  }
 0x453   :  { %4907 = vmatprep.subr.bf16.mxu1 %v6610_v52  ;;  %v6678_v51 = vld [vmem:[#allocation17 + $0x590] ss:$28 sps:$4 sm:$0xff]  }
 0x454   :  { %v6679_v52 = vld [vmem:[#allocation17 + $0x50] ss:$28 sps:$4 sm:$0xff]  }
 0x455   :  { %4867 = vmatpush2.bf16.msra.mxu0 %v6605_v11  ;;  %v6680_v11 = vld [vmem:[#allocation17 + $0x3d0] ss:$28 sps:$4 sm:$0xff]  }
 0x456   :  { %4908 = vmatpush2.bf16.msra.mxu1 %v6608_v53  ;;  %4868 = vmatprep.subr.bf16.mxu0 %v6613_v22  ;;  %v6681_v53 = vld [vmem:[#allocation17 + $0x1d8] ss:$28 sps:$4 sm:$0xff]  }
 0x457   :  { %4909 = vmatprep.subr.bf16.mxu1 %v6616_v57  ;;  %v6682_v22 = vld [vmem:[#allocation17 + $0x558] ss:$28 sps:$4 sm:$0xff]  }
 0x458   :  { %v6683_v57 = vld [vmem:[#allocation17 + $0x18] ss:$28 sps:$4 sm:$0xff]  }
 0x459   :  { %4869 = vmatpush2.bf16.msra.mxu0 %v6611_v54  ;;  %v6684_v54 = vld [vmem:[#allocation17 + $0x398] ss:$28 sps:$4 sm:$0xff]  }
 0x45a   :  { %4910 = vmatpush2.bf16.msra.mxu1 %v6614_v55  ;;  %4870 = vmatprep.subr.bf16.mxu0 %v6619_v56  ;;  %v7271_v55 = vld [vmem:[%s7308_s12] sm:$0xff]  ;;  %s7008_s12 = smov [#allocation20]  }
 0x45b   :  { %4911 = vmatprep.subr.bf16.mxu1 %v6622_v58  ;;  %v3502_v56 = vrot.slane %v7271_v55, %v7189_v61  ;;  %v3506_v58 = vrot.slane %v7271_v55, %v7197_v63  ;;  %s5079_s20 = sshll.u32 %s7008_s12, 4  ;;  %s5080_s20 = int_to_ptr.vmem [resolvable:$true] %s5079_s20 }
 0x45c   :  { %s6915_s22 = scalar_lea.vmem %s5080_s20, 128  ;;  %p6920_p9 = scmp.lt.s32.totalorder %s5080_s20, %s5080_s20 }
 0x45d   :  { %4871 = vmatpush2.bf16.msra.mxu0 %v6617_v60  ;;  %p6916_p8 = scmp.ne.s32.totalorder %s5080_s20, %s6915_s22  ;;  %p6921_p10 = scmp.lt.s32.totalorder %s6915_s22, %s6915_s22 }
 0x45e   :  { %4912 = vmatpush2.bf16.msra.mxu1 %v6620_v46  ;;  %4872 = vmatprep.subr.bf16.mxu0 %v6625_v2 }
 0x45f   :  { %4913 = vmatprep.subr.bf16.mxu1 %v6628_v39  ;;  %p6922_p11 = por %p6921_p10, %p6920_p9 }
 0x461   :  { %4873 = vmatpush2.bf16.msra.mxu0 %v6623_v3  ;;  %p6923_p12 = pnand %p6922_p11, %p6916_p8 }
 0x462   :  { %4914 = vmatpush2.bf16.msra.mxu1 %v6626_v4  ;;  %4874 = vmatprep.subr.bf16.mxu0 %v6631_v8 }
 0x463   :  { %4915 = vmatprep.subr.bf16.mxu1 %v6634_v9 }
 0x465   :  { %4875 = vmatpush2.bf16.msra.mxu0 %v6629_v36 }
 0x466   :  { %4916 = vmatpush2.bf16.msra.mxu1 %v6632_v14  ;;  %4876 = vmatprep.subr.bf16.mxu0 %v6637_v15 }
 0x467   :  { %4917 = vmatprep.subr.bf16.mxu1 %v6640_v13 }
 0x469   :  { %4877 = vmatpush2.bf16.msra.mxu0 %v6635_v16 }
 0x46a   :  { %4918 = vmatpush2.bf16.msra.mxu1 %v6638_v17  ;;  %4878 = vmatprep.subr.bf16.mxu0 %v6643_v18 }
 0x46b   :  { %4919 = vmatprep.subr.bf16.mxu1 %v6646_v20 }
 0x46d   :  { %4879 = vmatpush2.bf16.msra.mxu0 %v6641_v21  ;;  %v3510_v21 = vrot.slane %v7271_v55, %v7208_v40 }
 0x46e   :  { %4920 = vmatpush2.bf16.msra.mxu1 %v6644_v23  ;;  %4880 = vmatprep.subr.bf16.mxu0 %v6649_v24  ;;  %v3514_v23 = vrot.slane %v7271_v55, %v7212_v42 }
 0x46f   :  { %4921 = vmatprep.subr.bf16.mxu1 %v6652_v25 }
 0x471   :  { %4881 = vmatpush2.bf16.msra.mxu0 %v6647_v26 }
 0x472   :  { %4922 = vmatpush2.bf16.msra.mxu1 %v6650_v27  ;;  %5725 = vmatprep.subr.bf16.mxu0 %v6653_v6 }
 0x473   :  { %5747 = vmatprep.subr.bf16.mxu1 %v6654_v28 }
 0x474   :  { %4883 = vmatmul.mubr.bf16.vlgmr.msra.gmra.mxu0 %v7248_v62 }
 0x475   :  { %4924 = vmatmul.mubr.bf16.vlgmr.msra.gmra.mxu1 %v7250_v19  ;;  %5726 = vmatpush3.bf16.msra.mxu0 %v6655_v29 }
 0x476   :  { %4964 = vmatprep.mubr.bf16.mxu0 %v7244_v5  ;;  %5748 = vmatpush3.bf16.msra.mxu1 %v6656_v30  ;;  %v6668_v5 = vld [vmem:[#allocation17 + $0x478] ss:$28 sps:$4 sm:$0xff]  }
 0x477   :  { %5004 = vmatprep.mubr.bf16.mxu1 %v7246_v10  ;;  %5727 = vmatprep.subr.bf16.mxu0 %v6657_v31  ;;  %v6671_v10 = vld [vmem:[#allocation17 + $0xc0] ss:$28 sps:$4 sm:$0xff]  }
 0x478   :  { %5749 = vmatprep.subr.bf16.mxu1 %v6658_v32 }
 0x479   :  { %5728 = vmatpush3.bf16.msra.mxu0 %v6659_v33 }
 0x47a   :  { %5750 = vmatpush3.bf16.msra.mxu1 %v6660_v34  ;;  %5729 = vmatprep.subr.bf16.mxu0 %v6661_v35 }
 0x47b   :  { %5751 = vmatprep.subr.bf16.mxu1 %v6662_v37 }
 0x47d   :  { %5730 = vmatpush3.bf16.msra.mxu0 %v6663_v38 }
 0x47e   :  { %5752 = vmatpush3.bf16.msra.mxu1 %v6664_v12  ;;  %5731 = vmatprep.subr.bf16.mxu0 %v6665_v41 }
 0x47f   :  { %5753 = vmatprep.subr.bf16.mxu1 %v6666_v45 }
 0x481   :  { %5732 = vmatpush3.bf16.msra.mxu0 %v6667_v43 }
 0x482   :  { %5754 = vmatpush3.bf16.msra.mxu1 %v6668_v5  ;;  %5733 = vmatprep.subr.bf16.mxu0 %v6669_v0 }
 0x483   :  { %5755 = vmatprep.subr.bf16.mxu1 %v6670_v44 }
 0x485   :  { %5734 = vmatpush3.bf16.msra.mxu0 %v6671_v10 }
 0x486   :  { %5756 = vmatpush3.bf16.msra.mxu1 %v6672_v47  ;;  %5735 = vmatprep.subr.bf16.mxu0 %v6673_v48 }
 0x487   :  { %5757 = vmatprep.subr.bf16.mxu1 %v6674_v49 }
 0x489   :  { %5736 = vmatpush3.bf16.msra.mxu0 %v6675_v7 }
 0x48a   :  { %5758 = vmatpush3.bf16.msra.mxu1 %v6676_v1  ;;  %5737 = vmatprep.subr.bf16.mxu0 %v6677_v50 }
 0x48b   :  { %5759 = vmatprep.subr.bf16.mxu1 %v6678_v51 }
 0x48d   :  { %5738 = vmatpush3.bf16.msra.mxu0 %v6679_v52 }
 0x48e   :  { %5760 = vmatpush3.bf16.msra.mxu1 %v6680_v11  ;;  %5739 = vmatprep.subr.bf16.mxu0 %v6681_v53 }
 0x48f   :  { %5761 = vmatprep.subr.bf16.mxu1 %v6682_v22 }
 0x491   :  { %5740 = vmatpush3.bf16.msra.mxu0 %v6683_v57 }
 0x492   :  { %5762 = vmatpush3.bf16.msra.mxu1 %v6684_v54 }
 0x494   :  { %4965 = vmatmul.mubr.bf16.vlgmr.msra.gmra.mxu0 %v7248_v62 }
 0x495   :  { %5005 = vmatmul.mubr.bf16.vlgmr.msra.gmra.mxu1 %v7250_v19 }
 0x4b4   :  { %v4720_v60 = vpop.f32.mrf.mxu0  ;;  %v4761_v46 = vpop.f32.mrf.mxu1 }
 0x4b5   :  { %v4721_v2 = vadd.f32 %v4720_v60, %v3502_v56 }
 0x4b6   :  { %v4722_v39 = vpop.f32.mrf.mxu0  ;;  %v4763_v3 = vpop.f32.mrf.mxu1 }
 0x4b7   :  { %v4762_v4 = vadd.f32 %v4761_v46, %v4721_v2  ;;  %v4723_v62 = vadd.f32 %v4722_v39, %v3506_v58 }
 0x4b8   :  { %v4724_v8 = vpop.f32.mrf.mxu0  ;;  %v4765_v19 = vpop.f32.mrf.mxu1 }
 0x4b9   :  { %v5718_v9 = vmul.f32 -1.442695, %v4762_v4  ;;  %v4764_v36 = vadd.f32 %v4763_v3, %v4723_v62 }
 0x4ba   :  { %v4725_v14 = vpop.f32.mrf.mxu0  ;;  %v4766_v15 = vpop.f32.mrf.mxu1 }
 0x4bb   :  { %6687 = vpow2.f32 %v5718_v9  ;;  %v5719_v13 = vmul.f32 -1.442695, %v4764_v36 }
 0x4bd   :  { %6689 = vpow2.f32 %v5719_v13 }
 0x4c8   :  { %v6688_v61 = vpop.eup %6687 }
 0x4c9   :  { %v5033_v16 = vadd.f32 1.0, %v6688_v61 }
 0x4ca   :  { %v6690_v17 = vpop.eup %6689 }
 0x4cb   :  { %6691 = vrcp.f32 %v5033_v16  ;;  %v5034_v63 = vadd.f32 1.0, %v6690_v17 }
 0x4cd   :  { %6693 = vrcp.f32 %v5034_v63 }
 0x4d8   :  { %v6692_v18 = vpop.eup %6691 }
 0x4d9   :  { %5054 = vst [vmem:[#allocation19] sm:$0xff] %v6692_v18 }
 0x4da   :  { %v6694_v20 = vpop.eup %6693 }
 0x4db   :  { %5055 = vst [vmem:[#allocation19 + $0x8] sm:$0xff] %v6694_v20 }
 0x4f4   :  { %v4802_v24 = vpop.f32.mrf.mxu0  ;;  %v4843_v25 = vpop.f32.mrf.mxu1 }
 0x4f5   :  { %v4803_v26 = vadd.f32 %v4802_v24, %v3510_v21 }
 0x4f6   :  { %v4804_v27 = vpop.f32.mrf.mxu0  ;;  %v4845_v6 = vpop.f32.mrf.mxu1 }
 0x4f7   :  { %v4844_v28 = vadd.f32 %v4843_v25, %v4803_v26  ;;  %v4805_v29 = vadd.f32 %v4804_v27, %v3514_v23 }
 0x4f8   :  { %v4806_v30 = vpop.f32.mrf.mxu0  ;;  %v4847_v31 = vpop.f32.mrf.mxu1 }
 0x4f9   :  { %v5720_v32 = vmul.f32 -1.442695, %v4844_v28  ;;  %v4846_v33 = vadd.f32 %v4845_v6, %v4805_v29 }
 0x4fa   :  { %v4807_v34 = vpop.f32.mrf.mxu0  ;;  %v4848_v35 = vpop.f32.mrf.mxu1 }
 0x4fb   :  { %6695 = vpow2.f32 %v5720_v32  ;;  %v5721_v37 = vmul.f32 -1.442695, %v4846_v33 }
 0x4fd   :  { %6697 = vpow2.f32 %v5721_v37 }
 0x4fe   :  { %6926 = shalt.err (!%p6923_p12)
}
 0x4ff   :  { %5082 = dma.vmem_to_hbm [thread:$0]  %s5080_s20, 128, %s7310_s14, [#allocation21]  }
 0x500   :  { %s7009_s3 = smov [#allocation22]  }
 0x501   :  { %s5089_s21 = sshll.u32 %s7009_s3, 4  ;;  %s5090_s21 = int_to_ptr.vmem [resolvable:$true] %s5089_s21 }
 0x502   :  { %s6935_s24 = scalar_lea.vmem %s5090_s21, 128  ;;  %p6940_p0 = scmp.lt.s32.totalorder %s5090_s21, %s5090_s21 }
 0x503   :  { %p6936_p13 = scmp.ne.s32.totalorder %s5090_s21, %s6935_s24  ;;  %p6941_p1 = scmp.lt.s32.totalorder %s6935_s24, %s6935_s24 }
 0x505   :  { %p6942_p2 = por %p6941_p1, %p6940_p0 }
 0x507   :  { %p6943_p3 = pnand %p6942_p2, %p6936_p13 }
 0x509   :  { %6946 = shalt.err (!%p6943_p3)
}
 0x50a   :  { %5092 = dma.vmem_to_hbm [thread:$0]  %s5090_s21, 128, %s7311_s15, [#allocation21]   ;;  %v6696_v40 = vpop.eup %6695  ;;  %v3517_v43 = vsub.s32 4, %v7184_v59  ;;  %v3521_v5 = vsub.s32 5, %v7184_v59  ;;  %v3525_v2 = vsub.s32 6, %v7184_v59 }
 0x50b   :  { %v5035_v42 = vadd.f32 1.0, %v6696_v40  ;;  %v6698_v38 = vpop.eup %6697  ;;  %s7010_s14 = smov [#allocation19]  }
 0x50c   :  { %v5036_v12 = vadd.f32 1.0, %v6698_v38  ;;  %v3518_v0 = vrot.slane %v7271_v55, %v3517_v43  ;;  %v3522_v44 = vrot.slane %v7271_v55, %v3521_v5  ;;  %v3526_v4 = vrot.slane %v7271_v55, %v3525_v2  ;;  %s5069_s15 = sshll.u32 %s7010_s14, 4  ;;  %s5070_s15 = int_to_ptr.vmem [resolvable:$true] %s5069_s15 }
 0x50d   :  { %6699 = vrcp.f32 %v5035_v42  ;;  %s6955_s28 = scalar_lea.vmem %s5070_s15, 896  ;;  %p6960_p5 = scmp.lt.s32.totalorder %s5070_s15, %s5070_s15 }
 0x50e   :  { %6701 = vrcp.f32 %v5036_v12  ;;  %p6956_p4 = scmp.ne.s32.totalorder %s5070_s15, %s6955_s28  ;;  %p6961_p6 = scmp.lt.s32.totalorder %s6955_s28, %s6955_s28 }
 0x510   :  { %p6962_p7 = por %p6961_p6, %p6960_p5 }
 0x512   :  { %p6963_p8 = pnand %p6962_p7, %p6956_p4 }
 0x51a   :  { %v6700_v41 = vpop.eup %6699 }
 0x51b   :  { %5056 = vst [vmem:[#allocation19 + $0x10] sm:$0xff] %v6700_v41  ;;  %v6702_v45 = vpop.eup %6701 }
 0x51c   :  { %5057 = vst [vmem:[#allocation19 + $0x18] sm:$0xff] %v6702_v45 }
 0x534   :  { %v4884_v10 = vpop.f32.mrf.mxu0 }
 0x535   :  { %v4885_v47 = vadd.f32 %v4884_v10, %v3518_v0  ;;  %v4925_v48 = vpop.f32.mrf.mxu1 }
 0x536   :  { %v4886_v49 = vpop.f32.mrf.mxu0 }
 0x537   :  { %v4926_v7 = vadd.f32 %v4925_v48, %v4885_v47  ;;  %v4887_v1 = vadd.f32 %v4886_v49, %v3522_v44  ;;  %v4927_v50 = vpop.f32.mrf.mxu1 }
 0x538   :  { %v4888_v51 = vpop.f32.mrf.mxu0 }
 0x539   :  { %v5722_v52 = vmul.f32 -1.442695, %v4926_v7  ;;  %v4928_v11 = vadd.f32 %v4927_v50, %v4887_v1  ;;  %v4929_v53 = vpop.f32.mrf.mxu1 }
 0x53a   :  { %v4889_v22 = vpop.f32.mrf.mxu0 }
 0x53b   :  { %6703 = vpow2.f32 %v5722_v52  ;;  %v5723_v57 = vmul.f32 -1.442695, %v4928_v11  ;;  %v4930_v54 = vpop.f32.mrf.mxu1 }
 0x53d   :  { %6705 = vpow2.f32 %v5723_v57 }
 0x548   :  { %v6704_v56 = vpop.eup %6703 }
 0x549   :  { %v5037_v58 = vadd.f32 1.0, %v6704_v56 }
 0x54a   :  { %v6706_v60 = vpop.eup %6705 }
 0x54b   :  { %6707 = vrcp.f32 %v5037_v58  ;;  %v5038_v46 = vadd.f32 1.0, %v6706_v60 }
 0x54d   :  { %6709 = vrcp.f32 %v5038_v46 }
 0x554   :  { %v5741_v39 = vpop.f32.mrf.mxu0 }
 0x555   :  { %v5763_v3 = vpop.f32.mrf.mxu1 }
 0x556   :  { %v5742_v62 = vpop.f32.mrf.mxu0 }
 0x557   :  { %v5743_v8 = vadd.f32 %v5742_v62, %v5741_v39  ;;  %v5764_v19 = vpop.f32.mrf.mxu1 }
 0x558   :  { %v6708_v9 = vpop.eup %6707  ;;  %v5744_v36 = vpop.f32.mrf.mxu0  ;;  %v5765_v15 = vadd.f32 %v5764_v19, %v5763_v3 }
 0x559   :  { %5058 = vst [vmem:[#allocation19 + $0x20] sm:$0xff] %v6708_v9  ;;  %v4967_v14 = vadd.f32 %v5743_v8, %v3526_v4  ;;  %v5766_v13 = vpop.f32.mrf.mxu1 }
 0x55a   :  { %v6710_v61 = vpop.eup %6709  ;;  %v5745_v16 = vpop.f32.mrf.mxu0 }
 0x55b   :  { %5059 = vst [vmem:[#allocation19 + $0x28] sm:$0xff] %v6710_v61  ;;  %v5007_v17 = vadd.f32 %v5765_v15, %v4967_v14  ;;  %v5767_v63 = vpop.f32.mrf.mxu1 }
 0x55d   :  { %v5724_v18 = vmul.f32 -1.442695, %v5007_v17 }
 0x55f   :  { %6711 = vpow2.f32 %v5724_v18 }
 0x56c   :  { %v6712_v59 = vpop.eup %6711 }
 0x56d   :  { %v5039_v20 = vadd.f32 1.0, %v6712_v59 }
 0x56f   :  { %6713 = vrcp.f32 %v5039_v20 }
 0x57c   :  { %v6714_v55 = vpop.eup %6713 }
 0x57d   :  { %5060 = vst [vmem:[#allocation19 + $0x30] sm:$0xff] %v6714_v55 }
 0x57e   :  { %6966 = shalt.err (!%p6963_p8)
}
 0x57f   :  { %5072 = dma.vmem_to_hbm [thread:$0]  %s5070_s15, 896, %s7309_s13, [#allocation4]  }
 0x580   :  { %6987 = dma.done.wait [#allocation4], 896  }
 0x581   :  { %6988 = vsyncadd [#allocation4], 4294966400 }
 0x582   :  { %6989 = dma.done.wait [#allocation21], 256  }
 0x583   :  { %6990 = vsyncadd [#allocation21], 4294967040 }
 0x584   :  { %5102 = vsyncpa [#allocation3], 1 }
 0x585   :  { %5103 = vsyncpa [#allocation6], 1 }
 0x586   :  { %5104 = vsyncpa [#allocation9], 1 }
 0x587   :  { %5105 = vsyncpa [#allocation12], 1 }
 0x588   :  { %5106 = vsyncpa [#allocation15], 1 }
 0x589   :  { %5107 = vsyncpa [#allocation18], 1 }
 0x58a   :  { %5108 = vsyncpa [#allocation4], 1 }
 0x58b   :  { %5109 = vsyncpa [#allocation21], 1 }

</bundles_post_ra>
